<compile_context>
chip_gen: v7x
topology: tpu7x:2x2x1
jax: 0.10.0
libtpu: 0.0.40
codegen_flags: <defaults>
</compile_context>

<pallas_src>
import math

import jax
import jax.numpy as jnp
from jax import lax
from jax.experimental import pallas as pl
from jax.experimental.pallas import tpu as pltpu

LEAKY_SLOPE = 0.2
INV_SQRT2 = 1.0 / math.sqrt(2.0)


def _leaky_relu(v):
    return jnp.where(v >= 0, v, LEAKY_SLOPE * v)


def _block_kernel(xpad_ref, w1_ref, b1_ref, w2_ref, b2_ref, wproj_ref, bproj_ref,
                  sel_ref, out_ref, y1pad_ref):
    # Per grid step (= one batch element):
    #   xpad_ref  : (1, H+2, W+2, Cin)  zero-padded NHWC input
    #   w1_ref    : (9, Cin, Cp)        conv1 taps (tap-major)
    #   b1_ref    : (1, Cp)
    #   w2_ref    : (9, Cp, Cp)         conv2 taps
    #   b2_ref    : (1, Cp)
    #   wproj_ref : (Cin, Cp)           1x1 projection
    #   bproj_ref : (1, Cp)
    #   sel_ref   : (Ho*Wo, H*W)        constant stride-2 selection matrix
    #   out_ref   : (1, Ho, Wo, Cp)
    #   y1pad_ref : (H+2, W+2, Cp)      VMEM scratch (padded conv1 activation)
    _, hpad, wpad, cin = xpad_ref.shape
    h, w = hpad - 2, wpad - 2
    _, ho, wo, cp = out_ref.shape

    # ---- conv1: 3x3, stride 1 (padding already applied to x) -> LeakyReLU ----
    acc1 = jnp.zeros((h * w, cp), jnp.float32)
    for kh in range(3):
        for kw in range(3):
            patch = xpad_ref[0, kh:kh + h, kw:kw + w, :].reshape(h * w, cin)
            acc1 = acc1 + jnp.dot(patch, w1_ref[kh * 3 + kw],
                                  preferred_element_type=jnp.float32)
    y1 = _leaky_relu(acc1 + b1_ref[...])                       # (H*W, Cp)

    # ---- keep the conv1 activation in VMEM, zero-padded for conv2 ----
    y1pad_ref[...] = jnp.zeros_like(y1pad_ref)
    y1pad_ref[1:h + 1, 1:w + 1, :] = y1.reshape(h, w, cp)

    # ---- conv2: 3x3 taps evaluated on the dense (stride-1) grid ----
    acc2 = jnp.zeros((h * w, cp), jnp.float32)
    for kh in range(3):
        for kw in range(3):
            patch = y1pad_ref[kh:kh + h, kw:kw + w, :].reshape(h * w, cp)
            acc2 = acc2 + jnp.dot(patch, w2_ref[kh * 3 + kw],
                                  preferred_element_type=jnp.float32)
    y2 = _leaky_relu(acc2 + b2_ref[...])                       # (H*W, Cp)

    # ---- 1x1 projection of the input (dense grid as well) ----
    xc = xpad_ref[0, 1:h + 1, 1:w + 1, :].reshape(h * w, cin)
    ident = jnp.dot(xc, wproj_ref[...],
                    preferred_element_type=jnp.float32) + bproj_ref[...]

    dense = (y2 + ident) * INV_SQRT2                           # (H*W, Cp)

    # ---- stride-2 subsampling of both branches as one selection matmul ----
    out = jnp.dot(sel_ref[...], dense, preferred_element_type=jnp.float32)
    out_ref[0] = out.reshape(ho, wo, cp).astype(out_ref.dtype)


def strided_residual_conv_block(x_nchw, w1, b1, w2, b2, wproj, bproj):
    """Forward pass of StridedResidualConvBlock.

    x_nchw : (N, Cin, H, W)           (PyTorch NCHW convention)
    w1     : (Cp, Cin, 3, 3), b1: (Cp,)   -- first conv
    w2     : (Cp, Cp, 3, 3),  b2: (Cp,)   -- second (strided) conv
    wproj  : (Cp, Cin, 1, 1), bproj: (Cp,) -- 1x1 strided projection
    returns (N, Cp, H//2, W//2)
    """
    n, cin, h, w = x_nchw.shape
    cp = w1.shape[0]
    assert h % 2 == 0 and w % 2 == 0
    ho, wo = h // 2, w // 2

    # Layout plumbing (wrapper side): NHWC + explicit zero padding for the 3x3s.
    x_nhwc = jnp.transpose(x_nchw, (0, 2, 3, 1)).astype(jnp.float32)
    xpad = jnp.pad(x_nhwc, ((0, 0), (1, 1), (1, 1), (0, 0)))

    # Weights to tap-major matmul form: w_t[kh*3+kw, ci, co] = w[co, ci, kh, kw].
    w1_t = jnp.transpose(w1, (2, 3, 1, 0)).reshape(9, cin, cp).astype(jnp.float32)
    w2_t = jnp.transpose(w2, (2, 3, 1, 0)).reshape(9, cp, cp).astype(jnp.float32)
    wproj_t = jnp.transpose(wproj[:, :, 0, 0], (1, 0)).astype(jnp.float32)  # (Cin, Cp)
    b1_t = b1.reshape(1, cp).astype(jnp.float32)
    b2_t = b2.reshape(1, cp).astype(jnp.float32)
    bproj_t = bproj.reshape(1, cp).astype(jnp.float32)

    # Constant stride-2 selection: output row (ho*Wo+wo) <- dense row (2*ho*W + 2*wo).
    rows = jnp.arange(ho * wo)
    cols = (rows // wo) * (2 * w) + (rows % wo) * 2
    sel = jnp.zeros((ho * wo, h * w), jnp.float32).at[rows, cols].set(1.0)

    out_nhwc = pl.pallas_call(
        _block_kernel,
        out_shape=jax.ShapeDtypeStruct((n, ho, wo, cp), jnp.float32),
        grid_spec=pltpu.PrefetchScalarGridSpec(
            num_scalar_prefetch=0,
            grid=(n,),
            in_specs=[
                pl.BlockSpec((1, h + 2, w + 2, cin), lambda i: (i, 0, 0, 0)),
                pl.BlockSpec((9, cin, cp), lambda i: (0, 0, 0)),
                pl.BlockSpec((1, cp), lambda i: (0, 0)),
                pl.BlockSpec((9, cp, cp), lambda i: (0, 0, 0)),
                pl.BlockSpec((1, cp), lambda i: (0, 0)),
                pl.BlockSpec((cin, cp), lambda i: (0, 0)),
                pl.BlockSpec((1, cp), lambda i: (0, 0)),
                pl.BlockSpec((ho * wo, h * w), lambda i: (0, 0)),
            ],
            out_specs=pl.BlockSpec((1, ho, wo, cp), lambda i: (i, 0, 0, 0)),
            scratch_shapes=[pltpu.VMEM((h + 2, w + 2, cp), jnp.float32)],
        ),
        compiler_params=pltpu.CompilerParams(
            dimension_semantics=("parallel",),
        ),
    )(xpad, w1_t, b1_t, w2_t, b2_t, wproj_t, bproj_t, sel)

    return jnp.transpose(out_nhwc, (0, 3, 1, 2))


def _reference(x, w1, b1, w2, b2, wproj, bproj):
    """Plain-JAX reference (same semantics as the PyTorch module)."""
    dn = ('NCHW', 'OIHW', 'NCHW')
    hp = lax.Precision.HIGHEST
    y = lax.conv_general_dilated(x, w1, (1, 1), ((1, 1), (1, 1)),
                                 dimension_numbers=dn, precision=hp)
    y = y + b1[None, :, None, None]
    y = jnp.where(y >= 0, y, LEAKY_SLOPE * y)
    y = lax.conv_general_dilated(y, w2, (2, 2), ((1, 1), (1, 1)),
                                 dimension_numbers=dn, precision=hp)
    y = y + b2[None, :, None, None]
    y = jnp.where(y >= 0, y, LEAKY_SLOPE * y)
    ident = lax.conv_general_dilated(x, wproj, (2, 2), ((0, 0), (0, 0)),
                                     dimension_numbers=dn, precision=hp)
    ident = ident + bproj[None, :, None, None]
    return (y + ident) / math.sqrt(2.0)


if __name__ == "__main__":
    key = jax.random.PRNGKey(0)
    n, cin, cp, h, w = 2, 4, 8, 16, 16
    ks = jax.random.split(key, 7)

    # Kaiming-leaky-style scales (host-side init, not part of the forward pass).
    std1 = math.sqrt(2.0 / (1.0 + LEAKY_SLOPE ** 2) / (cin * 9))
    std2 = math.sqrt(2.0 / (1.0 + LEAKY_SLOPE ** 2) / (cp * 9))
    x = jax.random.normal(ks[0], (n, cin, h, w), jnp.float32)
    w1 = jax.random.normal(ks[1], (cp, cin, 3, 3), jnp.float32) * std1
    b1 = jax.random.normal(ks[2], (cp,), jnp.float32) * 0.01
    w2 = jax.random.normal(ks[3], (cp, cp, 3, 3), jnp.float32) * std2
    b2 = jax.random.normal(ks[4], (cp,), jnp.float32) * 0.01
    wproj = jax.random.normal(ks[5], (cp, cin, 1, 1), jnp.float32) * math.sqrt(1.0 / cin)
    bproj = jax.random.normal(ks[6], (cp,), jnp.float32) * 0.01

    out = strided_residual_conv_block(x, w1, b1, w2, b2, wproj, bproj)
    out = jax.block_until_ready(out)

    ref = _reference(x, w1, b1, w2, b2, wproj, bproj)
    assert out.shape == (n, cp, h // 2, w // 2), out.shape
    max_err = float(jnp.max(jnp.abs(out - ref)))
    assert jnp.allclose(out, ref, atol=5e-2, rtol=5e-2), max_err

    print("KERNEL_OK")
</pallas_src>

<mosaic_0001>
module attributes {stable_mosaic.version = 11 : i64} {
  func.func @_block_kernel(%arg0: i32, %arg1: memref<1x18x18x4xf32, #tpu.memory_space<vmem>>, %arg2: memref<9x4x8xf32, #tpu.memory_space<vmem>>, %arg3: memref<1x8xf32, #tpu.memory_space<vmem>>, %arg4: memref<9x8x8xf32, #tpu.memory_space<vmem>>, %arg5: memref<1x8xf32, #tpu.memory_space<vmem>>, %arg6: memref<4x8xf32, #tpu.memory_space<vmem>>, %arg7: memref<1x8xf32, #tpu.memory_space<vmem>>, %arg8: memref<64x256xf32, #tpu.memory_space<vmem>>, %arg9: memref<1x8x8x8xf32, #tpu.memory_space<vmem>>, %arg10: memref<18x18x8xf32, #tpu.memory_space<vmem>>) attributes {dimension_semantics = [#tpu.dimension_semantics<parallel>], iteration_bounds = array<i64: 2>, scalar_prefetch = 0 : i64, scratch_operands = 1 : i64, tpu.core_type = #tpu.core_type<tc>, window_params = [{transform_indices = @transform_0, window_bounds = array<i64: 1, 18, 18, 4>}, {pipeline_mode = #tpu.pipeline_mode<synchronous>, transform_indices = @transform_1, window_bounds = array<i64: 9, 4, 8>}, {pipeline_mode = #tpu.pipeline_mode<synchronous>, transform_indices = @transform_2, window_bounds = array<i64: 1, 8>}, {pipeline_mode = #tpu.pipeline_mode<synchronous>, transform_indices = @transform_3, window_bounds = array<i64: 9, 8, 8>}, {pipeline_mode = #tpu.pipeline_mode<synchronous>, transform_indices = @transform_4, window_bounds = array<i64: 1, 8>}, {pipeline_mode = #tpu.pipeline_mode<synchronous>, transform_indices = @transform_5, window_bounds = array<i64: 4, 8>}, {pipeline_mode = #tpu.pipeline_mode<synchronous>, transform_indices = @transform_6, window_bounds = array<i64: 1, 8>}, {pipeline_mode = #tpu.pipeline_mode<synchronous>, transform_indices = @transform_7, window_bounds = array<i64: 64, 256>}, {transform_indices = @transform_8, window_bounds = array<i64: 1, 8, 8, 8>}]} {
    %cst = arith.constant 0.000000e+00 : f32
    %0 = vector.broadcast %cst : f32 to vector<256x8xf32>
    %c0 = arith.constant 0 : index
    %c0_0 = arith.constant 0 : index
    %c0_1 = arith.constant 0 : index
    %c0_2 = arith.constant 0 : index
    %1 = vector.load %arg1[%c0, %c0_0, %c0_1, %c0_2] : memref<1x18x18x4xf32, #tpu.memory_space<vmem>>, vector<1x16x16x4xf32>
    %2 = vector.shape_cast %1 : vector<1x16x16x4xf32> to vector<16x16x4xf32>
    %3 = vector.shape_cast %2 : vector<16x16x4xf32> to vector<256x4xf32>
    %c0_3 = arith.constant 0 : index
    %c0_4 = arith.constant 0 : index
    %c0_5 = arith.constant 0 : index
    %4 = vector.load %arg2[%c0_3, %c0_4, %c0_5] : memref<9x4x8xf32, #tpu.memory_space<vmem>>, vector<1x4x8xf32>
    %5 = vector.shape_cast %4 : vector<1x4x8xf32> to vector<4x8xf32>
    %cst_6 = arith.constant dense<0.000000e+00> : vector<256x8xf32>
    %6 = tpu.matmul %3, %5, %cst_6 {dimension_numbers = #tpu.dot_dimension_numbers<[1], [0], [0], [1], [0, 0, 1, 1], [], []>} : vector<256x4xf32>, vector<4x8xf32>, vector<256x8xf32> -> vector<256x8xf32>
    %7 = arith.addf %0, %6 : vector<256x8xf32>
    %c0_7 = arith.constant 0 : index
    %c0_8 = arith.constant 0 : index
    %c1 = arith.constant 1 : index
    %c0_9 = arith.constant 0 : index
    %8 = vector.load %arg1[%c0_7, %c0_8, %c1, %c0_9] : memref<1x18x18x4xf32, #tpu.memory_space<vmem>>, vector<1x16x16x4xf32>
    %9 = vector.shape_cast %8 : vector<1x16x16x4xf32> to vector<16x16x4xf32>
    %10 = vector.shape_cast %9 : vector<16x16x4xf32> to vector<256x4xf32>
    %c1_10 = arith.constant 1 : index
    %c0_11 = arith.constant 0 : index
    %c0_12 = arith.constant 0 : index
    %11 = vector.load %arg2[%c1_10, %c0_11, %c0_12] : memref<9x4x8xf32, #tpu.memory_space<vmem>>, vector<1x4x8xf32>
    %12 = vector.shape_cast %11 : vector<1x4x8xf32> to vector<4x8xf32>
    %cst_13 = arith.constant dense<0.000000e+00> : vector<256x8xf32>
    %13 = tpu.matmul %10, %12, %cst_13 {dimension_numbers = #tpu.dot_dimension_numbers<[1], [0], [0], [1], [0, 0, 1, 1], [], []>} : vector<256x4xf32>, vector<4x8xf32>, vector<256x8xf32> -> vector<256x8xf32>
    %14 = arith.addf %7, %13 : vector<256x8xf32>
    %c0_14 = arith.constant 0 : index
    %c0_15 = arith.constant 0 : index
    %c2 = arith.constant 2 : index
    %c0_16 = arith.constant 0 : index
    %15 = vector.load %arg1[%c0_14, %c0_15, %c2, %c0_16] : memref<1x18x18x4xf32, #tpu.memory_space<vmem>>, vector<1x16x16x4xf32>
    %16 = vector.shape_cast %15 : vector<1x16x16x4xf32> to vector<16x16x4xf32>
    %17 = vector.shape_cast %16 : vector<16x16x4xf32> to vector<256x4xf32>
    %c2_17 = arith.constant 2 : index
    %c0_18 = arith.constant 0 : index
    %c0_19 = arith.constant 0 : index
    %18 = vector.load %arg2[%c2_17, %c0_18, %c0_19] : memref<9x4x8xf32, #tpu.memory_space<vmem>>, vector<1x4x8xf32>
    %19 = vector.shape_cast %18 : vector<1x4x8xf32> to vector<4x8xf32>
    %cst_20 = arith.constant dense<0.000000e+00> : vector<256x8xf32>
    %20 = tpu.matmul %17, %19, %cst_20 {dimension_numbers = #tpu.dot_dimension_numbers<[1], [0], [0], [1], [0, 0, 1, 1], [], []>} : vector<256x4xf32>, vector<4x8xf32>, vector<256x8xf32> -> vector<256x8xf32>
    %21 = arith.addf %14, %20 : vector<256x8xf32>
    %c0_21 = arith.constant 0 : index
    %c1_22 = arith.constant 1 : index
    %c0_23 = arith.constant 0 : index
    %c0_24 = arith.constant 0 : index
    %22 = vector.load %arg1[%c0_21, %c1_22, %c0_23, %c0_24] : memref<1x18x18x4xf32, #tpu.memory_space<vmem>>, vector<1x16x16x4xf32>
    %23 = vector.shape_cast %22 : vector<1x16x16x4xf32> to vector<16x16x4xf32>
    %24 = vector.shape_cast %23 : vector<16x16x4xf32> to vector<256x4xf32>
    %c3 = arith.constant 3 : index
    %c0_25 = arith.constant 0 : index
    %c0_26 = arith.constant 0 : index
    %25 = vector.load %arg2[%c3, %c0_25, %c0_26] : memref<9x4x8xf32, #tpu.memory_space<vmem>>, vector<1x4x8xf32>
    %26 = vector.shape_cast %25 : vector<1x4x8xf32> to vector<4x8xf32>
    %cst_27 = arith.constant dense<0.000000e+00> : vector<256x8xf32>
    %27 = tpu.matmul %24, %26, %cst_27 {dimension_numbers = #tpu.dot_dimension_numbers<[1], [0], [0], [1], [0, 0, 1, 1], [], []>} : vector<256x4xf32>, vector<4x8xf32>, vector<256x8xf32> -> vector<256x8xf32>
    %28 = arith.addf %21, %27 : vector<256x8xf32>
    %c0_28 = arith.constant 0 : index
    %c1_29 = arith.constant 1 : index
    %c1_30 = arith.constant 1 : index
    %c0_31 = arith.constant 0 : index
    %29 = vector.load %arg1[%c0_28, %c1_29, %c1_30, %c0_31] : memref<1x18x18x4xf32, #tpu.memory_space<vmem>>, vector<1x16x16x4xf32>
    %30 = vector.shape_cast %29 : vector<1x16x16x4xf32> to vector<16x16x4xf32>
    %31 = vector.shape_cast %30 : vector<16x16x4xf32> to vector<256x4xf32>
    %c4 = arith.constant 4 : index
    %c0_32 = arith.constant 0 : index
    %c0_33 = arith.constant 0 : index
    %32 = vector.load %arg2[%c4, %c0_32, %c0_33] : memref<9x4x8xf32, #tpu.memory_space<vmem>>, vector<1x4x8xf32>
    %33 = vector.shape_cast %32 : vector<1x4x8xf32> to vector<4x8xf32>
    %cst_34 = arith.constant dense<0.000000e+00> : vector<256x8xf32>
    %34 = tpu.matmul %31, %33, %cst_34 {dimension_numbers = #tpu.dot_dimension_numbers<[1], [0], [0], [1], [0, 0, 1, 1], [], []>} : vector<256x4xf32>, vector<4x8xf32>, vector<256x8xf32> -> vector<256x8xf32>
    %35 = arith.addf %28, %34 : vector<256x8xf32>
    %c0_35 = arith.constant 0 : index
    %c1_36 = arith.constant 1 : index
    %c2_37 = arith.constant 2 : index
    %c0_38 = arith.constant 0 : index
    %36 = vector.load %arg1[%c0_35, %c1_36, %c2_37, %c0_38] : memref<1x18x18x4xf32, #tpu.memory_space<vmem>>, vector<1x16x16x4xf32>
    %37 = vector.shape_cast %36 : vector<1x16x16x4xf32> to vector<16x16x4xf32>
    %38 = vector.shape_cast %37 : vector<16x16x4xf32> to vector<256x4xf32>
    %c5 = arith.constant 5 : index
    %c0_39 = arith.constant 0 : index
    %c0_40 = arith.constant 0 : index
    %39 = vector.load %arg2[%c5, %c0_39, %c0_40] : memref<9x4x8xf32, #tpu.memory_space<vmem>>, vector<1x4x8xf32>
    %40 = vector.shape_cast %39 : vector<1x4x8xf32> to vector<4x8xf32>
    %cst_41 = arith.constant dense<0.000000e+00> : vector<256x8xf32>
    %41 = tpu.matmul %38, %40, %cst_41 {dimension_numbers = #tpu.dot_dimension_numbers<[1], [0], [0], [1], [0, 0, 1, 1], [], []>} : vector<256x4xf32>, vector<4x8xf32>, vector<256x8xf32> -> vector<256x8xf32>
    %42 = arith.addf %35, %41 : vector<256x8xf32>
    %c0_42 = arith.constant 0 : index
    %c2_43 = arith.constant 2 : index
    %c0_44 = arith.constant 0 : index
    %c0_45 = arith.constant 0 : index
    %43 = vector.load %arg1[%c0_42, %c2_43, %c0_44, %c0_45] : memref<1x18x18x4xf32, #tpu.memory_space<vmem>>, vector<1x16x16x4xf32>
    %44 = vector.shape_cast %43 : vector<1x16x16x4xf32> to vector<16x16x4xf32>
    %45 = vector.shape_cast %44 : vector<16x16x4xf32> to vector<256x4xf32>
    %c6 = arith.constant 6 : index
    %c0_46 = arith.constant 0 : index
    %c0_47 = arith.constant 0 : index
    %46 = vector.load %arg2[%c6, %c0_46, %c0_47] : memref<9x4x8xf32, #tpu.memory_space<vmem>>, vector<1x4x8xf32>
    %47 = vector.shape_cast %46 : vector<1x4x8xf32> to vector<4x8xf32>
    %cst_48 = arith.constant dense<0.000000e+00> : vector<256x8xf32>
    %48 = tpu.matmul %45, %47, %cst_48 {dimension_numbers = #tpu.dot_dimension_numbers<[1], [0], [0], [1], [0, 0, 1, 1], [], []>} : vector<256x4xf32>, vector<4x8xf32>, vector<256x8xf32> -> vector<256x8xf32>
    %49 = arith.addf %42, %48 : vector<256x8xf32>
    %c0_49 = arith.constant 0 : index
    %c2_50 = arith.constant 2 : index
    %c1_51 = arith.constant 1 : index
    %c0_52 = arith.constant 0 : index
    %50 = vector.load %arg1[%c0_49, %c2_50, %c1_51, %c0_52] : memref<1x18x18x4xf32, #tpu.memory_space<vmem>>, vector<1x16x16x4xf32>
    %51 = vector.shape_cast %50 : vector<1x16x16x4xf32> to vector<16x16x4xf32>
    %52 = vector.shape_cast %51 : vector<16x16x4xf32> to vector<256x4xf32>
    %c7 = arith.constant 7 : index
    %c0_53 = arith.constant 0 : index
    %c0_54 = arith.constant 0 : index
    %53 = vector.load %arg2[%c7, %c0_53, %c0_54] : memref<9x4x8xf32, #tpu.memory_space<vmem>>, vector<1x4x8xf32>
    %54 = vector.shape_cast %53 : vector<1x4x8xf32> to vector<4x8xf32>
    %cst_55 = arith.constant dense<0.000000e+00> : vector<256x8xf32>
    %55 = tpu.matmul %52, %54, %cst_55 {dimension_numbers = #tpu.dot_dimension_numbers<[1], [0], [0], [1], [0, 0, 1, 1], [], []>} : vector<256x4xf32>, vector<4x8xf32>, vector<256x8xf32> -> vector<256x8xf32>
    %56 = arith.addf %49, %55 : vector<256x8xf32>
    %c0_56 = arith.constant 0 : index
    %c2_57 = arith.constant 2 : index
    %c2_58 = arith.constant 2 : index
    %c0_59 = arith.constant 0 : index
    %57 = vector.load %arg1[%c0_56, %c2_57, %c2_58, %c0_59] : memref<1x18x18x4xf32, #tpu.memory_space<vmem>>, vector<1x16x16x4xf32>
    %58 = vector.shape_cast %57 : vector<1x16x16x4xf32> to vector<16x16x4xf32>
    %59 = vector.shape_cast %58 : vector<16x16x4xf32> to vector<256x4xf32>
    %c8 = arith.constant 8 : index
    %c0_60 = arith.constant 0 : index
    %c0_61 = arith.constant 0 : index
    %60 = vector.load %arg2[%c8, %c0_60, %c0_61] : memref<9x4x8xf32, #tpu.memory_space<vmem>>, vector<1x4x8xf32>
    %61 = vector.shape_cast %60 : vector<1x4x8xf32> to vector<4x8xf32>
    %cst_62 = arith.constant dense<0.000000e+00> : vector<256x8xf32>
    %62 = tpu.matmul %59, %61, %cst_62 {dimension_numbers = #tpu.dot_dimension_numbers<[1], [0], [0], [1], [0, 0, 1, 1], [], []>} : vector<256x4xf32>, vector<4x8xf32>, vector<256x8xf32> -> vector<256x8xf32>
    %63 = arith.addf %56, %62 : vector<256x8xf32>
    %c0_63 = arith.constant 0 : index
    %c0_64 = arith.constant 0 : index
    %64 = vector.load %arg3[%c0_63, %c0_64] : memref<1x8xf32, #tpu.memory_space<vmem>>, vector<1x8xf32>
    %65 = vector.broadcast %64 : vector<1x8xf32> to vector<256x8xf32>
    %66 = arith.addf %63, %65 : vector<256x8xf32>
    %cst_65 = arith.constant 0.000000e+00 : f32
    %67 = vector.broadcast %cst_65 : f32 to vector<256x8xf32>
    %68 = arith.cmpf oge, %66, %67 : vector<256x8xf32>
    %cst_66 = arith.constant 2.000000e-01 : f32
    %69 = vector.broadcast %cst_66 : f32 to vector<256x8xf32>
    %70 = arith.mulf %69, %66 : vector<256x8xf32>
    %71 = arith.select %68, %66, %70 : vector<256x8xi1>, vector<256x8xf32>
    %cst_67 = arith.constant 0.000000e+00 : f32
    %72 = vector.broadcast %cst_67 : f32 to vector<18x18x8xf32>
    %c0_68 = arith.constant 0 : index
    %c0_69 = arith.constant 0 : index
    %c0_70 = arith.constant 0 : index
    %73 = vector.load %arg10[%c0_68, %c0_69, %c0_70] : memref<18x18x8xf32, #tpu.memory_space<vmem>>, vector<18x18x8xf32>
    tpu.vector_store %arg10[%c0_68, %c0_69, %c0_70], %72 {strides = array<i32>} : memref<18x18x8xf32, #tpu.memory_space<vmem>>, vector<18x18x8xf32>,
    %74 = vector.shape_cast %71 : vector<256x8xf32> to vector<16x16x8xf32>
    %c1_71 = arith.constant 1 : index
    %c1_72 = arith.constant 1 : index
    %c0_73 = arith.constant 0 : index
    %75 = vector.load %arg10[%c1_71, %c1_72, %c0_73] : memref<18x18x8xf32, #tpu.memory_space<vmem>>, vector<16x16x8xf32>
    tpu.vector_store %arg10[%c1_71, %c1_72, %c0_73], %74 {strides = array<i32>} : memref<18x18x8xf32, #tpu.memory_space<vmem>>, vector<16x16x8xf32>,
    %cst_74 = arith.constant 0.000000e+00 : f32
    %76 = vector.broadcast %cst_74 : f32 to vector<256x8xf32>
    %c0_75 = arith.constant 0 : index
    %c0_76 = arith.constant 0 : index
    %c0_77 = arith.constant 0 : index
    %77 = vector.load %arg10[%c0_75, %c0_76, %c0_77] : memref<18x18x8xf32, #tpu.memory_space<vmem>>, vector<16x16x8xf32>
    %78 = vector.shape_cast %77 : vector<16x16x8xf32> to vector<256x8xf32>
    %c0_78 = arith.constant 0 : index
    %c0_79 = arith.constant 0 : index
    %c0_80 = arith.constant 0 : index
    %79 = vector.load %arg4[%c0_78, %c0_79, %c0_80] : memref<9x8x8xf32, #tpu.memory_space<vmem>>, vector<1x8x8xf32>
    %80 = vector.shape_cast %79 : vector<1x8x8xf32> to vector<8x8xf32>
    %cst_81 = arith.constant dense<0.000000e+00> : vector<256x8xf32>
    %81 = tpu.matmul %78, %80, %cst_81 {dimension_numbers = #tpu.dot_dimension_numbers<[1], [0], [0], [1], [0, 0, 1, 1], [], []>} : vector<256x8xf32>, vector<8x8xf32>, vector<256x8xf32> -> vector<256x8xf32>
    %82 = arith.addf %76, %81 : vector<256x8xf32>
    %c0_82 = arith.constant 0 : index
    %c1_83 = arith.constant 1 : index
    %c0_84 = arith.constant 0 : index
    %83 = vector.load %arg10[%c0_82, %c1_83, %c0_84] : memref<18x18x8xf32, #tpu.memory_space<vmem>>, vector<16x16x8xf32>
    %84 = vector.shape_cast %83 : vector<16x16x8xf32> to vector<256x8xf32>
    %c1_85 = arith.constant 1 : index
    %c0_86 = arith.constant 0 : index
    %c0_87 = arith.constant 0 : index
    %85 = vector.load %arg4[%c1_85, %c0_86, %c0_87] : memref<9x8x8xf32, #tpu.memory_space<vmem>>, vector<1x8x8xf32>
    %86 = vector.shape_cast %85 : vector<1x8x8xf32> to vector<8x8xf32>
    %cst_88 = arith.constant dense<0.000000e+00> : vector<256x8xf32>
    %87 = tpu.matmul %84, %86, %cst_88 {dimension_numbers = #tpu.dot_dimension_numbers<[1], [0], [0], [1], [0, 0, 1, 1], [], []>} : vector<256x8xf32>, vector<8x8xf32>, vector<256x8xf32> -> vector<256x8xf32>
    %88 = arith.addf %82, %87 : vector<256x8xf32>
    %c0_89 = arith.constant 0 : index
    %c2_90 = arith.constant 2 : index
    %c0_91 = arith.constant 0 : index
    %89 = vector.load %arg10[%c0_89, %c2_90, %c0_91] : memref<18x18x8xf32, #tpu.memory_space<vmem>>, vector<16x16x8xf32>
    %90 = vector.shape_cast %89 : vector<16x16x8xf32> to vector<256x8xf32>
    %c2_92 = arith.constant 2 : index
    %c0_93 = arith.constant 0 : index
    %c0_94 = arith.constant 0 : index
    %91 = vector.load %arg4[%c2_92, %c0_93, %c0_94] : memref<9x8x8xf32, #tpu.memory_space<vmem>>, vector<1x8x8xf32>
    %92 = vector.shape_cast %91 : vector<1x8x8xf32> to vector<8x8xf32>
    %cst_95 = arith.constant dense<0.000000e+00> : vector<256x8xf32>
    %93 = tpu.matmul %90, %92, %cst_95 {dimension_numbers = #tpu.dot_dimension_numbers<[1], [0], [0], [1], [0, 0, 1, 1], [], []>} : vector<256x8xf32>, vector<8x8xf32>, vector<256x8xf32> -> vector<256x8xf32>
    %94 = arith.addf %88, %93 : vector<256x8xf32>
    %c1_96 = arith.constant 1 : index
    %c0_97 = arith.constant 0 : index
    %c0_98 = arith.constant 0 : index
    %95 = vector.load %arg10[%c1_96, %c0_97, %c0_98] : memref<18x18x8xf32, #tpu.memory_space<vmem>>, vector<16x16x8xf32>
    %96 = vector.shape_cast %95 : vector<16x16x8xf32> to vector<256x8xf32>
    %c3_99 = arith.constant 3 : index
    %c0_100 = arith.constant 0 : index
    %c0_101 = arith.constant 0 : index
    %97 = vector.load %arg4[%c3_99, %c0_100, %c0_101] : memref<9x8x8xf32, #tpu.memory_space<vmem>>, vector<1x8x8xf32>
    %98 = vector.shape_cast %97 : vector<1x8x8xf32> to vector<8x8xf32>
    %cst_102 = arith.constant dense<0.000000e+00> : vector<256x8xf32>
    %99 = tpu.matmul %96, %98, %cst_102 {dimension_numbers = #tpu.dot_dimension_numbers<[1], [0], [0], [1], [0, 0, 1, 1], [], []>} : vector<256x8xf32>, vector<8x8xf32>, vector<256x8xf32> -> vector<256x8xf32>
    %100 = arith.addf %94, %99 : vector<256x8xf32>
    %c1_103 = arith.constant 1 : index
    %c1_104 = arith.constant 1 : index
    %c0_105 = arith.constant 0 : index
    %101 = vector.load %arg10[%c1_103, %c1_104, %c0_105] : memref<18x18x8xf32, #tpu.memory_space<vmem>>, vector<16x16x8xf32>
    %102 = vector.shape_cast %101 : vector<16x16x8xf32> to vector<256x8xf32>
    %c4_106 = arith.constant 4 : index
    %c0_107 = arith.constant 0 : index
    %c0_108 = arith.constant 0 : index
    %103 = vector.load %arg4[%c4_106, %c0_107, %c0_108] : memref<9x8x8xf32, #tpu.memory_space<vmem>>, vector<1x8x8xf32>
    %104 = vector.shape_cast %103 : vector<1x8x8xf32> to vector<8x8xf32>
    %cst_109 = arith.constant dense<0.000000e+00> : vector<256x8xf32>
    %105 = tpu.matmul %102, %104, %cst_109 {dimension_numbers = #tpu.dot_dimension_numbers<[1], [0], [0], [1], [0, 0, 1, 1], [], []>} : vector<256x8xf32>, vector<8x8xf32>, vector<256x8xf32> -> vector<256x8xf32>
    %106 = arith.addf %100, %105 : vector<256x8xf32>
    %c1_110 = arith.constant 1 : index
    %c2_111 = arith.constant 2 : index
    %c0_112 = arith.constant 0 : index
    %107 = vector.load %arg10[%c1_110, %c2_111, %c0_112] : memref<18x18x8xf32, #tpu.memory_space<vmem>>, vector<16x16x8xf32>
    %108 = vector.shape_cast %107 : vector<16x16x8xf32> to vector<256x8xf32>
    %c5_113 = arith.constant 5 : index
    %c0_114 = arith.constant 0 : index
    %c0_115 = arith.constant 0 : index
    %109 = vector.load %arg4[%c5_113, %c0_114, %c0_115] : memref<9x8x8xf32, #tpu.memory_space<vmem>>, vector<1x8x8xf32>
    %110 = vector.shape_cast %109 : vector<1x8x8xf32> to vector<8x8xf32>
    %cst_116 = arith.constant dense<0.000000e+00> : vector<256x8xf32>
    %111 = tpu.matmul %108, %110, %cst_116 {dimension_numbers = #tpu.dot_dimension_numbers<[1], [0], [0], [1], [0, 0, 1, 1], [], []>} : vector<256x8xf32>, vector<8x8xf32>, vector<256x8xf32> -> vector<256x8xf32>
    %112 = arith.addf %106, %111 : vector<256x8xf32>
    %c2_117 = arith.constant 2 : index
    %c0_118 = arith.constant 0 : index
    %c0_119 = arith.constant 0 : index
    %113 = vector.load %arg10[%c2_117, %c0_118, %c0_119] : memref<18x18x8xf32, #tpu.memory_space<vmem>>, vector<16x16x8xf32>
    %114 = vector.shape_cast %113 : vector<16x16x8xf32> to vector<256x8xf32>
    %c6_120 = arith.constant 6 : index
    %c0_121 = arith.constant 0 : index
    %c0_122 = arith.constant 0 : index
    %115 = vector.load %arg4[%c6_120, %c0_121, %c0_122] : memref<9x8x8xf32, #tpu.memory_space<vmem>>, vector<1x8x8xf32>
    %116 = vector.shape_cast %115 : vector<1x8x8xf32> to vector<8x8xf32>
    %cst_123 = arith.constant dense<0.000000e+00> : vector<256x8xf32>
    %117 = tpu.matmul %114, %116, %cst_123 {dimension_numbers = #tpu.dot_dimension_numbers<[1], [0], [0], [1], [0, 0, 1, 1], [], []>} : vector<256x8xf32>, vector<8x8xf32>, vector<256x8xf32> -> vector<256x8xf32>
    %118 = arith.addf %112, %117 : vector<256x8xf32>
    %c2_124 = arith.constant 2 : index
    %c1_125 = arith.constant 1 : index
    %c0_126 = arith.constant 0 : index
    %119 = vector.load %arg10[%c2_124, %c1_125, %c0_126] : memref<18x18x8xf32, #tpu.memory_space<vmem>>, vector<16x16x8xf32>
    %120 = vector.shape_cast %119 : vector<16x16x8xf32> to vector<256x8xf32>
    %c7_127 = arith.constant 7 : index
    %c0_128 = arith.constant 0 : index
    %c0_129 = arith.constant 0 : index
    %121 = vector.load %arg4[%c7_127, %c0_128, %c0_129] : memref<9x8x8xf32, #tpu.memory_space<vmem>>, vector<1x8x8xf32>
    %122 = vector.shape_cast %121 : vector<1x8x8xf32> to vector<8x8xf32>
    %cst_130 = arith.constant dense<0.000000e+00> : vector<256x8xf32>
    %123 = tpu.matmul %120, %122, %cst_130 {dimension_numbers = #tpu.dot_dimension_numbers<[1], [0], [0], [1], [0, 0, 1, 1], [], []>} : vector<256x8xf32>, vector<8x8xf32>, vector<256x8xf32> -> vector<256x8xf32>
    %124 = arith.addf %118, %123 : vector<256x8xf32>
    %c2_131 = arith.constant 2 : index
    %c2_132 = arith.constant 2 : index
    %c0_133 = arith.constant 0 : index
    %125 = vector.load %arg10[%c2_131, %c2_132, %c0_133] : memref<18x18x8xf32, #tpu.memory_space<vmem>>, vector<16x16x8xf32>
    %126 = vector.shape_cast %125 : vector<16x16x8xf32> to vector<256x8xf32>
    %c8_134 = arith.constant 8 : index
    %c0_135 = arith.constant 0 : index
    %c0_136 = arith.constant 0 : index
    %127 = vector.load %arg4[%c8_134, %c0_135, %c0_136] : memref<9x8x8xf32, #tpu.memory_space<vmem>>, vector<1x8x8xf32>
    %128 = vector.shape_cast %127 : vector<1x8x8xf32> to vector<8x8xf32>
    %cst_137 = arith.constant dense<0.000000e+00> : vector<256x8xf32>
    %129 = tpu.matmul %126, %128, %cst_137 {dimension_numbers = #tpu.dot_dimension_numbers<[1], [0], [0], [1], [0, 0, 1, 1], [], []>} : vector<256x8xf32>, vector<8x8xf32>, vector<256x8xf32> -> vector<256x8xf32>
    %130 = arith.addf %124, %129 : vector<256x8xf32>
    %c0_138 = arith.constant 0 : index
    %c0_139 = arith.constant 0 : index
    %131 = vector.load %arg5[%c0_138, %c0_139] : memref<1x8xf32, #tpu.memory_space<vmem>>, vector<1x8xf32>
    %132 = vector.broadcast %131 : vector<1x8xf32> to vector<256x8xf32>
    %133 = arith.addf %130, %132 : vector<256x8xf32>
    %cst_140 = arith.constant 0.000000e+00 : f32
    %134 = vector.broadcast %cst_140 : f32 to vector<256x8xf32>
    %135 = arith.cmpf oge, %133, %134 : vector<256x8xf32>
    %cst_141 = arith.constant 2.000000e-01 : f32
    %136 = vector.broadcast %cst_141 : f32 to vector<256x8xf32>
    %137 = arith.mulf %136, %133 : vector<256x8xf32>
    %138 = arith.select %135, %133, %137 : vector<256x8xi1>, vector<256x8xf32>
    %c0_142 = arith.constant 0 : index
    %c1_143 = arith.constant 1 : index
    %c1_144 = arith.constant 1 : index
    %c0_145 = arith.constant 0 : index
    %139 = vector.load %arg1[%c0_142, %c1_143, %c1_144, %c0_145] : memref<1x18x18x4xf32, #tpu.memory_space<vmem>>, vector<1x16x16x4xf32>
    %140 = vector.shape_cast %139 : vector<1x16x16x4xf32> to vector<16x16x4xf32>
    %141 = vector.shape_cast %140 : vector<16x16x4xf32> to vector<256x4xf32>
    %c0_146 = arith.constant 0 : index
    %c0_147 = arith.constant 0 : index
    %142 = vector.load %arg6[%c0_146, %c0_147] : memref<4x8xf32, #tpu.memory_space<vmem>>, vector<4x8xf32>
    %cst_148 = arith.constant dense<0.000000e+00> : vector<256x8xf32>
    %143 = tpu.matmul %141, %142, %cst_148 {dimension_numbers = #tpu.dot_dimension_numbers<[1], [0], [0], [1], [0, 0, 1, 1], [], []>} : vector<256x4xf32>, vector<4x8xf32>, vector<256x8xf32> -> vector<256x8xf32>
    %c0_149 = arith.constant 0 : index
    %c0_150 = arith.constant 0 : index
    %144 = vector.load %arg7[%c0_149, %c0_150] : memref<1x8xf32, #tpu.memory_space<vmem>>, vector<1x8xf32>
    %145 = vector.broadcast %144 : vector<1x8xf32> to vector<256x8xf32>
    %146 = arith.addf %143, %145 : vector<256x8xf32>
    %147 = arith.addf %138, %146 : vector<256x8xf32>
    %cst_151 = arith.constant 0.707106769 : f32
    %148 = vector.broadcast %cst_151 : f32 to vector<256x8xf32>
    %149 = arith.mulf %147, %148 : vector<256x8xf32>
    %c0_152 = arith.constant 0 : index
    %c0_153 = arith.constant 0 : index
    %150 = vector.load %arg8[%c0_152, %c0_153] : memref<64x256xf32, #tpu.memory_space<vmem>>, vector<64x256xf32>
    %cst_154 = arith.constant dense<0.000000e+00> : vector<64x8xf32>
    %151 = tpu.matmul %150, %149, %cst_154 {dimension_numbers = #tpu.dot_dimension_numbers<[1], [0], [0], [1], [0, 0, 1, 1], [], []>} : vector<64x256xf32>, vector<256x8xf32>, vector<64x8xf32> -> vector<64x8xf32>
    %152 = vector.shape_cast %151 : vector<64x8xf32> to vector<8x8x8xf32>
    %c0_155 = arith.constant 0 : index
    %c0_156 = arith.constant 0 : index
    %c0_157 = arith.constant 0 : index
    %c0_158 = arith.constant 0 : index
    %153 = vector.load %arg9[%c0_155, %c0_156, %c0_157, %c0_158] : memref<1x8x8x8xf32, #tpu.memory_space<vmem>>, vector<1x8x8x8xf32>
    %154 = vector.shape_cast %153 : vector<1x8x8x8xf32> to vector<8x8x8xf32>
    %155 = vector.shape_cast %152 : vector<8x8x8xf32> to vector<1x8x8x8xf32>
    tpu.vector_store %arg9[%c0_155, %c0_156, %c0_157, %c0_158], %155 {strides = array<i32>} : memref<1x8x8x8xf32, #tpu.memory_space<vmem>>, vector<1x8x8x8xf32>,
    return
  }
  func.func @transform_0(%arg0: i32) -> (i32, i32, i32, i32) {
    %c0_i32 = arith.constant 0 : i32
    %c0_i32_0 = arith.constant 0 : i32
    %c0_i32_1 = arith.constant 0 : i32
    %c0_i32_2 = arith.constant 0 : i32
    return %arg0, %c0_i32, %c0_i32_0, %c0_i32_1 : i32, i32, i32, i32
  }
  func.func @transform_1(%arg0: i32) -> (i32, i32, i32) {
    %c0_i32 = arith.constant 0 : i32
    %c0_i32_0 = arith.constant 0 : i32
    %c0_i32_1 = arith.constant 0 : i32
    %c0_i32_2 = arith.constant 0 : i32
    return %c0_i32, %c0_i32_0, %c0_i32_1 : i32, i32, i32
  }
  func.func @transform_2(%arg0: i32) -> (i32, i32) {
    %c0_i32 = arith.constant 0 : i32
    %c0_i32_0 = arith.constant 0 : i32
    %c0_i32_1 = arith.constant 0 : i32
    return %c0_i32, %c0_i32_0 : i32, i32
  }
  func.func @transform_3(%arg0: i32) -> (i32, i32, i32) {
    %c0_i32 = arith.constant 0 : i32
    %c0_i32_0 = arith.constant 0 : i32
    %c0_i32_1 = arith.constant 0 : i32
    %c0_i32_2 = arith.constant 0 : i32
    return %c0_i32, %c0_i32_0, %c0_i32_1 : i32, i32, i32
  }
  func.func @transform_4(%arg0: i32) -> (i32, i32) {
    %c0_i32 = arith.constant 0 : i32
    %c0_i32_0 = arith.constant 0 : i32
    %c0_i32_1 = arith.constant 0 : i32
    return %c0_i32, %c0_i32_0 : i32, i32
  }
  func.func @transform_5(%arg0: i32) -> (i32, i32) {
    %c0_i32 = arith.constant 0 : i32
    %c0_i32_0 = arith.constant 0 : i32
    %c0_i32_1 = arith.constant 0 : i32
    return %c0_i32, %c0_i32_0 : i32, i32
  }
  func.func @transform_6(%arg0: i32) -> (i32, i32) {
    %c0_i32 = arith.constant 0 : i32
    %c0_i32_0 = arith.constant 0 : i32
    %c0_i32_1 = arith.constant 0 : i32
    return %c0_i32, %c0_i32_0 : i32, i32
  }
  func.func @transform_7(%arg0: i32) -> (i32, i32) {
    %c0_i32 = arith.constant 0 : i32
    %c0_i32_0 = arith.constant 0 : i32
    %c0_i32_1 = arith.constant 0 : i32
    return %c0_i32, %c0_i32_0 : i32, i32
  }
  func.func @transform_8(%arg0: i32) -> (i32, i32, i32, i32) {
    %c0_i32 = arith.constant 0 : i32
    %c0_i32_0 = arith.constant 0 : i32
    %c0_i32_1 = arith.constant 0 : i32
    %c0_i32_2 = arith.constant 0 : i32
    return %arg0, %c0_i32, %c0_i32_0, %c0_i32_1 : i32, i32, i32, i32
  }
}

</mosaic_0001>

<bundles_post_ra>
// kernel: tpu_custom_call.1
= control target key start
LH: loop header
LB: loop body
LE: loop exit
PB: predicated region body
PF: predicated region fallthrough
CT: control target
= control target key end

     0   :  { %13 = vsyncpa [#allocation4], 0  ;;  %s13693_s0 = inlined_call_operand.vmem [shape: f32[2,18,18,4], index: 0, kind: input, shape index: {}]   ;;  %s13694_s1 = inlined_call_operand.vmem [shape: f32[9,4,8], index: 1, kind: input, shape index: {}]   ;;  %s13695_s2 = inlined_call_operand.vmem [shape: f32[1,8], index: 2, kind: input, shape index: {}]   ;;  %s13696_s3 = inlined_call_operand.vmem [shape: f32[9,8,8], index: 3, kind: input, shape index: {}]   ;;  %s13697_s4 = inlined_call_operand.vmem [shape: f32[1,8], index: 4, kind: input, shape index: {}]   ;;  %s13698_s5 = inlined_call_operand.vmem [shape: f32[4,8], index: 5, kind: input, shape index: {}]   ;;  %s13699_s6 = inlined_call_operand.vmem [shape: f32[1,8], index: 6, kind: input, shape index: {}]   ;;  %s13700_s7 = inlined_call_operand.vmem [shape: f32[64,256], index: 7, kind: input, shape index: {}]   ;;  %s13701_s8 = inlined_call_operand.hbm [shape: f32[2,8,8,8], index: 8, kind: output, shape index: {}]  }
   0x1   :  { %15 = vsyncpa [#allocation4 + $0x1], 0  ;;  %s11372_s27 = smov 0   ;;  %s11374_s28 = smov 0  }
   0x2   :  { %s11376_s29 = smov 0   ;;  %s11378_s30 = smov 0  }
   0x3 LB: > { %s11393_s9 = sadd.s32 4294967295, %s11321_s30   ;;  %s8164_s10 = sadd.s32 4294967294, %s11321_s30   ;;  %s11321_s30 = sphi %s11378_s30, %s13993_s30   ;;  %s11317_s29 = sphi %s11376_s29, %s13992_s29   ;;  %s11313_s28 = sphi %s11374_s28, %s13991_s28   ;;  %s11309_s27 = sphi %s11372_s27, %s13990_s27  }
   0x4   : > { %s11397_s11 = sadd.s32 1, %s11321_s30   ;;  %s201_s12 = sadd.s32 1, %s11317_s29 }
   0x5   : > { %s198_s13 = ssub.s32 %s11321_s30, %s11397_s11  ;;  %p211_p0 = scmp.ne.s32.totalorder %s11317_s29, %s11313_s28 }
   0x6   : > { %p199_p1 = scmp.eq.s32.totalorder %s198_s13, 0  ;;  %p212_p2 = scmp.eq.s32.totalorder %s11393_s9, 1 }
   0x7   : > { %p217_p3 = scmp.ne.s32.totalorder %s11313_s28, %s11309_s27  ;;  %p218_p4 = scmp.eq.s32.totalorder %s8164_s10, 1 }
   0x8   : > { %s11408_s14 = scalar_select %p199_p1, %s11317_s29, %s201_s12  }
   0x9   : > { %p11410_p5 = por %p212_p2, %p211_p0  ;;  %p11414_p6 = por %p218_p4, %p217_p3 }
   0xa   : > { %p8167_p7 = scmp.ge.s32.totalorder %s11321_s30, 1  ;;  %p265_p8 = scmp.lt.s32.totalorder %s11321_s30, 3 }
   0xc   : > { %p266_p9 = pnand %p8167_p7, %p265_p8 }
   0xe   : > { %269 = sbr.rel (%p266_p9) target bundleno = 1809 (0x711), region = 52 }
  0x15   : > { %v8170_v0 = vld [vmem:[%s13694_s1 + $0x4] sm:$0xf]  ;;  %vm468_vm0 = vcmask 1043456   ;;  %p299_p10 = scmp.lt.s32.totalorder %s11393_s9, 1  ;;  %v336_v1 = vld [vmem:[%s13694_s1] sm:$0xf] }
  0x16   : > { %9720 = vmatprep.subr.msk.mxu0 %vm468_vm0, %v8170_v0  ;;  %10702 = vmatprep.subr.msk.mxu1 %vm468_vm0, %v8170_v0  ;;  %vm371_vm1 = vcmask 31744   ;;  %v8237_v5 = vld [vmem:[%s13694_s1 + $0x8] sm:$0xf]  ;;  %v11566_v30 = vld [vmem:[%s13694_s1 + $0xc] sm:$0xf]  ;;  %vm3888_vm2 = vcmask 64512  }
  0x17   : > { %9721 = vmatpush3.msk.msra.mxu0 %vm468_vm0, %v8170_v0  ;;  %s300_s21 = scalar_select %p299_p10, %s11393_s9, 1  ;;  %10703 = vmatpush3.msk.msra.mxu1 %vm468_vm0, %v8170_v0  ;;  %v11728_v63 = vld [vmem:[%s13694_s1 + $0x10] sm:$0xf]  ;;  %vm3891_vm3 = vcmask 58368  }
  0x18   : > { %9770 = vmatprep.subr.msk.mxu0 %vm468_vm0, %v336_v1  ;;  %s11324_s18 = smov [#allocation3]  }
  0x19   : > { %s11216_s22 = smul.u32 432, %s300_s21  ;;  %s11263_s19 = sshll.u32 %s11324_s18, 4  ;;  %s11264_s19 = int_to_ptr.vmem [resolvable:$false] %s11263_s19 }
  0x1a   : > { %s11265_s20 = scalar_lea.vmem %s11264_s19, 2048 }
  0x1b   : > { %s11436_s25 = scalar_lea.vmem %s13693_s0, %s11216_s22  ;;  %s296_s22 = sand.u32 1, %s11313_s28  }
  0x1c   : > { %v337_v2 = vld [vmem:[%s11436_s25 + $0x1] sm:$0xff]  ;;  %v338_v3 = vld [vmem:[%s11436_s25 + $0x9] sm:$0xff]  ;;  %v11441_v4 = vld [vmem:[%s11436_s25 + $0x19] sm:$0xff]  ;;  %s8168_s23 = sshll.u32 %s296_s22, 6 }
  0x1d   : > { %9722 = vmatprep.mubr.msk.f32.mxu0 %vm371_vm1, %v337_v2  ;;  %v11451_v6 = vld [vmem:[%s11436_s25 + $0x21] sm:$0xff]  ;;  %v11455_v7 = vld [vmem:[%s11436_s25 + $0x31] sm:$0xff]  ;;  %v11463_v8 = vld [vmem:[%s11436_s25 + $0x39] sm:$0xff]  ;;  %s13623_s24 = scalar_lea.vmem [#allocation3], %s8168_s23 }
  0x1e   : > { %9723 = vmatmul.mubr.msk.f32.vlgmr.msra.gmra.mrb[0].mxu0 %vm371_vm1, %v338_v3  ;;  %v11466_v9 = vld [vmem:[%s11436_s25 + $0x49] sm:$0xff]  ;;  %v11473_v10 = vld [vmem:[%s11436_s25 + $0x51] sm:$0xff]  ;;  %v11476_v11 = vld [vmem:[%s11436_s25 + $0x61] sm:$0xff]  ;;  %s8102_s26 = sshll.u32 %s13623_s24, 4  ;;  %s13646_s26 = int_to_ptr.vmem [resolvable:$true] %s8102_s26 }
  0x1f   : > { %9725 = vmatprep.mubr.msk.f32.mxu0 %vm371_vm1, %v11441_v4  ;;  %9771 = vmatpush3.msk.msra.mxu0 %vm468_vm0, %v336_v1  ;;  %v11483_v12 = vld [vmem:[%s11436_s25 + $0x69] sm:$0xff]  ;;  %v11486_v13 = vld [vmem:[%s11436_s25 + $0x79] sm:$0xff]  ;;  %v11493_v14 = vld [vmem:[%s11436_s25 + $0x81] sm:$0xff]  ;;  %s11259_s17 = scalar_lea.vmem %s13646_s26, 1024  ;;  %p11266_p0 = scmp.lt.s32.totalorder %s13646_s26, %s11264_s19 }
  0x20   : > { %9820 = vmatprep.subr.msk.mxu0 %vm468_vm0, %v8237_v5  ;;  %v11496_v15 = vld [vmem:[%s11436_s25 + $0x91] sm:$0xff]  ;;  %v11503_v16 = vld [vmem:[%s11436_s25 + $0x99] sm:$0xff]  ;;  %v11506_v17 = vld [vmem:[%s11436_s25 + $0xa9] sm:$0xff]  ;;  %p11260_p11 = scmp.ne.s32.totalorder %s13646_s26, %s11259_s17  ;;  %p11267_p1 = scmp.lt.s32.totalorder %s11265_s20, %s11259_s17 }
  0x21   : > { %v11513_v18 = vld [vmem:[%s11436_s25 + $0xb1] sm:$0xff]  ;;  %v11516_v19 = vld [vmem:[%s11436_s25 + $0xc1] sm:$0xff]  ;;  %v11523_v20 = vld [vmem:[%s11436_s25 + $0xc9] sm:$0xff] }
  0x22   : > { %9726 = vmatmul.mubr.msk.f32.gmra.mrb[2].mxu0 %vm371_vm1, %v11451_v6  ;;  %v11526_v21 = vld [vmem:[%s11436_s25 + $0xd9] sm:$0xff]  ;;  %v11533_v22 = vld [vmem:[%s11436_s25 + $0xe1] sm:$0xff]  ;;  %v11536_v23 = vld [vmem:[%s11436_s25 + $0xf1] sm:$0xff]  ;;  %p11261_p12 = pnand %p11260_p11, %p11410_p5  ;;  %p11268_p2 = por %p11267_p1, %p11266_p0 }
  0x23   : > { %9728 = vmatprep.mubr.msk.f32.mxu0 %vm371_vm1, %v11455_v7  ;;  %v11543_v24 = vld [vmem:[%s11436_s25 + $0xf9] sm:$0xff]  ;;  %v11546_v25 = vld [vmem:[%s11436_s25 + $0x109] sm:$0xff]  ;;  %v11553_v26 = vld [vmem:[%s11436_s25 + $0x111] sm:$0xff] }
  0x24   : > { %v304_v27 = vld [vmem:[%s11436_s25] sm:$0xff]  ;;  %v305_v28 = vld [vmem:[%s11436_s25 + $0x8] sm:$0xff]  ;;  %v11561_v29 = vld [vmem:[%s11436_s25 + $0x18] sm:$0xff]  ;;  %p11262_p13 = pneg %p11261_p12 }
  0x25   : > { %v11572_v31 = vld [vmem:[%s11436_s25 + $0x20] sm:$0xff]  ;;  %v11576_v32 = vld [vmem:[%s11436_s25 + $0x30] sm:$0xff]  ;;  %v11585_v33 = vld [vmem:[%s11436_s25 + $0x38] sm:$0xff] }
  0x26   : > { %9729 = vmatmul.mubr.msk.f32.gmra.mrb[4].mxu0 %vm371_vm1, %v11463_v8  ;;  %v11588_v34 = vld [vmem:[%s11436_s25 + $0x48] sm:$0xff]  ;;  %v11595_v35 = vld [vmem:[%s11436_s25 + $0x50] sm:$0xff]  ;;  %v11598_v36 = vld [vmem:[%s11436_s25 + $0x60] sm:$0xff]  ;;  %p11269_p3 = pnand %p11268_p2, %p11262_p13 }
  0x27   : > { %9731 = vmatprep.mubr.msk.f32.mxu0 %vm371_vm1, %v11466_v9  ;;  %v11605_v37 = vld [vmem:[%s11436_s25 + $0x68] sm:$0xff]  ;;  %v11608_v38 = vld [vmem:[%s11436_s25 + $0x78] sm:$0xff]  ;;  %v11615_v39 = vld [vmem:[%s11436_s25 + $0x80] sm:$0xff] }
  0x28   : > { %v11618_v40 = vld [vmem:[%s11436_s25 + $0x90] sm:$0xff]  ;;  %v11625_v41 = vld [vmem:[%s11436_s25 + $0x98] sm:$0xff]  ;;  %v11628_v42 = vld [vmem:[%s11436_s25 + $0xa8] sm:$0xff] }
  0x29   : > { %v11635_v43 = vld [vmem:[%s11436_s25 + $0xb0] sm:$0xff]  ;;  %v11638_v44 = vld [vmem:[%s11436_s25 + $0xc0] sm:$0xff]  ;;  %v11645_v45 = vld [vmem:[%s11436_s25 + $0xc8] sm:$0xff] }
  0x2a   : > { %9732 = vmatmul.mubr.msk.f32.gmra.mrb[6].mxu0 %vm371_vm1, %v11473_v10  ;;  %v11648_v46 = vld [vmem:[%s11436_s25 + $0xd8] sm:$0xff]  ;;  %v11655_v47 = vld [vmem:[%s11436_s25 + $0xe0] sm:$0xff]  ;;  %v11658_v48 = vld [vmem:[%s11436_s25 + $0xf0] sm:$0xff] }
  0x2b   : > { %9734 = vmatprep.mubr.msk.f32.mxu0 %vm371_vm1, %v11476_v11  ;;  %v11665_v49 = vld [vmem:[%s11436_s25 + $0xf8] sm:$0xff]  ;;  %v11668_v50 = vld [vmem:[%s11436_s25 + $0x108] sm:$0xff]  ;;  %v11675_v51 = vld [vmem:[%s11436_s25 + $0x110] sm:$0xff] }
  0x2c   : > { %v11678_v52 = vld [vmem:[%s11436_s25 + $0x120] sm:$0xff]  ;;  %v11685_v53 = vld [vmem:[%s11436_s25 + $0x128] sm:$0xff]  ;;  %v11688_v54 = vld [vmem:[%s11436_s25 + $0x138] sm:$0xff] }
  0x2d   : > { %v11695_v55 = vld [vmem:[%s11436_s25 + $0x140] sm:$0xff]  ;;  %v11698_v56 = vld [vmem:[%s11436_s25 + $0x150] sm:$0xff]  ;;  %v11705_v57 = vld [vmem:[%s11436_s25 + $0x158] sm:$0xff] }
  0x2e   : > { %9735 = vmatmul.mubr.msk.f32.gmra.mrb[8].mxu0 %vm371_vm1, %v11483_v12  ;;  %v11708_v58 = vld [vmem:[%s11436_s25 + $0x168] sm:$0xff]  ;;  %v11715_v59 = vld [vmem:[%s11436_s25 + $0x170] sm:$0xff]  ;;  %v11723_v62 = vld [vmem:[%s11436_s25 + $0x1a] sm:$0xff] }
  0x2f   : > { %9737 = vmatprep.mubr.msk.f32.mxu0 %vm371_vm1, %v11486_v13  ;;  %v1021_v60 = vld [vmem:[%s11436_s25 + $0x2] sm:$0xff]  ;;  %v1022_v61 = vld [vmem:[%s11436_s25 + $0xa] sm:$0xff]  ;;  %13824 = vst [vmem:[#allocation6_spill] sm:$0xff] %v11723_v62  ;;  %v11739_v1 = vld [vmem:[%s11436_s25 + $0x32] sm:$0xff] }
  0x30   : > { %v11734_v0 = vld [vmem:[%s11436_s25 + $0x22] sm:$0xff]  ;;  %13826 = vst [vmem:[#allocation8_spill] sm:$0xff] %v11739_v1  ;;  %v11748_v2 = vld [vmem:[%s11436_s25 + $0x3a] sm:$0xff]  ;;  %v11751_v3 = vld [vmem:[%s11436_s25 + $0x4a] sm:$0xff] }
  0x31   : > { %13825 = vst [vmem:[#allocation7_spill] sm:$0xff] %v11734_v0  ;;  %13827 = vst [vmem:[#allocation9_spill] sm:$0xff] %v11748_v2 }
  0x32   : > { %9738 = vmatmul.mubr.msk.f32.gmra.mrb[10].mxu0 %vm371_vm1, %v11493_v14  ;;  %13828 = vst [vmem:[#allocation10_spill] sm:$0xff] %v11751_v3 }
  0x33   : > { %9740 = vmatprep.mubr.msk.f32.mxu0 %vm371_vm1, %v11496_v15 }
  0x36   : > { %9741 = vmatmul.mubr.msk.f32.gmra.mrb[12].mxu0 %vm371_vm1, %v11503_v16 }
  0x37   : > { %9743 = vmatprep.mubr.msk.f32.mxu0 %vm371_vm1, %v11506_v17 }
  0x3a   : > { %9744 = vmatmul.mubr.msk.f32.gmra.mrb[14].mxu0 %vm371_vm1, %v11513_v18 }
  0x3b   : > { %9746 = vmatprep.mubr.msk.f32.mxu0 %vm371_vm1, %v11516_v19 }
  0x3e   : > { %9747 = vmatmul.mubr.msk.f32.gmra.mrb[16].mxu0 %vm371_vm1, %v11523_v20 }
  0x3f   : > { %9749 = vmatprep.mubr.msk.f32.mxu0 %vm371_vm1, %v11526_v21 }
  0x42   : > { %9750 = vmatmul.mubr.msk.f32.gmra.mrb[18].mxu0 %vm371_vm1, %v11533_v22 }
  0x43   : > { %9752 = vmatprep.mubr.msk.f32.mxu0 %vm371_vm1, %v11536_v23 }
  0x46   : > { %9753 = vmatmul.mubr.msk.f32.gmra.mrb[20].mxu0 %vm371_vm1, %v11543_v24 }
  0x47   : > { %9755 = vmatprep.mubr.msk.f32.mxu0 %vm371_vm1, %v11546_v25 }
  0x4a   : > { %9756 = vmatmul.mubr.msk.f32.gmra.mrb[22].mxu0 %vm371_vm1, %v11553_v26 }
  0x4b   : > { %9772 = vmatprep.mubr.msk.f32.mxu0 %vm371_vm1, %v304_v27  ;;  %v11761_v27 = vld [vmem:[%s11436_s25 + $0x62] sm:$0xff] }
  0x4c   : > { %13830 = vst [vmem:[#allocation12_spill] sm:$0xff] %v11761_v27 }
  0x4e   : > { %9773 = vmatmul.mubr.msk.f32.vlgmr.msra.gmra.mrb[0].mxu0 %vm371_vm1, %v305_v28  ;;  %v11768_v28 = vld [vmem:[%s11436_s25 + $0x6a] sm:$0xff] }
  0x4f   : > { %9775 = vmatprep.mubr.msk.f32.mxu0 %vm371_vm1, %v11561_v29  ;;  %9821 = vmatpush3.msk.msra.mxu0 %vm468_vm0, %v8237_v5  ;;  %v11758_v5 = vld [vmem:[%s11436_s25 + $0x52] sm:$0xff]  ;;  %13831 = vst [vmem:[#allocation13_spill] sm:$0xff] %v11768_v28 }
  0x50   : > { %9870 = vmatprep.subr.msk.mxu0 %vm468_vm0, %v11566_v30  ;;  %13829 = vst [vmem:[#allocation11_spill] sm:$0xff] %v11758_v5 }
  0x52   : > { %9776 = vmatmul.mubr.msk.f32.gmra.mrb[2].mxu0 %vm371_vm1, %v11572_v31 }
  0x53   : > { %9778 = vmatprep.mubr.msk.f32.mxu0 %vm371_vm1, %v11576_v32 }
  0x56   : > { %9779 = vmatmul.mubr.msk.f32.gmra.mrb[4].mxu0 %vm371_vm1, %v11585_v33 }
  0x57   : > { %9781 = vmatprep.mubr.msk.f32.mxu0 %vm371_vm1, %v11588_v34 }
  0x5a   : > { %9782 = vmatmul.mubr.msk.f32.gmra.mrb[6].mxu0 %vm371_vm1, %v11595_v35 }
  0x5b   : > { %9784 = vmatprep.mubr.msk.f32.mxu0 %vm371_vm1, %v11598_v36 }
  0x5e   : > { %9785 = vmatmul.mubr.msk.f32.gmra.mrb[8].mxu0 %vm371_vm1, %v11605_v37 }
  0x5f   : > { %9787 = vmatprep.mubr.msk.f32.mxu0 %vm371_vm1, %v11608_v38 }
  0x62   : > { %9788 = vmatmul.mubr.msk.f32.gmra.mrb[10].mxu0 %vm371_vm1, %v11615_v39 }
  0x63   : > { %9790 = vmatprep.mubr.msk.f32.mxu0 %vm371_vm1, %v11618_v40 }
  0x66   : > { %9791 = vmatmul.mubr.msk.f32.gmra.mrb[12].mxu0 %vm371_vm1, %v11625_v41 }
  0x67   : > { %9793 = vmatprep.mubr.msk.f32.mxu0 %vm371_vm1, %v11628_v42 }
  0x6a   : > { %9794 = vmatmul.mubr.msk.f32.gmra.mrb[14].mxu0 %vm371_vm1, %v11635_v43 }
  0x6b   : > { %9796 = vmatprep.mubr.msk.f32.mxu0 %vm371_vm1, %v11638_v44 }
  0x6e   : > { %9797 = vmatmul.mubr.msk.f32.gmra.mrb[16].mxu0 %vm371_vm1, %v11645_v45 }
  0x6f   : > { %9799 = vmatprep.mubr.msk.f32.mxu0 %vm371_vm1, %v11648_v46 }
  0x72   : > { %9800 = vmatmul.mubr.msk.f32.gmra.mrb[18].mxu0 %vm371_vm1, %v11655_v47 }
  0x73   : > { %9802 = vmatprep.mubr.msk.f32.mxu0 %vm371_vm1, %v11658_v48 }
  0x76   : > { %9803 = vmatmul.mubr.msk.f32.gmra.mrb[20].mxu0 %vm371_vm1, %v11665_v49 }
  0x77   : > { %9805 = vmatprep.mubr.msk.f32.mxu0 %vm371_vm1, %v11668_v50 }
  0x7a   : > { %9806 = vmatmul.mubr.msk.f32.gmra.mrb[22].mxu0 %vm371_vm1, %v11675_v51 }
  0x7b   : > { %9808 = vmatprep.mubr.msk.f32.mxu0 %vm371_vm1, %v11678_v52 }
  0x7e   : > { %9809 = vmatmul.mubr.msk.f32.gmra.mrb[24].mxu0 %vm371_vm1, %v11685_v53 }
  0x7f   : > { %9811 = vmatprep.mubr.msk.f32.mxu0 %vm371_vm1, %v11688_v54 }
  0x82   : > { %9812 = vmatmul.mubr.msk.f32.gmra.mrb[26].mxu0 %vm371_vm1, %v11695_v55 }
  0x83   : > { %9814 = vmatprep.mubr.msk.f32.mxu0 %vm371_vm1, %v11698_v56 }
  0x86   : > { %9815 = vmatmul.mubr.msk.f32.gmra.mrb[28].mxu0 %vm371_vm1, %v11705_v57 }
  0x87   : > { %9817 = vmatprep.mubr.msk.f32.mxu0 %vm371_vm1, %v11708_v58 }
  0x8a   : > { %9818 = vmatmul.mubr.msk.f32.gmra.mrb[30].mxu0 %vm371_vm1, %v11715_v59 }
  0x8b   : > { %9822 = vmatprep.mubr.msk.f32.mxu0 %vm371_vm1, %v1021_v60  ;;  %v11778_v60 = vld [vmem:[%s11436_s25 + $0x82] sm:$0xff] }
  0x8c   : > { %13833 = vst [vmem:[#allocation15_spill] sm:$0xff] %v11778_v60 }
  0x8e   : > { %9823 = vmatmul.mubr.msk.f32.vlgmr.msra.gmra.mrb[0].mxu0 %vm371_vm1, %v1022_v61  ;;  %v11781_v61 = vld [vmem:[%s11436_s25 + $0x92] sm:$0xff] }
  0x8f   : > { %9825 = vmatprep.mubr.msk.f32.mxu0 %vm371_vm1, %v11723_v62  ;;  %9871 = vmatpush3.msk.msra.mxu0 %vm468_vm0, %v11566_v30  ;;  %v11771_v30 = vld [vmem:[%s11436_s25 + $0x7a] sm:$0xff]  ;;  %13834 = vst [vmem:[#allocation16_spill] sm:$0xff] %v11781_v61  ;;  %v11904_v62 = vld [vmem:[%s11436_s25 + $0x171] sm:$0xff] }
  0x90   : > { %9920 = vmatprep.subr.msk.mxu0 %vm468_vm0, %v11728_v63  ;;  %13832 = vst [vmem:[#allocation14_spill] sm:$0xff] %v11771_v30  ;;  %13856 = vst [vmem:[#allocation38_spill] sm:$0xff] %v11904_v62 }
  0x92   : > { %9826 = vmatmul.mubr.msk.f32.gmra.mrb[2].mxu0 %vm371_vm1, %v11734_v0  ;;  %v11889_v0 = vld [vmem:[%s11436_s25 + $0x152] sm:$0xff] }
  0x93   : > { %9828 = vmatprep.mubr.msk.f32.mxu0 %vm371_vm1, %v11739_v1  ;;  %v11884_v1 = vld [vmem:[%s11436_s25 + $0x159] sm:$0xff]  ;;  %13854 = vst [vmem:[#allocation36_spill] sm:$0xff] %v11889_v0 }
  0x94   : > { %13853 = vst [vmem:[#allocation35_spill] sm:$0xff] %v11884_v1 }
  0x96   : > { %9829 = vmatmul.mubr.msk.f32.gmra.mrb[4].mxu0 %vm371_vm1, %v11748_v2  ;;  %v11869_v2 = vld [vmem:[%s11436_s25 + $0x13a] sm:$0xff] }
  0x97   : > { %9831 = vmatprep.mubr.msk.f32.mxu0 %vm371_vm1, %v11751_v3  ;;  %v11864_v3 = vld [vmem:[%s11436_s25 + $0x141] sm:$0xff]  ;;  %13850 = vst [vmem:[#allocation32_spill] sm:$0xff] %v11869_v2 }
  0x98   : > { %13849 = vst [vmem:[#allocation31_spill] sm:$0xff] %v11864_v3 }
  0x9a   : > { %9832 = vmatmul.mubr.msk.f32.gmra.mrb[6].mxu0 %vm371_vm1, %v11758_v5  ;;  %v11791_v5 = vld [vmem:[%s11436_s25 + $0xaa] sm:$0xff] }
  0x9b   : > { %9834 = vmatprep.mubr.msk.f32.mxu0 %vm371_vm1, %v11761_v27  ;;  %v11788_v27 = vld [vmem:[%s11436_s25 + $0x9a] sm:$0xff]  ;;  %13836 = vst [vmem:[#allocation18_spill] sm:$0xff] %v11791_v5 }
  0x9c   : > { %13835 = vst [vmem:[#allocation17_spill] sm:$0xff] %v11788_v27 }
  0x9e   : > { %9835 = vmatmul.mubr.msk.f32.gmra.mrb[8].mxu0 %vm371_vm1, %v11768_v28  ;;  %v11801_v28 = vld [vmem:[%s11436_s25 + $0xc2] sm:$0xff] }
  0x9f   : > { %9837 = vmatprep.mubr.msk.f32.mxu0 %vm371_vm1, %v11771_v30  ;;  %v11798_v30 = vld [vmem:[%s11436_s25 + $0xb2] sm:$0xff]  ;;  %13838 = vst [vmem:[#allocation20_spill] sm:$0xff] %v11801_v28 }
  0xa0   : > { %13837 = vst [vmem:[#allocation19_spill] sm:$0xff] %v11798_v30 }
  0xa2   : > { %9838 = vmatmul.mubr.msk.f32.gmra.mrb[10].mxu0 %vm371_vm1, %v11778_v60  ;;  %v11821_v60 = vld [vmem:[%s11436_s25 + $0xf2] sm:$0xff] }
  0xa3   : > { %9840 = vmatprep.mubr.msk.f32.mxu0 %vm371_vm1, %v11781_v61  ;;  %v11808_v61 = vld [vmem:[%s11436_s25 + $0xca] sm:$0xff]  ;;  %13842 = vst [vmem:[#allocation24_spill] sm:$0xff] %v11821_v60 }
  0xa4   : > { %13839 = vst [vmem:[#allocation21_spill] sm:$0xff] %v11808_v61 }
  0xa6   : > { %9841 = vmatmul.mubr.msk.f32.gmra.mrb[12].mxu0 %vm371_vm1, %v11788_v27  ;;  %v11811_v27 = vld [vmem:[%s11436_s25 + $0xda] sm:$0xff] }
  0xa7   : > { %9843 = vmatprep.mubr.msk.f32.mxu0 %vm371_vm1, %v11791_v5  ;;  %13840 = vst [vmem:[#allocation22_spill] sm:$0xff] %v11811_v27  ;;  %v11818_v5 = vld [vmem:[%s11436_s25 + $0xe2] sm:$0xff] }
  0xa8   : > { %13841 = vst [vmem:[#allocation23_spill] sm:$0xff] %v11818_v5 }
  0xaa   : > { %9844 = vmatmul.mubr.msk.f32.gmra.mrb[14].mxu0 %vm371_vm1, %v11798_v30  ;;  %v11841_v30 = vld [vmem:[%s11436_s25 + $0x112] sm:$0xff] }
  0xab   : > { %9846 = vmatprep.mubr.msk.f32.mxu0 %vm371_vm1, %v11801_v28  ;;  %v11828_v28 = vld [vmem:[%s11436_s25 + $0xfa] sm:$0xff]  ;;  %13845 = vst [vmem:[#allocation27_spill] sm:$0xff] %v11841_v30 }
  0xac   : > { %13843 = vst [vmem:[#allocation25_spill] sm:$0xff] %v11828_v28 }
  0xae   : > { %9847 = vmatmul.mubr.msk.f32.gmra.mrb[16].mxu0 %vm371_vm1, %v11808_v61  ;;  %v11831_v61 = vld [vmem:[%s11436_s25 + $0x10a] sm:$0xff] }
  0xaf   : > { %9849 = vmatprep.mubr.msk.f32.mxu0 %vm371_vm1, %v11811_v27  ;;  %13844 = vst [vmem:[#allocation26_spill] sm:$0xff] %v11831_v61  ;;  %v11836_v27 = vld [vmem:[%s11436_s25 + $0x121] sm:$0xff] }
  0xb0   : > { %9758 = vmatprep.mubr.msk.f32.mxu1 %vm371_vm1, %v11836_v27 }
  0xb2   : > { %9850 = vmatmul.mubr.msk.f32.gmra.mrb[18].mxu0 %vm371_vm1, %v11818_v5  ;;  %v11844_v5 = vld [vmem:[%s11436_s25 + $0x129] sm:$0xff] }
  0xb3   : > { %9852 = vmatprep.mubr.msk.f32.mxu0 %vm371_vm1, %v11821_v60  ;;  %v11849_v60 = vld [vmem:[%s11436_s25 + $0x122] sm:$0xff]  ;;  %9759 = vmatmul.mubr.msk.f32.vlgmr.msra.gmra.mrb[0].mxu1 %vm371_vm1, %v11844_v5 }
  0xb4   : > { %13846 = vst [vmem:[#allocation28_spill] sm:$0xff] %v11849_v60 }
  0xb6   : > { %9853 = vmatmul.mubr.msk.f32.gmra.mrb[20].mxu0 %vm371_vm1, %v11828_v28  ;;  %v11856_v28 = vld [vmem:[%s11436_s25 + $0x139] sm:$0xff] }
  0xb7   : > { %9855 = vmatprep.mubr.msk.f32.mxu0 %vm371_vm1, %v11831_v61  ;;  %13847 = vst [vmem:[#allocation29_spill] sm:$0xff] %v11856_v28  ;;  %v11861_v61 = vld [vmem:[%s11436_s25 + $0x12a] sm:$0xff]  ;;  %9761 = vmatprep.mubr.msk.f32.mxu1 %vm371_vm1, %v11856_v28 }
  0xb8   : > { %13848 = vst [vmem:[#allocation30_spill] sm:$0xff] %v11861_v61  ;;  %9762 = vmatmul.mubr.msk.f32.gmra.mrb[2].mxu1 %vm371_vm1, %v11864_v3 }
  0xba   : > { %9856 = vmatmul.mubr.msk.f32.gmra.mrb[22].mxu0 %vm371_vm1, %v11841_v30  ;;  %v11876_v30 = vld [vmem:[%s11436_s25 + $0x151] sm:$0xff] }
  0xbb   : > { %9858 = vmatprep.mubr.msk.f32.mxu0 %vm371_vm1, %v11849_v60  ;;  %13851 = vst [vmem:[#allocation33_spill] sm:$0xff] %v11876_v30  ;;  %v11881_v60 = vld [vmem:[%s11436_s25 + $0x142] sm:$0xff]  ;;  %9764 = vmatprep.mubr.msk.f32.mxu1 %vm371_vm1, %v11876_v30  ;;  %v11909_v30 = vld [vmem:[%s11436_s25 + $0x16a] sm:$0xff] }
  0xbc   : > { %13852 = vst [vmem:[#allocation34_spill] sm:$0xff] %v11881_v60  ;;  %9765 = vmatmul.mubr.msk.f32.gmra.mrb[4].mxu1 %vm371_vm1, %v11884_v1  ;;  %13857 = vst [vmem:[#allocation39_spill] sm:$0xff] %v11909_v30 }
  0xbe   : > { %9859 = vmatmul.mubr.msk.f32.gmra.mrb[24].mxu0 %vm371_vm1, %v11861_v61  ;;  %v11896_v61 = vld [vmem:[%s11436_s25 + $0x169] sm:$0xff] }
  0xbf   : > { %9861 = vmatprep.mubr.msk.f32.mxu0 %vm371_vm1, %v11869_v2  ;;  %13855 = vst [vmem:[#allocation37_spill] sm:$0xff] %v11896_v61  ;;  %v11901_v2 = vld [vmem:[%s11436_s25 + $0x15a] sm:$0xff]  ;;  %9767 = vmatprep.mubr.msk.f32.mxu1 %vm371_vm1, %v11896_v61 }
  0xc0   : > { %9768 = vmatmul.mubr.msk.f32.gmra.mrb[6].mxu1 %vm371_vm1, %v11904_v62 }
  0xc2   : > { %9862 = vmatmul.mubr.msk.f32.gmra.mrb[26].mxu0 %vm371_vm1, %v11881_v60  ;;  %v11918_v60 = vld [vmem:[%s11436_s25 + $0x172] sm:$0xff] }
  0xc3   : > { %9864 = vmatprep.mubr.msk.f32.mxu0 %vm371_vm1, %v11889_v0  ;;  %v8435_v0 = vld [vmem:[%s13694_s1 + $0x14] sm:$0xf] }
  0xc6   : > { %9865 = vmatmul.mubr.msk.f32.gmra.mrb[28].mxu0 %vm371_vm1, %v11901_v2 }
  0xc7   : > { %9867 = vmatprep.mubr.msk.f32.mxu0 %vm371_vm1, %v11909_v30 }
  0xca   : > { %9868 = vmatmul.mubr.msk.f32.gmra.mrb[30].mxu0 %vm371_vm1, %v11918_v60 }
  0xcb   : > { %9872 = vmatprep.mubr.msk.f32.mxu0 %vm371_vm1, %v11561_v29  ;;  %v11987_v29 = vld [vmem:[%s11436_s25 + $0x180] sm:$0xff] }
  0xce   : > { %9873 = vmatmul.mubr.msk.f32.vlgmr.msra.gmra.mrb[0].mxu0 %vm371_vm1, %v11572_v31  ;;  %v11994_v31 = vld [vmem:[%s11436_s25 + $0x188] sm:$0xff] }
  0xcf   : > { %9875 = vmatprep.mubr.msk.f32.mxu0 %vm371_vm1, %v11576_v32  ;;  %9921 = vmatpush3.msk.msra.mxu0 %vm468_vm0, %v11728_v63  ;;  %v8501_v63 = vld [vmem:[%s13694_s1 + $0x18] sm:$0xf] }
  0xd0   : > { %9970 = vmatprep.subr.msk.mxu0 %vm468_vm0, %v8435_v0 }
  0xd2   : > { %9876 = vmatmul.mubr.msk.f32.gmra.mrb[2].mxu0 %vm371_vm1, %v11585_v33 }
  0xd3   : > { %9878 = vmatprep.mubr.msk.f32.mxu0 %vm371_vm1, %v11588_v34 }
  0xd6   : > { %9879 = vmatmul.mubr.msk.f32.gmra.mrb[4].mxu0 %vm371_vm1, %v11595_v35 }
  0xd7   : > { %9881 = vmatprep.mubr.msk.f32.mxu0 %vm371_vm1, %v11598_v36 }
  0xda   : > { %9882 = vmatmul.mubr.msk.f32.gmra.mrb[6].mxu0 %vm371_vm1, %v11605_v37 }
  0xdb   : > { %9884 = vmatprep.mubr.msk.f32.mxu0 %vm371_vm1, %v11608_v38 }
  0xde   : > { %9885 = vmatmul.mubr.msk.f32.gmra.mrb[8].mxu0 %vm371_vm1, %v11615_v39 }
  0xdf   : > { %9887 = vmatprep.mubr.msk.f32.mxu0 %vm371_vm1, %v11618_v40 }
  0xe2   : > { %9888 = vmatmul.mubr.msk.f32.gmra.mrb[10].mxu0 %vm371_vm1, %v11625_v41 }
  0xe3   : > { %9890 = vmatprep.mubr.msk.f32.mxu0 %vm371_vm1, %v11628_v42 }
  0xe6   : > { %9891 = vmatmul.mubr.msk.f32.gmra.mrb[12].mxu0 %vm371_vm1, %v11635_v43 }
  0xe7   : > { %9893 = vmatprep.mubr.msk.f32.mxu0 %vm371_vm1, %v11638_v44 }
  0xea   : > { %9894 = vmatmul.mubr.msk.f32.gmra.mrb[14].mxu0 %vm371_vm1, %v11645_v45 }
  0xeb   : > { %9896 = vmatprep.mubr.msk.f32.mxu0 %vm371_vm1, %v11648_v46 }
  0xee   : > { %9897 = vmatmul.mubr.msk.f32.gmra.mrb[16].mxu0 %vm371_vm1, %v11655_v47 }
  0xef   : > { %9899 = vmatprep.mubr.msk.f32.mxu0 %vm371_vm1, %v11658_v48 }
  0xf2   : > { %9900 = vmatmul.mubr.msk.f32.gmra.mrb[18].mxu0 %vm371_vm1, %v11665_v49 }
  0xf3   : > { %9902 = vmatprep.mubr.msk.f32.mxu0 %vm371_vm1, %v11668_v50 }
  0xf6   : > { %9903 = vmatmul.mubr.msk.f32.gmra.mrb[20].mxu0 %vm371_vm1, %v11675_v51 }
  0xf7   : > { %9905 = vmatprep.mubr.msk.f32.mxu0 %vm371_vm1, %v11678_v52 }
  0xfa   : > { %9906 = vmatmul.mubr.msk.f32.gmra.mrb[22].mxu0 %vm371_vm1, %v11685_v53 }
  0xfb   : > { %9908 = vmatprep.mubr.msk.f32.mxu0 %vm371_vm1, %v11688_v54 }
  0xfe   : > { %9909 = vmatmul.mubr.msk.f32.gmra.mrb[24].mxu0 %vm371_vm1, %v11695_v55 }
  0xff   : > { %9911 = vmatprep.mubr.msk.f32.mxu0 %vm371_vm1, %v11698_v56 }
 0x102   : > { %9912 = vmatmul.mubr.msk.f32.gmra.mrb[26].mxu0 %vm371_vm1, %v11705_v57 }
 0x103   : > { %9914 = vmatprep.mubr.msk.f32.mxu0 %vm371_vm1, %v11708_v58 }
 0x106   : > { %9915 = vmatmul.mubr.msk.f32.gmra.mrb[28].mxu0 %vm371_vm1, %v11715_v59 }
 0x107   : > { %9917 = vmatprep.mubr.msk.f32.mxu0 %vm371_vm1, %v11987_v29 }
 0x10a   : > { %9918 = vmatmul.mubr.msk.f32.gmra.mrb[30].mxu0 %vm371_vm1, %v11994_v31 }
 0x10b   : > { %9922 = vmatprep.mubr.msk.f32.mxu0 %vm371_vm1, %v11441_v4  ;;  %v13858_v4 = vld [vmem:[#allocation33_spill] sm:$0xff] }
 0x10e   : > { %9923 = vmatmul.mubr.msk.f32.vlgmr.msra.gmra.mrb[0].mxu0 %vm371_vm1, %v11451_v6  ;;  %v12062_v6 = vld [vmem:[%s11436_s25 + $0x181] sm:$0xff] }
 0x10f   : > { %9925 = vmatprep.mubr.msk.f32.mxu0 %vm371_vm1, %v11455_v7  ;;  %9971 = vmatpush3.msk.msra.mxu0 %vm468_vm0, %v8435_v0  ;;  %13859 = vst [vmem:[#allocation40_spill] sm:$0xff] %v12062_v6  ;;  %v12069_v0 = vld [vmem:[%s11436_s25 + $0x189] sm:$0xff] }
 0x110   : > { %10020 = vmatprep.subr.msk.mxu0 %vm468_vm0, %v8501_v63  ;;  %13860 = vst [vmem:[#allocation41_spill] sm:$0xff] %v12069_v0 }
 0x112   : > { %9926 = vmatmul.mubr.msk.f32.gmra.mrb[2].mxu0 %vm371_vm1, %v11463_v8 }
 0x113   : > { %9928 = vmatprep.mubr.msk.f32.mxu0 %vm371_vm1, %v11466_v9 }
 0x116   : > { %9929 = vmatmul.mubr.msk.f32.gmra.mrb[4].mxu0 %vm371_vm1, %v11473_v10 }
 0x117   : > { %9931 = vmatprep.mubr.msk.f32.mxu0 %vm371_vm1, %v11476_v11 }
 0x11a   : > { %9932 = vmatmul.mubr.msk.f32.gmra.mrb[6].mxu0 %vm371_vm1, %v11483_v12 }
 0x11b   : > { %9934 = vmatprep.mubr.msk.f32.mxu0 %vm371_vm1, %v11486_v13 }
 0x11e   : > { %9935 = vmatmul.mubr.msk.f32.gmra.mrb[8].mxu0 %vm371_vm1, %v11493_v14 }
 0x11f   : > { %9937 = vmatprep.mubr.msk.f32.mxu0 %vm371_vm1, %v11496_v15 }
 0x122   : > { %9938 = vmatmul.mubr.msk.f32.gmra.mrb[10].mxu0 %vm371_vm1, %v11503_v16 }
 0x123   : > { %9940 = vmatprep.mubr.msk.f32.mxu0 %vm371_vm1, %v11506_v17 }
 0x126   : > { %9941 = vmatmul.mubr.msk.f32.gmra.mrb[12].mxu0 %vm371_vm1, %v11513_v18 }
 0x127   : > { %9943 = vmatprep.mubr.msk.f32.mxu0 %vm371_vm1, %v11516_v19 }
 0x12a   : > { %9944 = vmatmul.mubr.msk.f32.gmra.mrb[14].mxu0 %vm371_vm1, %v11523_v20 }
 0x12b   : > { %9946 = vmatprep.mubr.msk.f32.mxu0 %vm371_vm1, %v11526_v21 }
 0x12e   : > { %9947 = vmatmul.mubr.msk.f32.gmra.mrb[16].mxu0 %vm371_vm1, %v11533_v22 }
 0x12f   : > { %9949 = vmatprep.mubr.msk.f32.mxu0 %vm371_vm1, %v11536_v23 }
 0x132   : > { %9950 = vmatmul.mubr.msk.f32.gmra.mrb[18].mxu0 %vm371_vm1, %v11543_v24 }
 0x133   : > { %9952 = vmatprep.mubr.msk.f32.mxu0 %vm371_vm1, %v11546_v25 }
 0x136   : > { %9953 = vmatmul.mubr.msk.f32.gmra.mrb[20].mxu0 %vm371_vm1, %v11553_v26 }
 0x137   : > { %9955 = vmatprep.mubr.msk.f32.mxu0 %vm371_vm1, %v11836_v27 }
 0x13a   : > { %9956 = vmatmul.mubr.msk.f32.gmra.mrb[22].mxu0 %vm371_vm1, %v11844_v5 }
 0x13b   : > { %9958 = vmatprep.mubr.msk.f32.mxu0 %vm371_vm1, %v11856_v28  ;;  %v13871_v28 = vld [vmem:[#allocation16_spill] sm:$0xff] }
 0x13e   : > { %9959 = vmatmul.mubr.msk.f32.gmra.mrb[24].mxu0 %vm371_vm1, %v11864_v3  ;;  %v13863_v3 = vld [vmem:[#allocation8_spill] sm:$0xff] }
 0x13f   : > { %9961 = vmatprep.mubr.msk.f32.mxu0 %vm371_vm1, %v13858_v4  ;;  %v13861_v4 = vld [vmem:[#allocation6_spill] sm:$0xff] }
 0x142   : > { %9962 = vmatmul.mubr.msk.f32.gmra.mrb[26].mxu0 %vm371_vm1, %v11884_v1  ;;  %v13862_v1 = vld [vmem:[#allocation7_spill] sm:$0xff] }
 0x143   : > { %9964 = vmatprep.mubr.msk.f32.mxu0 %vm371_vm1, %v11896_v61  ;;  %v8567_v61 = vld [vmem:[%s13694_s1 + $0x1c] sm:$0xf] }
 0x146   : > { %9965 = vmatmul.mubr.msk.f32.gmra.mrb[28].mxu0 %vm371_vm1, %v11904_v62  ;;  %v13867_v62 = vld [vmem:[#allocation12_spill] sm:$0xff] }
 0x147   : > { %9967 = vmatprep.mubr.msk.f32.mxu0 %vm371_vm1, %v12062_v6  ;;  %v13864_v6 = vld [vmem:[#allocation9_spill] sm:$0xff] }
 0x14a   : > { %9968 = vmatmul.mubr.msk.f32.gmra.mrb[30].mxu0 %vm371_vm1, %v12069_v0  ;;  %v13865_v0 = vld [vmem:[#allocation10_spill] sm:$0xff] }
 0x14b   : > { %9972 = vmatprep.mubr.msk.f32.mxu0 %vm371_vm1, %v13861_v4  ;;  %v13866_v4 = vld [vmem:[#allocation11_spill] sm:$0xff] }
 0x14e   : > { %9973 = vmatmul.mubr.msk.f32.vlgmr.msra.gmra.mrb[0].mxu0 %vm371_vm1, %v13862_v1  ;;  %v13868_v1 = vld [vmem:[#allocation13_spill] sm:$0xff] }
 0x14f   : > { %9975 = vmatprep.mubr.msk.f32.mxu0 %vm371_vm1, %v13863_v3  ;;  %10021 = vmatpush3.msk.msra.mxu0 %vm468_vm0, %v8501_v63  ;;  %v13869_v3 = vld [vmem:[#allocation14_spill] sm:$0xff]  ;;  %v13870_v63 = vld [vmem:[#allocation15_spill] sm:$0xff] }
 0x150   : > { %10070 = vmatprep.subr.msk.mxu0 %vm468_vm0, %v8567_v61 }
 0x152   : > { %9976 = vmatmul.mubr.msk.f32.gmra.mrb[2].mxu0 %vm371_vm1, %v13864_v6  ;;  %v13872_v6 = vld [vmem:[#allocation17_spill] sm:$0xff] }
 0x153   : > { %9978 = vmatprep.mubr.msk.f32.mxu0 %vm371_vm1, %v13865_v0  ;;  %v13873_v0 = vld [vmem:[#allocation18_spill] sm:$0xff] }
 0x156   : > { %9979 = vmatmul.mubr.msk.f32.gmra.mrb[4].mxu0 %vm371_vm1, %v13866_v4  ;;  %v13874_v4 = vld [vmem:[#allocation19_spill] sm:$0xff] }
 0x157   : > { %9981 = vmatprep.mubr.msk.f32.mxu0 %vm371_vm1, %v13867_v62  ;;  %v13875_v62 = vld [vmem:[#allocation20_spill] sm:$0xff] }
 0x15a   : > { %9982 = vmatmul.mubr.msk.f32.gmra.mrb[6].mxu0 %vm371_vm1, %v13868_v1  ;;  %v13885_v1 = vld [vmem:[#allocation32_spill] sm:$0xff] }
 0x15b   : > { %9984 = vmatprep.mubr.msk.f32.mxu0 %vm371_vm1, %v13869_v3  ;;  %v13876_v3 = vld [vmem:[#allocation21_spill] sm:$0xff] }
 0x15e   : > { %9985 = vmatmul.mubr.msk.f32.gmra.mrb[8].mxu0 %vm371_vm1, %v13870_v63  ;;  %v13877_v63 = vld [vmem:[#allocation22_spill] sm:$0xff] }
 0x15f   : > { %9987 = vmatprep.mubr.msk.f32.mxu0 %vm371_vm1, %v13871_v28  ;;  %v13878_v28 = vld [vmem:[#allocation23_spill] sm:$0xff] }
 0x162   : > { %9988 = vmatmul.mubr.msk.f32.gmra.mrb[10].mxu0 %vm371_vm1, %v13872_v6  ;;  %v13879_v6 = vld [vmem:[#allocation24_spill] sm:$0xff] }
 0x163   : > { %9990 = vmatprep.mubr.msk.f32.mxu0 %vm371_vm1, %v13873_v0  ;;  %v13880_v0 = vld [vmem:[#allocation25_spill] sm:$0xff] }
 0x166   : > { %9991 = vmatmul.mubr.msk.f32.gmra.mrb[12].mxu0 %vm371_vm1, %v13874_v4  ;;  %v13881_v4 = vld [vmem:[#allocation26_spill] sm:$0xff] }
 0x167   : > { %9993 = vmatprep.mubr.msk.f32.mxu0 %vm371_vm1, %v13875_v62  ;;  %v13882_v62 = vld [vmem:[#allocation27_spill] sm:$0xff] }
 0x16a   : > { %9994 = vmatmul.mubr.msk.f32.gmra.mrb[14].mxu0 %vm371_vm1, %v13876_v3  ;;  %v13883_v3 = vld [vmem:[#allocation28_spill] sm:$0xff] }
 0x16b   : > { %9996 = vmatprep.mubr.msk.f32.mxu0 %vm371_vm1, %v13877_v63  ;;  %v13884_v63 = vld [vmem:[#allocation30_spill] sm:$0xff] }
 0x16e   : > { %9997 = vmatmul.mubr.msk.f32.gmra.mrb[16].mxu0 %vm371_vm1, %v13878_v28  ;;  %v13886_v28 = vld [vmem:[#allocation34_spill] sm:$0xff] }
 0x16f   : > { %9999 = vmatprep.mubr.msk.f32.mxu0 %vm371_vm1, %v13879_v6  ;;  %v13887_v6 = vld [vmem:[#allocation36_spill] sm:$0xff] }
 0x172   : > { %10000 = vmatmul.mubr.msk.f32.gmra.mrb[18].mxu0 %vm371_vm1, %v13880_v0 }
 0x173   : > { %10002 = vmatprep.mubr.msk.f32.mxu0 %vm371_vm1, %v13881_v4 }
 0x176   : > { %10003 = vmatmul.mubr.msk.f32.gmra.mrb[20].mxu0 %vm371_vm1, %v13882_v62  ;;  %v12137_v62 = vld [vmem:[%s11436_s25 + $0x182] sm:$0xff] }
 0x177   : > { %10005 = vmatprep.mubr.msk.f32.mxu0 %vm371_vm1, %v13883_v3 }
 0x17a   : > { %10006 = vmatmul.mubr.msk.f32.gmra.mrb[22].mxu0 %vm371_vm1, %v13884_v63 }
 0x17b   : > { %10008 = vmatprep.mubr.msk.f32.mxu0 %vm371_vm1, %v13885_v1  ;;  %v12144_v1 = vld [vmem:[%s11436_s25 + $0x18a] sm:$0xff] }
 0x17e   : > { %10009 = vmatmul.mubr.msk.f32.gmra.mrb[24].mxu0 %vm371_vm1, %v13886_v28 }
 0x17f   : > { %10011 = vmatprep.mubr.msk.f32.mxu0 %vm371_vm1, %v13887_v6 }
 0x182   : > { %10012 = vmatmul.mubr.msk.f32.gmra.mrb[26].mxu0 %vm371_vm1, %v11901_v2 }
 0x183   : > { %10014 = vmatprep.mubr.msk.f32.mxu0 %vm371_vm1, %v11909_v30  ;;  %v8633_v30 = vld [vmem:[%s13694_s1 + $0x20] sm:$0xf] }
 0x186   : > { %10015 = vmatmul.mubr.msk.f32.gmra.mrb[28].mxu0 %vm371_vm1, %v11918_v60 }
 0x187   : > { %10017 = vmatprep.mubr.msk.f32.mxu0 %vm371_vm1, %v12137_v62 }
 0x18a   : > { %10018 = vmatmul.mubr.msk.f32.gmra.mrb[30].mxu0 %vm371_vm1, %v12144_v1 }
 0x18b   : > { %10022 = vmatprep.mubr.msk.f32.mxu0 %vm371_vm1, %v11576_v32  ;;  %v8499_v32 = vld [vmem:[%s11436_s25 + $0x198] sm:$0xff] }
 0x18e   : > { %10023 = vmatmul.mubr.msk.f32.vlgmr.msra.gmra.mrb[0].mxu0 %vm371_vm1, %v11585_v33  ;;  %v8500_v33 = vld [vmem:[%s11436_s25 + $0x1a0] sm:$0xff] }
 0x18f   : > { %10025 = vmatprep.mubr.msk.f32.mxu0 %vm371_vm1, %v11588_v34  ;;  %10071 = vmatpush3.msk.msra.mxu0 %vm468_vm0, %v8567_v61  ;;  %v13906_v34 = vld [vmem:[#allocation18_spill] sm:$0xff] }
 0x190   : > { %10120 = vmatprep.subr.msk.mxu0 %vm468_vm0, %v8633_v30 }
 0x192   : > { %10026 = vmatmul.mubr.msk.f32.gmra.mrb[2].mxu0 %vm371_vm1, %v11595_v35  ;;  %v13907_v35 = vld [vmem:[#allocation19_spill] sm:$0xff] }
 0x193   : > { %10028 = vmatprep.mubr.msk.f32.mxu0 %vm371_vm1, %v11598_v36  ;;  %v13908_v36 = vld [vmem:[#allocation20_spill] sm:$0xff] }
 0x196   : > { %10029 = vmatmul.mubr.msk.f32.gmra.mrb[4].mxu0 %vm371_vm1, %v11605_v37  ;;  %v13909_v37 = vld [vmem:[#allocation21_spill] sm:$0xff] }
 0x197   : > { %10031 = vmatprep.mubr.msk.f32.mxu0 %vm371_vm1, %v11608_v38  ;;  %v13910_v38 = vld [vmem:[#allocation22_spill] sm:$0xff] }
 0x19a   : > { %10032 = vmatmul.mubr.msk.f32.gmra.mrb[6].mxu0 %vm371_vm1, %v11615_v39  ;;  %v13911_v39 = vld [vmem:[#allocation23_spill] sm:$0xff] }
 0x19b   : > { %10034 = vmatprep.mubr.msk.f32.mxu0 %vm371_vm1, %v11618_v40  ;;  %v13912_v40 = vld [vmem:[#allocation24_spill] sm:$0xff] }
 0x19e   : > { %10035 = vmatmul.mubr.msk.f32.gmra.mrb[8].mxu0 %vm371_vm1, %v11625_v41  ;;  %v13913_v41 = vld [vmem:[#allocation27_spill] sm:$0xff] }
 0x19f   : > { %10037 = vmatprep.mubr.msk.f32.mxu0 %vm371_vm1, %v11628_v42  ;;  %v13914_v42 = vld [vmem:[#allocation32_spill] sm:$0xff] }
 0x1a2   : > { %10038 = vmatmul.mubr.msk.f32.gmra.mrb[10].mxu0 %vm371_vm1, %v11635_v43  ;;  %v13915_v43 = vld [vmem:[#allocation39_spill] sm:$0xff] }
 0x1a3   : > { %10040 = vmatprep.mubr.msk.f32.mxu0 %vm371_vm1, %v11638_v44  ;;  %v8631_v44 = vld [vmem:[%s11436_s25 + $0x19a] sm:$0xff] }
 0x1a6   : > { %10041 = vmatmul.mubr.msk.f32.gmra.mrb[12].mxu0 %vm371_vm1, %v11645_v45  ;;  %v8632_v45 = vld [vmem:[%s11436_s25 + $0x1a2] sm:$0xff] }
 0x1a7   : > { %10043 = vmatprep.mubr.msk.f32.mxu0 %vm371_vm1, %v11648_v46  ;;  %v11323_v46 = vmov 0.0  }
 0x1a8   : > { %3894 = vst.msk [vmem:[#allocation2 + $0x20] sm:$0xff] %vm3888_vm2, %v11323_v46  ;;  %3889 = vst.msk [vmem:[#allocation2] sm:$0xff] %vm3888_vm2, %v11323_v46 }
 0x1a9   : > { %3890 = vst.msk [vmem:[#allocation2 + $0x8] sm:$0xff] %vm3888_vm2, %v11323_v46  ;;  %3893 = vst.msk [vmem:[#allocation2 + $0x18] sm:$0xff] %vm3888_vm2, %v11323_v46 }
 0x1aa   : > { %10044 = vmatmul.mubr.msk.f32.gmra.mrb[14].mxu0 %vm371_vm1, %v11655_v47  ;;  %3896 = vst.msk [vmem:[#allocation2 + $0x30] sm:$0xff] %vm3888_vm2, %v11323_v46  ;;  %3897 = vst.msk [vmem:[#allocation2 + $0x38] sm:$0xff] %vm3888_vm2, %v11323_v46  ;;  %v8668_v47 = vld [vmem:[%s13696_s3 + $0x8] sm:$0xff] }
 0x1ab   : > { %10046 = vmatprep.mubr.msk.f32.mxu0 %vm371_vm1, %v11658_v48  ;;  %3899 = vst.msk [vmem:[#allocation2 + $0x48] sm:$0xff] %vm3888_vm2, %v11323_v46  ;;  %3900 = vst.msk [vmem:[#allocation2 + $0x50] sm:$0xff] %vm3888_vm2, %v11323_v46  ;;  %10170 = vmatprep.subr.mxu1 %v8668_v47 }
 0x1ac   : > { %3902 = vst.msk [vmem:[#allocation2 + $0x60] sm:$0xff] %vm3888_vm2, %v11323_v46  ;;  %3903 = vst.msk [vmem:[#allocation2 + $0x68] sm:$0xff] %vm3888_vm2, %v11323_v46  ;;  %10171 = vmatpush3.msra.mxu1 %v8668_v47 }
 0x1ad   : > { %3905 = vst.msk [vmem:[#allocation2 + $0x78] sm:$0xff] %vm3888_vm2, %v11323_v46  ;;  %3906 = vst.msk [vmem:[#allocation2 + $0x80] sm:$0xff] %vm3888_vm2, %v11323_v46 }
 0x1ae   : > { %10047 = vmatmul.mubr.msk.f32.gmra.mrb[16].mxu0 %vm371_vm1, %v11665_v49  ;;  %3908 = vst.msk [vmem:[#allocation2 + $0x90] sm:$0xff] %vm3888_vm2, %v11323_v46  ;;  %3909 = vst.msk [vmem:[#allocation2 + $0x98] sm:$0xff] %vm3888_vm2, %v11323_v46 }
 0x1af   : > { %10049 = vmatprep.mubr.msk.f32.mxu0 %vm371_vm1, %v11668_v50  ;;  %3911 = vst.msk [vmem:[#allocation2 + $0xa8] sm:$0xff] %vm3888_vm2, %v11323_v46  ;;  %3912 = vst.msk [vmem:[#allocation2 + $0xb0] sm:$0xff] %vm3888_vm2, %v11323_v46  ;;  %v12405_v50 = vpop.f32.mrb[0].mxu1 }
 0x1b0   : > { %3914 = vst.msk [vmem:[#allocation2 + $0xc0] sm:$0xff] %vm3888_vm2, %v11323_v46  ;;  %3915 = vst.msk [vmem:[#allocation2 + $0xc8] sm:$0xff] %vm3888_vm2, %v11323_v46  ;;  %v4010_v48 = vld [vmem:[#allocation2 + $0x1] sm:$0xff] }
 0x1b1   : > { %3917 = vst.msk [vmem:[#allocation2 + $0xd8] sm:$0xff] %vm3888_vm2, %v11323_v46  ;;  %3918 = vst.msk [vmem:[#allocation2 + $0xe0] sm:$0xff] %vm3888_vm2, %v11323_v46  ;;  %10172 = vmatprep.mubr.msk.f32.mxu1 %vm3888_vm2, %v4010_v48 }
 0x1b2   : > { %10050 = vmatmul.mubr.msk.f32.gmra.mrb[18].mxu0 %vm371_vm1, %v11675_v51  ;;  %3920 = vst.msk [vmem:[#allocation2 + $0xf0] sm:$0xff] %vm3888_vm2, %v11323_v46  ;;  %3921 = vst.msk [vmem:[#allocation2 + $0xf8] sm:$0xff] %vm3888_vm2, %v11323_v46  ;;  %v12407_v51 = vpop.f32.mrb[1].mxu1 }
 0x1b3   : > { %10052 = vmatprep.mubr.msk.f32.mxu0 %vm371_vm1, %v11678_v52  ;;  %3923 = vst.msk [vmem:[#allocation2 + $0x108] sm:$0xff] %vm3888_vm2, %v11323_v46  ;;  %3924 = vst.msk [vmem:[#allocation2 + $0x110] sm:$0xff] %vm3888_vm2, %v11323_v46  ;;  %v4009_v52 = vld [vmem:[%s13696_s3] sm:$0xff] }
 0x1b4   : > { %3926 = vst.msk [vmem:[#allocation2 + $0x120] sm:$0xff] %vm3888_vm2, %v11323_v46  ;;  %3927 = vst.msk [vmem:[#allocation2 + $0x128] sm:$0xff] %vm3888_vm2, %v11323_v46  ;;  %10220 = vmatprep.subr.mxu1 %v4009_v52 }
 0x1b5   : > { %3929 = vst.msk [vmem:[#allocation2 + $0x138] sm:$0xff] %vm3888_vm2, %v11323_v46  ;;  %3930 = vst.msk [vmem:[#allocation2 + $0x140] sm:$0xff] %vm3888_vm2, %v11323_v46 }
 0x1b6   : > { %10053 = vmatmul.mubr.msk.f32.gmra.mrb[20].mxu0 %vm371_vm1, %v11685_v53  ;;  %3932 = vst.msk [vmem:[#allocation2 + $0x150] sm:$0xff] %vm3888_vm2, %v11323_v46  ;;  %3933 = vst.msk [vmem:[#allocation2 + $0x158] sm:$0xff] %vm3888_vm2, %v11323_v46  ;;  %v12412_v53 = vpop.f32.mrb[2].mxu1 }
 0x1b7   : > { %10055 = vmatprep.mubr.msk.f32.mxu0 %vm371_vm1, %v11688_v54  ;;  %3935 = vst.msk [vmem:[#allocation2 + $0x168] sm:$0xff] %vm3888_vm2, %v11323_v46  ;;  %3936 = vst.msk [vmem:[#allocation2 + $0x170] sm:$0xff] %vm3888_vm2, %v11323_v46  ;;  %v12414_v54 = vpop.f32.mrb[3].mxu1 }
 0x1b8   : > { %3938 = vst.msk [vmem:[#allocation2 + $0x180] sm:$0xff] %vm3888_vm2, %v11323_v46  ;;  %3939 = vst.msk [vmem:[#allocation2 + $0x188] sm:$0xff] %vm3888_vm2, %v11323_v46 }
 0x1b9   : > { %3941 = vst.msk [vmem:[#allocation2 + $0x198] sm:$0xff] %vm3888_vm2, %v11323_v46  ;;  %3942 = vst.msk [vmem:[#allocation2 + $0x1a0] sm:$0xff] %vm3888_vm2, %v11323_v46 }
 0x1ba   : > { %10056 = vmatmul.mubr.msk.f32.gmra.mrb[22].mxu0 %vm371_vm1, %v11695_v55  ;;  %3895 = vst.msk [vmem:[#allocation2 + $0x28] sm:$0x3] %vm3891_vm3, %v11323_v46  ;;  %3892 = vst.msk [vmem:[#allocation2 + $0x10] sm:$0x3] %vm3891_vm3, %v11323_v46  ;;  %v12416_v55 = vpop.f32.mrb[4].mxu1 }
 0x1bb   : > { %10058 = vmatprep.mubr.msk.f32.mxu0 %vm371_vm1, %v11698_v56  ;;  %3898 = vst.msk [vmem:[#allocation2 + $0x40] sm:$0x3] %vm3891_vm3, %v11323_v46  ;;  %3901 = vst.msk [vmem:[#allocation2 + $0x58] sm:$0x3] %vm3891_vm3, %v11323_v46  ;;  %v12418_v56 = vpop.f32.mrb[5].mxu1 }
 0x1bc   : > { %3904 = vst.msk [vmem:[#allocation2 + $0x70] sm:$0x3] %vm3891_vm3, %v11323_v46  ;;  %3907 = vst.msk [vmem:[#allocation2 + $0x88] sm:$0x3] %vm3891_vm3, %v11323_v46 }
 0x1bd   : > { %3910 = vst.msk [vmem:[#allocation2 + $0xa0] sm:$0x3] %vm3891_vm3, %v11323_v46  ;;  %3913 = vst.msk [vmem:[#allocation2 + $0xb8] sm:$0x3] %vm3891_vm3, %v11323_v46 }
 0x1be   : > { %10059 = vmatmul.mubr.msk.f32.gmra.mrb[24].mxu0 %vm371_vm1, %v11705_v57  ;;  %3916 = vst.msk [vmem:[#allocation2 + $0xd0] sm:$0x3] %vm3891_vm3, %v11323_v46  ;;  %3919 = vst.msk [vmem:[#allocation2 + $0xe8] sm:$0x3] %vm3891_vm3, %v11323_v46  ;;  %v12420_v57 = vpop.f32.mrb[6].mxu1 }
 0x1bf   : > { %10061 = vmatprep.mubr.msk.f32.mxu0 %vm371_vm1, %v11708_v58  ;;  %3922 = vst.msk [vmem:[#allocation2 + $0x100] sm:$0x3] %vm3891_vm3, %v11323_v46  ;;  %3925 = vst.msk [vmem:[#allocation2 + $0x118] sm:$0x3] %vm3891_vm3, %v11323_v46  ;;  %v12422_v58 = vpop.f32.mrb[7].mxu1 }
 0x1c0   : > { %3928 = vst.msk [vmem:[#allocation2 + $0x130] sm:$0x3] %vm3891_vm3, %v11323_v46  ;;  %3931 = vst.msk [vmem:[#allocation2 + $0x148] sm:$0x3] %vm3891_vm3, %v11323_v46 }
 0x1c1   : > { %3934 = vst.msk [vmem:[#allocation2 + $0x160] sm:$0x3] %vm3891_vm3, %v11323_v46  ;;  %3937 = vst.msk [vmem:[#allocation2 + $0x178] sm:$0x3] %vm3891_vm3, %v11323_v46  ;;  %v4011_v49 = vld [vmem:[#allocation2 + $0x9] sm:$0xff] }
 0x1c2   : > { %10062 = vmatmul.mubr.msk.f32.gmra.mrb[26].mxu0 %vm371_vm1, %v11715_v59  ;;  %3940 = vst.msk [vmem:[#allocation2 + $0x190] sm:$0x3] %vm3891_vm3, %v11323_v46  ;;  %3943 = vst.msk [vmem:[#allocation2 + $0x1a8] sm:$0x3] %vm3891_vm3, %v11323_v46  ;;  %10173 = vmatmul.mubr.msk.f32.vlgmr.msra.gmra.mrb[8].mxu1 %vm3888_vm2, %v4011_v49  ;;  %v12427_v59 = vld [vmem:[%s13696_s3 + $0x10] sm:$0xff] }
 0x1c3   : > { %10064 = vmatprep.mubr.msk.f32.mxu0 %vm371_vm1, %v11987_v29  ;;  %10221 = vmatpush3.msra.mxu1 %v4009_v52 }
 0x1c4   : > { %10270 = vmatprep.subr.mxu1 %v12427_v59 }
 0x1c6   : > { %10065 = vmatmul.mubr.msk.f32.gmra.mrb[28].mxu0 %vm371_vm1, %v11994_v31 }
 0x1c7   : > { %10067 = vmatprep.mubr.msk.f32.mxu0 %vm371_vm1, %v8499_v32 }
 0x1ca   : > { %10068 = vmatmul.mubr.msk.f32.gmra.mrb[30].mxu0 %vm371_vm1, %v8500_v33 }
 0x1cb   : > { %10072 = vmatprep.mubr.msk.f32.mxu0 %vm371_vm1, %v11455_v7  ;;  %v13888_v7 = vld [vmem:[#allocation29_spill] sm:$0xff] }
 0x1ce   : > { %10073 = vmatmul.mubr.msk.f32.vlgmr.msra.gmra.mrb[0].mxu0 %vm371_vm1, %v11463_v8  ;;  %v13889_v8 = vld [vmem:[#allocation31_spill] sm:$0xff] }
 0x1cf   : > { %10075 = vmatprep.mubr.msk.f32.mxu0 %vm371_vm1, %v11466_v9  ;;  %10121 = vmatpush3.msk.msra.mxu0 %vm468_vm0, %v8633_v30  ;;  %v13890_v9 = vld [vmem:[#allocation33_spill] sm:$0xff] }
 0x1d2   : > { %10076 = vmatmul.mubr.msk.f32.gmra.mrb[2].mxu0 %vm371_vm1, %v11473_v10  ;;  %v13891_v10 = vld [vmem:[#allocation35_spill] sm:$0xff] }
 0x1d3   : > { %10078 = vmatprep.mubr.msk.f32.mxu0 %vm371_vm1, %v11476_v11  ;;  %v13892_v11 = vld [vmem:[#allocation37_spill] sm:$0xff] }
 0x1d6   : > { %10079 = vmatmul.mubr.msk.f32.gmra.mrb[4].mxu0 %vm371_vm1, %v11483_v12  ;;  %v13893_v12 = vld [vmem:[#allocation38_spill] sm:$0xff] }
 0x1d7   : > { %10081 = vmatprep.mubr.msk.f32.mxu0 %vm371_vm1, %v11486_v13  ;;  %v13894_v13 = vld [vmem:[#allocation40_spill] sm:$0xff] }
 0x1da   : > { %10082 = vmatmul.mubr.msk.f32.gmra.mrb[6].mxu0 %vm371_vm1, %v11493_v14  ;;  %v8565_v14 = vld [vmem:[%s11436_s25 + $0x199] sm:$0xff] }
 0x1db   : > { %10084 = vmatprep.mubr.msk.f32.mxu0 %vm371_vm1, %v11496_v15  ;;  %v13895_v15 = vld [vmem:[#allocation41_spill] sm:$0xff] }
 0x1de   : > { %10085 = vmatmul.mubr.msk.f32.gmra.mrb[8].mxu0 %vm371_vm1, %v11503_v16  ;;  %v8566_v16 = vld [vmem:[%s11436_s25 + $0x1a1] sm:$0xff] }
 0x1df   : > { %10087 = vmatprep.mubr.msk.f32.mxu0 %vm371_vm1, %v11506_v17  ;;  %v13896_v17 = vld [vmem:[#allocation8_spill] sm:$0xff] }
 0x1e2   : > { %10088 = vmatmul.mubr.msk.f32.gmra.mrb[10].mxu0 %vm371_vm1, %v11513_v18  ;;  %v13897_v18 = vld [vmem:[#allocation9_spill] sm:$0xff] }
 0x1e3   : > { %10090 = vmatprep.mubr.msk.f32.mxu0 %vm371_vm1, %v11516_v19  ;;  %v13898_v19 = vld [vmem:[#allocation10_spill] sm:$0xff] }
 0x1e6   : > { %10091 = vmatmul.mubr.msk.f32.gmra.mrb[12].mxu0 %vm371_vm1, %v11523_v20  ;;  %v13899_v20 = vld [vmem:[#allocation11_spill] sm:$0xff] }
 0x1e7   : > { %10093 = vmatprep.mubr.msk.f32.mxu0 %vm371_vm1, %v11526_v21  ;;  %v13900_v21 = vld [vmem:[#allocation12_spill] sm:$0xff] }
 0x1ea   : > { %10094 = vmatmul.mubr.msk.f32.gmra.mrb[14].mxu0 %vm371_vm1, %v11533_v22  ;;  %v13901_v22 = vld [vmem:[#allocation13_spill] sm:$0xff] }
 0x1eb   : > { %10096 = vmatprep.mubr.msk.f32.mxu0 %vm371_vm1, %v11536_v23  ;;  %v13902_v23 = vld [vmem:[#allocation14_spill] sm:$0xff] }
 0x1ee   : > { %10097 = vmatmul.mubr.msk.f32.gmra.mrb[16].mxu0 %vm371_vm1, %v11543_v24  ;;  %v13903_v24 = vld [vmem:[#allocation15_spill] sm:$0xff] }
 0x1ef   : > { %10099 = vmatprep.mubr.msk.f32.mxu0 %vm371_vm1, %v11546_v25  ;;  %v13904_v25 = vld [vmem:[#allocation16_spill] sm:$0xff] }
 0x1f2   : > { %10100 = vmatmul.mubr.msk.f32.gmra.mrb[18].mxu0 %vm371_vm1, %v11553_v26  ;;  %v13905_v26 = vld [vmem:[#allocation17_spill] sm:$0xff] }
 0x1f3   : > { %10102 = vmatprep.mubr.msk.f32.mxu0 %vm371_vm1, %v11836_v27 }
 0x1f6   : > { %10103 = vmatmul.mubr.msk.f32.gmra.mrb[20].mxu0 %vm371_vm1, %v11844_v5 }
 0x1f7   : > { %10105 = vmatprep.mubr.msk.f32.mxu0 %vm371_vm1, %v13888_v7 }
 0x1fa   : > { %10106 = vmatmul.mubr.msk.f32.gmra.mrb[22].mxu0 %vm371_vm1, %v13889_v8 }
 0x1fb   : > { %10108 = vmatprep.mubr.msk.f32.mxu0 %vm371_vm1, %v13890_v9 }
 0x1fe   : > { %10109 = vmatmul.mubr.msk.f32.gmra.mrb[24].mxu0 %vm371_vm1, %v13891_v10 }
 0x1ff   : > { %10111 = vmatprep.mubr.msk.f32.mxu0 %vm371_vm1, %v13892_v11 }
 0x202   : > { %10112 = vmatmul.mubr.msk.f32.gmra.mrb[26].mxu0 %vm371_vm1, %v13893_v12 }
 0x203   : > { %10114 = vmatprep.mubr.msk.f32.mxu0 %vm371_vm1, %v13894_v13 }
 0x206   : > { %10115 = vmatmul.mubr.msk.f32.gmra.mrb[28].mxu0 %vm371_vm1, %v13895_v15 }
 0x207   : > { %10117 = vmatprep.mubr.msk.f32.mxu0 %vm371_vm1, %v8565_v14 }
 0x20a   : > { %10118 = vmatmul.mubr.msk.f32.gmra.mrb[30].mxu0 %vm371_vm1, %v8566_v16 }
 0x20b   : > { %10122 = vmatprep.mubr.msk.f32.mxu0 %vm371_vm1, %v13896_v17 }
 0x20e   : > { %10123 = vmatmul.mubr.msk.f32.vlgmr.msra.gmra.mrb[0].mxu0 %vm371_vm1, %v13897_v18 }
 0x20f   : > { %10125 = vmatprep.mubr.msk.f32.mxu0 %vm371_vm1, %v13898_v19 }
 0x212   : > { %10126 = vmatmul.mubr.msk.f32.gmra.mrb[2].mxu0 %vm371_vm1, %v13899_v20 }
 0x213   : > { %10128 = vmatprep.mubr.msk.f32.mxu0 %vm371_vm1, %v13900_v21 }
 0x216   : > { %10129 = vmatmul.mubr.msk.f32.gmra.mrb[4].mxu0 %vm371_vm1, %v13901_v22 }
 0x217   : > { %10131 = vmatprep.mubr.msk.f32.mxu0 %vm371_vm1, %v13902_v23 }
 0x21a   : > { %10132 = vmatmul.mubr.msk.f32.gmra.mrb[6].mxu0 %vm371_vm1, %v13903_v24 }
 0x21b   : > { %10134 = vmatprep.mubr.msk.f32.mxu0 %vm371_vm1, %v13904_v25 }
 0x21e   : > { %10135 = vmatmul.mubr.msk.f32.gmra.mrb[8].mxu0 %vm371_vm1, %v13905_v26 }
 0x21f   : > { %10137 = vmatprep.mubr.msk.f32.mxu0 %vm371_vm1, %v13906_v34 }
 0x222   : > { %10138 = vmatmul.mubr.msk.f32.gmra.mrb[10].mxu0 %vm371_vm1, %v13907_v35 }
 0x223   : > { %10140 = vmatprep.mubr.msk.f32.mxu0 %vm371_vm1, %v13908_v36 }
 0x226   : > { %10141 = vmatmul.mubr.msk.f32.gmra.mrb[12].mxu0 %vm371_vm1, %v13909_v37 }
 0x227   : > { %10143 = vmatprep.mubr.msk.f32.mxu0 %vm371_vm1, %v13910_v38 }
 0x22a   : > { %10144 = vmatmul.mubr.msk.f32.gmra.mrb[14].mxu0 %vm371_vm1, %v13911_v39 }
 0x22b   : > { %10146 = vmatprep.mubr.msk.f32.mxu0 %vm371_vm1, %v13912_v40 }
 0x22e   : > { %10147 = vmatmul.mubr.msk.f32.gmra.mrb[16].mxu0 %vm371_vm1, %v13880_v0 }
 0x22f   : > { %10149 = vmatprep.mubr.msk.f32.mxu0 %vm371_vm1, %v13881_v4 }
 0x232   : > { %10150 = vmatmul.mubr.msk.f32.gmra.mrb[18].mxu0 %vm371_vm1, %v13913_v41 }
 0x233   : > { %10152 = vmatprep.mubr.msk.f32.mxu0 %vm371_vm1, %v13883_v3 }
 0x236   : > { %10153 = vmatmul.mubr.msk.f32.gmra.mrb[20].mxu0 %vm371_vm1, %v13884_v63 }
 0x237   : > { %10155 = vmatprep.mubr.msk.f32.mxu0 %vm371_vm1, %v13914_v42 }
 0x23a   : > { %10156 = vmatmul.mubr.msk.f32.gmra.mrb[22].mxu0 %vm371_vm1, %v13886_v28 }
 0x23b   : > { %10158 = vmatprep.mubr.msk.f32.mxu0 %vm371_vm1, %v13887_v6 }
 0x23e   : > { %10159 = vmatmul.mubr.msk.f32.gmra.mrb[24].mxu0 %vm371_vm1, %v11901_v2 }
 0x23f   : > { %10161 = vmatprep.mubr.msk.f32.mxu0 %vm371_vm1, %v13915_v43 }
 0x242   : > { %10162 = vmatmul.mubr.msk.f32.gmra.mrb[26].mxu0 %vm371_vm1, %v11918_v60 }
 0x243   : > { %10164 = vmatprep.mubr.msk.f32.mxu0 %vm371_vm1, %v12137_v62  ;;  %v12433_v62 = vld [vmem:[%s13695_s2] ss:$0 sm:$0xff] }
 0x246   : > { %10165 = vmatmul.mubr.msk.f32.gmra.mrb[28].mxu0 %vm371_vm1, %v12144_v1 }
 0x247   : > { %10167 = vmatprep.mubr.msk.f32.mxu0 %vm371_vm1, %v8631_v44 }
 0x24a   : > { %10168 = vmatmul.mubr.msk.f32.gmra.mrb[30].mxu0 %vm371_vm1, %v8632_v45 }
 0x2e1   : > { %v10124_v2 = vpop.f32.mrb[0].mxu0 }
 0x2e2   : > { %v3761_v3 = vadd.f32 %v10124_v2, %v12433_v62  ;;  %v3562_v5 = vpop.f32.mrb[1].mxu0 }
 0x2e3   : > { %v3760_v27 = vadd.f32 %v12433_v62, %v3562_v5 }
 0x2e4   : > { %vm3793_vm4 = vcmp.ge.f32.partialorder %v3761_v3, 0.0  ;;  %v3825_v28 = vmul.f32 0.2, %v3761_v3 }
 0x2e5   : > { %vm3792_vm5 = vcmp.ge.f32.partialorder %v3760_v27, 0.0  ;;  %v3824_v30 = vmul.f32 0.2, %v3760_v27  ;;  %v10127_v60 = vpop.f32.mrb[2].mxu0 }
 0x2e6   : > { %v3857_v61 = vsel %vm3793_vm4, %v3761_v3, %v3825_v28  ;;  %v3763_v29 = vadd.f32 %v10127_v60, %v12433_v62  ;;  %v3572_v31 = vpop.f32.mrb[3].mxu0 }
 0x2e7   : > { %3946 = vst.msk [vmem:[#allocation2 + $0x21] sm:$0xff] %vm3888_vm2, %v3857_v61  ;;  %v3856_v6 = vsel %vm3792_vm5, %v3760_v27, %v3824_v30  ;;  %v3762_v0 = vadd.f32 %v12433_v62, %v3572_v31 }
 0x2e8   : > { %3945 = vst.msk [vmem:[#allocation2 + $0x19] sm:$0xff] %vm3888_vm2, %v3856_v6  ;;  %vm3795_vm6 = vcmp.ge.f32.partialorder %v3763_v29, 0.0  ;;  %v3827_v4 = vmul.f32 0.2, %v3763_v29 }
 0x2e9   : > { %vm3794_vm7 = vcmp.ge.f32.partialorder %v3762_v0, 0.0  ;;  %v3826_v1 = vmul.f32 0.2, %v3762_v0  ;;  %v10130_v63 = vpop.f32.mrb[4].mxu0 }
 0x2ea   : > { %v3859_v32 = vsel %vm3795_vm6, %v3763_v29, %v3827_v4  ;;  %v3765_v33 = vadd.f32 %v10130_v63, %v12433_v62  ;;  %v3582_v7 = vpop.f32.mrb[5].mxu0 }
 0x2eb   : > { %3948 = vst.msk [vmem:[#allocation2 + $0x39] sm:$0xff] %vm3888_vm2, %v3859_v32  ;;  %v3858_v8 = vsel %vm3794_vm7, %v3762_v0, %v3826_v1  ;;  %v3764_v9 = vadd.f32 %v12433_v62, %v3582_v7 }
 0x2ec   : > { %3947 = vst.msk [vmem:[#allocation2 + $0x31] sm:$0xff] %vm3888_vm2, %v3858_v8  ;;  %vm3797_vm8 = vcmp.ge.f32.partialorder %v3765_v33, 0.0  ;;  %v3829_v10 = vmul.f32 0.2, %v3765_v33 }
 0x2ed   : > { %vm3796_vm9 = vcmp.ge.f32.partialorder %v3764_v9, 0.0  ;;  %v3828_v11 = vmul.f32 0.2, %v3764_v9  ;;  %v10133_v12 = vpop.f32.mrb[6].mxu0 }
 0x2ee   : > { %v3861_v13 = vsel %vm3797_vm8, %v3765_v33, %v3829_v10  ;;  %v3767_v14 = vadd.f32 %v10133_v12, %v12433_v62  ;;  %v3592_v15 = vpop.f32.mrb[7].mxu0  ;;  %v12453_v20 = vld [vmem:[#allocation2 + $0x21] sm:$0xff] }
 0x2ef   : > { %3950 = vst.msk [vmem:[#allocation2 + $0x51] sm:$0xff] %vm3888_vm2, %v3861_v13  ;;  %v3860_v16 = vsel %vm3796_vm9, %v3764_v9, %v3828_v11  ;;  %v3766_v17 = vadd.f32 %v12433_v62, %v3592_v15  ;;  %v12448_v18 = vld [vmem:[#allocation2 + $0x19] sm:$0xff] }
 0x2f0   : > { %3949 = vst.msk [vmem:[#allocation2 + $0x49] sm:$0xff] %vm3888_vm2, %v3860_v16  ;;  %vm3799_vm10 = vcmp.ge.f32.partialorder %v3767_v14, 0.0  ;;  %v3831_v19 = vmul.f32 0.2, %v3767_v14  ;;  %10175 = vmatprep.mubr.msk.f32.mxu1 %vm3888_vm2, %v12448_v18 }
 0x2f1   : > { %vm3798_vm11 = vcmp.ge.f32.partialorder %v3766_v17, 0.0  ;;  %v3830_v21 = vmul.f32 0.2, %v3766_v17  ;;  %v10136_v22 = vpop.f32.mrb[8].mxu0  ;;  %10176 = vmatmul.mubr.msk.f32.gmra.mrb[10].mxu1 %vm3888_vm2, %v12453_v20 }
 0x2f2   : > { %v3863_v23 = vsel %vm3799_vm10, %v3767_v14, %v3831_v19  ;;  %v3769_v24 = vadd.f32 %v10136_v22, %v12433_v62  ;;  %v3602_v25 = vpop.f32.mrb[9].mxu0  ;;  %v12465_v37 = vld [vmem:[#allocation2 + $0x39] sm:$0xff] }
 0x2f3   : > { %3952 = vst.msk [vmem:[#allocation2 + $0x69] sm:$0xff] %vm3888_vm2, %v3863_v23  ;;  %v3862_v26 = vsel %vm3798_vm11, %v3766_v17, %v3830_v21  ;;  %v3768_v34 = vadd.f32 %v12433_v62, %v3602_v25  ;;  %v12460_v35 = vld [vmem:[#allocation2 + $0x31] sm:$0xff] }
 0x2f4   : > { %3951 = vst.msk [vmem:[#allocation2 + $0x61] sm:$0xff] %vm3888_vm2, %v3862_v26  ;;  %vm3801_vm12 = vcmp.ge.f32.partialorder %v3769_v24, 0.0  ;;  %v3833_v36 = vmul.f32 0.2, %v3769_v24  ;;  %10178 = vmatprep.mubr.msk.f32.mxu1 %vm3888_vm2, %v12460_v35 }
 0x2f5   : > { %vm3800_vm13 = vcmp.ge.f32.partialorder %v3768_v34, 0.0  ;;  %v3832_v38 = vmul.f32 0.2, %v3768_v34  ;;  %v10139_v39 = vpop.f32.mrb[10].mxu0  ;;  %10179 = vmatmul.mubr.msk.f32.gmra.mrb[12].mxu1 %vm3888_vm2, %v12465_v37 }
 0x2f6   : > { %v3865_v40 = vsel %vm3801_vm12, %v3769_v24, %v3833_v36  ;;  %v3771_v41 = vadd.f32 %v10139_v39, %v12433_v62  ;;  %v3612_v42 = vpop.f32.mrb[11].mxu0  ;;  %v12477_v47 = vld [vmem:[#allocation2 + $0x51] sm:$0xff] }
 0x2f7   : > { %3954 = vst.msk [vmem:[#allocation2 + $0x81] sm:$0xff] %vm3888_vm2, %v3865_v40  ;;  %v3864_v43 = vsel %vm3800_vm13, %v3768_v34, %v3832_v38  ;;  %v3770_v44 = vadd.f32 %v12433_v62, %v3612_v42  ;;  %v12472_v45 = vld [vmem:[#allocation2 + $0x49] sm:$0xff] }
 0x2f8   : > { %3953 = vst.msk [vmem:[#allocation2 + $0x79] sm:$0xff] %vm3888_vm2, %v3864_v43  ;;  %vm3803_vm14 = vcmp.ge.f32.partialorder %v3771_v41, 0.0  ;;  %v3835_v46 = vmul.f32 0.2, %v3771_v41  ;;  %10181 = vmatprep.mubr.msk.f32.mxu1 %vm3888_vm2, %v12472_v45 }
 0x2f9   : > { %vm3802_vm15 = vcmp.ge.f32.partialorder %v3770_v44, 0.0  ;;  %v3834_v48 = vmul.f32 0.2, %v3770_v44  ;;  %v10142_v49 = vpop.f32.mrb[12].mxu0  ;;  %10182 = vmatmul.mubr.msk.f32.gmra.mrb[14].mxu1 %vm3888_vm2, %v12477_v47 }
 0x2fa   : > { %v3867_v52 = vsel %vm3803_vm14, %v3771_v41, %v3835_v46  ;;  %v3773_v2 = vadd.f32 %v10142_v49, %v12433_v62  ;;  %v3622_v3 = vpop.f32.mrb[13].mxu0  ;;  %v12489_v60 = vld [vmem:[#allocation2 + $0x69] sm:$0xff] }
 0x2fb   : > { %3956 = vst.msk [vmem:[#allocation2 + $0x99] sm:$0xff] %vm3888_vm2, %v3867_v52  ;;  %v3866_v5 = vsel %vm3802_vm15, %v3770_v44, %v3834_v48  ;;  %v3772_v27 = vadd.f32 %v12433_v62, %v3622_v3  ;;  %v12484_v28 = vld [vmem:[#allocation2 + $0x61] sm:$0xff] }
 0x2fc   : > { %3955 = vst.msk [vmem:[#allocation2 + $0x91] sm:$0xff] %vm3888_vm2, %v3866_v5  ;;  %vm3805_vm3 = vcmp.ge.f32.partialorder %v3773_v2, 0.0  ;;  %v3837_v30 = vmul.f32 0.2, %v3773_v2  ;;  %10184 = vmatprep.mubr.msk.f32.mxu1 %vm3888_vm2, %v12484_v28 }
 0x2fd   : > { %vm3804_vm4 = vcmp.ge.f32.partialorder %v3772_v27, 0.0  ;;  %v3836_v61 = vmul.f32 0.2, %v3772_v27  ;;  %v10145_v29 = vpop.f32.mrb[14].mxu0  ;;  %10185 = vmatmul.mubr.msk.f32.gmra.mrb[16].mxu1 %vm3888_vm2, %v12489_v60 }
 0x2fe   : > { %v3869_v31 = vsel %vm3805_vm3, %v3773_v2, %v3837_v30  ;;  %v3775_v6 = vadd.f32 %v10145_v29, %v12433_v62  ;;  %v3632_v0 = vpop.f32.mrb[15].mxu0  ;;  %v12501_v33 = vld [vmem:[#allocation2 + $0x81] sm:$0xff] }
 0x2ff   : > { %3958 = vst.msk [vmem:[#allocation2 + $0xb1] sm:$0xff] %vm3888_vm2, %v3869_v31  ;;  %v3868_v4 = vsel %vm3804_vm4, %v3772_v27, %v3836_v61  ;;  %v3774_v1 = vadd.f32 %v12433_v62, %v3632_v0  ;;  %v12496_v63 = vld [vmem:[#allocation2 + $0x79] sm:$0xff] }
 0x300   : > { %3957 = vst.msk [vmem:[#allocation2 + $0xa9] sm:$0xff] %vm3888_vm2, %v3868_v4  ;;  %vm3807_vm5 = vcmp.ge.f32.partialorder %v3775_v6, 0.0  ;;  %v3839_v32 = vmul.f32 0.2, %v3775_v6  ;;  %10187 = vmatprep.mubr.msk.f32.mxu1 %vm3888_vm2, %v12496_v63 }
 0x301   : > { %vm3806_vm6 = vcmp.ge.f32.partialorder %v3774_v1, 0.0  ;;  %v3838_v7 = vmul.f32 0.2, %v3774_v1  ;;  %v10148_v8 = vpop.f32.mrb[16].mxu0  ;;  %10188 = vmatmul.mubr.msk.f32.gmra.mrb[18].mxu1 %vm3888_vm2, %v12501_v33 }
 0x302   : > { %v3871_v9 = vsel %vm3807_vm5, %v3775_v6, %v3839_v32  ;;  %v3777_v10 = vadd.f32 %v10148_v8, %v12433_v62  ;;  %v3642_v11 = vpop.f32.mrb[17].mxu0  ;;  %v12513_v16 = vld [vmem:[#allocation2 + $0x99] sm:$0xff] }
 0x303   : > { %3960 = vst.msk [vmem:[#allocation2 + $0xc9] sm:$0xff] %vm3888_vm2, %v3871_v9  ;;  %v3870_v12 = vsel %vm3806_vm6, %v3774_v1, %v3838_v7  ;;  %v3776_v13 = vadd.f32 %v12433_v62, %v3642_v11  ;;  %v12508_v14 = vld [vmem:[#allocation2 + $0x91] sm:$0xff] }
 0x304   : > { %3959 = vst.msk [vmem:[#allocation2 + $0xc1] sm:$0xff] %vm3888_vm2, %v3870_v12  ;;  %vm3809_vm7 = vcmp.ge.f32.partialorder %v3777_v10, 0.0  ;;  %v3841_v15 = vmul.f32 0.2, %v3777_v10  ;;  %10190 = vmatprep.mubr.msk.f32.mxu1 %vm3888_vm2, %v12508_v14 }
 0x305   : > { %vm3808_vm8 = vcmp.ge.f32.partialorder %v3776_v13, 0.0  ;;  %v3840_v17 = vmul.f32 0.2, %v3776_v13  ;;  %v10151_v19 = vpop.f32.mrb[18].mxu0  ;;  %10191 = vmatmul.mubr.msk.f32.gmra.mrb[20].mxu1 %vm3888_vm2, %v12513_v16 }
 0x306   : > { %v3873_v21 = vsel %vm3809_vm7, %v3777_v10, %v3841_v15  ;;  %v3779_v22 = vadd.f32 %v10151_v19, %v12433_v62  ;;  %v3652_v23 = vpop.f32.mrb[19].mxu0  ;;  %v12525_v36 = vld [vmem:[#allocation2 + $0xb1] sm:$0xff] }
 0x307   : > { %3962 = vst.msk [vmem:[#allocation2 + $0xe1] sm:$0xff] %vm3888_vm2, %v3873_v21  ;;  %v3872_v24 = vsel %vm3808_vm8, %v3776_v13, %v3840_v17  ;;  %v3778_v25 = vadd.f32 %v12433_v62, %v3652_v23  ;;  %v12520_v26 = vld [vmem:[#allocation2 + $0xa9] sm:$0xff] }
 0x308   : > { %3961 = vst.msk [vmem:[#allocation2 + $0xd9] sm:$0xff] %vm3888_vm2, %v3872_v24  ;;  %vm3811_vm9 = vcmp.ge.f32.partialorder %v3779_v22, 0.0  ;;  %v3843_v34 = vmul.f32 0.2, %v3779_v22  ;;  %10193 = vmatprep.mubr.msk.f32.mxu1 %vm3888_vm2, %v12520_v26 }
 0x309   : > { %vm3810_vm10 = vcmp.ge.f32.partialorder %v3778_v25, 0.0  ;;  %v3842_v38 = vmul.f32 0.2, %v3778_v25  ;;  %v10154_v39 = vpop.f32.mrb[20].mxu0  ;;  %10194 = vmatmul.mubr.msk.f32.gmra.mrb[22].mxu1 %vm3888_vm2, %v12525_v36 }
 0x30a   : > { %v3875_v40 = vsel %vm3811_vm9, %v3779_v22, %v3843_v34  ;;  %v3781_v41 = vadd.f32 %v10154_v39, %v12433_v62  ;;  %v3662_v42 = vpop.f32.mrb[21].mxu0  ;;  %v12537_v49 = vld [vmem:[#allocation2 + $0xc9] sm:$0xff] }
 0x30b   : > { %3964 = vst.msk [vmem:[#allocation2 + $0xf9] sm:$0xff] %vm3888_vm2, %v3875_v40  ;;  %v3874_v43 = vsel %vm3810_vm10, %v3778_v25, %v3842_v38  ;;  %v3780_v44 = vadd.f32 %v12433_v62, %v3662_v42  ;;  %v12532_v46 = vld [vmem:[#allocation2 + $0xc1] sm:$0xff] }
 0x30c   : > { %3963 = vst.msk [vmem:[#allocation2 + $0xf1] sm:$0xff] %vm3888_vm2, %v3874_v43  ;;  %vm3813_vm11 = vcmp.ge.f32.partialorder %v3781_v41, 0.0  ;;  %v3845_v48 = vmul.f32 0.2, %v3781_v41  ;;  %10196 = vmatprep.mubr.msk.f32.mxu1 %vm3888_vm2, %v12532_v46 }
 0x30d   : > { %vm3812_vm12 = vcmp.ge.f32.partialorder %v3780_v44, 0.0  ;;  %v3844_v52 = vmul.f32 0.2, %v3780_v44  ;;  %v10157_v2 = vpop.f32.mrb[22].mxu0  ;;  %10197 = vmatmul.mubr.msk.f32.gmra.mrb[24].mxu1 %vm3888_vm2, %v12537_v49 }
 0x30e   : > { %v3877_v3 = vsel %vm3813_vm11, %v3781_v41, %v3845_v48  ;;  %v3783_v5 = vadd.f32 %v10157_v2, %v12433_v62  ;;  %v3672_v27 = vpop.f32.mrb[23].mxu0  ;;  %v12549_v6 = vld [vmem:[#allocation2 + $0xe1] sm:$0xff] }
 0x30f   : > { %3966 = vst.msk [vmem:[#allocation2 + $0x111] sm:$0xff] %vm3888_vm2, %v3877_v3  ;;  %v3876_v30 = vsel %vm3812_vm12, %v3780_v44, %v3844_v52  ;;  %v3782_v61 = vadd.f32 %v12433_v62, %v3672_v27  ;;  %v12544_v29 = vld [vmem:[#allocation2 + $0xd9] sm:$0xff] }
 0x310   : > { %3965 = vst.msk [vmem:[#allocation2 + $0x109] sm:$0xff] %vm3888_vm2, %v3876_v30  ;;  %vm3815_vm13 = vcmp.ge.f32.partialorder %v3783_v5, 0.0  ;;  %v3847_v31 = vmul.f32 0.2, %v3783_v5  ;;  %10199 = vmatprep.mubr.msk.f32.mxu1 %vm3888_vm2, %v12544_v29 }
 0x311   : > { %vm3814_vm14 = vcmp.ge.f32.partialorder %v3782_v61, 0.0  ;;  %v3846_v0 = vmul.f32 0.2, %v3782_v61  ;;  %v10160_v4 = vpop.f32.mrb[24].mxu0  ;;  %10200 = vmatmul.mubr.msk.f32.gmra.mrb[26].mxu1 %vm3888_vm2, %v12549_v6 }
 0x312   : > { %v3879_v1 = vsel %vm3815_vm13, %v3783_v5, %v3847_v31  ;;  %v10704_v32 = vadd.f32 %v10160_v4, %v12405_v50  ;;  %v3682_v7 = vpop.f32.mrb[25].mxu0  ;;  %v12562_v12 = vld [vmem:[#allocation2 + $0xf9] sm:$0xff] }
 0x313   : > { %3968 = vst.msk [vmem:[#allocation2 + $0x129] sm:$0xff] %vm3888_vm2, %v3879_v1  ;;  %v3878_v8 = vsel %vm3814_vm14, %v3782_v61, %v3846_v0  ;;  %v10705_v9 = vadd.f32 %v3682_v7, %v12407_v51  ;;  %v12556_v10 = vld [vmem:[#allocation2 + $0xf1] sm:$0xff] }
 0x314   : > { %3967 = vst.msk [vmem:[#allocation2 + $0x121] sm:$0xff] %vm3888_vm2, %v3878_v8  ;;  %v3785_v11 = vadd.f32 %v10704_v32, %v12433_v62  ;;  %10202 = vmatprep.mubr.msk.f32.mxu1 %vm3888_vm2, %v12556_v10 }
 0x315   : > { %v3784_v13 = vadd.f32 %v10705_v9, %v12433_v62  ;;  %v10163_v50 = vpop.f32.mrb[26].mxu0  ;;  %10203 = vmatmul.mubr.msk.f32.gmra.mrb[28].mxu1 %vm3888_vm2, %v12562_v12 }
 0x316   : > { %vm3817_vm15 = vcmp.ge.f32.partialorder %v3785_v11, 0.0  ;;  %v3849_v15 = vmul.f32 0.2, %v3785_v11  ;;  %v10706_v51 = vadd.f32 %v10163_v50, %v12412_v53  ;;  %v3692_v17 = vpop.f32.mrb[27].mxu0  ;;  %v12574_v25 = vld [vmem:[#allocation2 + $0x111] sm:$0xff]  ;;  %v3977_v50 = vld [vmem:[#allocation2] sm:$0xff] }
 0x317   : > { %vm3816_vm3 = vcmp.ge.f32.partialorder %v3784_v13, 0.0  ;;  %v3848_v19 = vmul.f32 0.2, %v3784_v13  ;;  %v10707_v21 = vadd.f32 %v3692_v17, %v12414_v54  ;;  %v12569_v22 = vld [vmem:[#allocation2 + $0x109] sm:$0xff]  ;;  %v12631_v17 = vld [vmem:[%s13696_s3 + $0x18] sm:$0xff] }
 0x318   : > { %v3881_v23 = vsel %vm3817_vm15, %v3785_v11, %v3849_v15  ;;  %v3787_v24 = vadd.f32 %v10706_v51, %v12433_v62  ;;  %10205 = vmatprep.mubr.msk.f32.mxu1 %vm3888_vm2, %v12569_v22  ;;  %v3978_v51 = vld [vmem:[#allocation2 + $0x8] sm:$0xff] }
 0x319   : > { %3970 = vst.msk [vmem:[#allocation2 + $0x141] sm:$0xff] %vm3888_vm2, %v3881_v23  ;;  %v3880_v34 = vsel %vm3816_vm3, %v3784_v13, %v3848_v19  ;;  %v3786_v53 = vadd.f32 %v10707_v21, %v12433_v62  ;;  %v10166_v38 = vpop.f32.mrb[28].mxu0  ;;  %10206 = vmatmul.mubr.msk.f32.gmra.mrb[30].mxu1 %vm3888_vm2, %v12574_v25  ;;  %v12634_v19 = vld [vmem:[#allocation2 + $0x18] sm:$0xff]  ;;  %v12640_v21 = vld [vmem:[#allocation2 + $0x20] sm:$0xff]  ;;  %v12644_v23 = vld [vmem:[#allocation2 + $0x30] sm:$0xff] }
 0x31a   : > { %3969 = vst.msk [vmem:[#allocation2 + $0x139] sm:$0xff] %vm3888_vm2, %v3880_v34  ;;  %vm3819_vm4 = vcmp.ge.f32.partialorder %v3787_v24, 0.0  ;;  %v3851_v54 = vmul.f32 0.2, %v3787_v24  ;;  %v10708_v39 = vadd.f32 %v10166_v38, %v12416_v55  ;;  %v3702_v40 = vpop.f32.mrb[29].mxu0  ;;  %v12588_v52 = vld [vmem:[#allocation2 + $0x129] sm:$0xff] }
 0x31b   : > { %vm3818_vm5 = vcmp.ge.f32.partialorder %v3786_v53, 0.0  ;;  %v3850_v41 = vmul.f32 0.2, %v3786_v53  ;;  %v10709_v42 = vadd.f32 %v3702_v40, %v12418_v56  ;;  %v12583_v43 = vld [vmem:[#allocation2 + $0x121] sm:$0xff]  ;;  %v12676_v40 = vld [vmem:[#allocation2 + $0x90] sm:$0xff] }
 0x31c   : > { %v3883_v44 = vsel %vm3819_vm4, %v3787_v24, %v3851_v54  ;;  %v3789_v48 = vadd.f32 %v10708_v39, %v12433_v62  ;;  %10208 = vmatprep.mubr.msk.f32.mxu1 %vm3888_vm2, %v12583_v43  ;;  %v12648_v24 = vld [vmem:[#allocation2 + $0x38] sm:$0xff]  ;;  %v12652_v34 = vld [vmem:[#allocation2 + $0x48] sm:$0xff]  ;;  %v12672_v39 = vld [vmem:[#allocation2 + $0x80] sm:$0xff] }
 0x31d   : > { %3972 = vst.msk [vmem:[#allocation2 + $0x159] sm:$0xff] %vm3888_vm2, %v3883_v44  ;;  %v3882_v2 = vsel %vm3818_vm5, %v3786_v53, %v3850_v41  ;;  %v3788_v55 = vadd.f32 %v10709_v42, %v12433_v62  ;;  %v10169_v3 = vpop.f32.mrb[30].mxu0  ;;  %10209 = vmatmul.mubr.msk.f32.gmra.mrb[32].mxu1 %vm3888_vm2, %v12588_v52  ;;  %v12660_v53 = vld [vmem:[#allocation2 + $0x60] sm:$0xff]  ;;  %v12664_v38 = vld [vmem:[#allocation2 + $0x68] sm:$0xff]  ;;  %v12668_v54 = vld [vmem:[#allocation2 + $0x78] sm:$0xff] }
 0x31e   : > { %3971 = vst.msk [vmem:[#allocation2 + $0x151] sm:$0xff] %vm3888_vm2, %v3882_v2  ;;  %vm3821_vm6 = vcmp.ge.f32.partialorder %v3789_v48, 0.0  ;;  %v3853_v56 = vmul.f32 0.2, %v3789_v48  ;;  %v10710_v5 = vadd.f32 %v10169_v3, %v12420_v57  ;;  %v3712_v27 = vpop.f32.mrb[31].mxu0  ;;  %v12680_v41 = vld [vmem:[#allocation2 + $0x98] sm:$0xff] }
 0x31f   : > { %vm3820_vm7 = vcmp.ge.f32.partialorder %v3788_v55, 0.0  ;;  %v3852_v30 = vmul.f32 0.2, %v3788_v55  ;;  %v10711_v61 = vadd.f32 %v3712_v27, %v12422_v58  ;;  %v12684_v42 = vld [vmem:[#allocation2 + $0xa8] sm:$0xff]  ;;  %v12688_v44 = vld [vmem:[#allocation2 + $0xb0] sm:$0xff]  ;;  %v12704_v3 = vld [vmem:[#allocation2 + $0xe0] sm:$0xff] }
 0x320   : > { %v3885_v31 = vsel %vm3821_vm6, %v3789_v48, %v3853_v56  ;;  %v3791_v0 = vadd.f32 %v10710_v5, %v12433_v62  ;;  %v12605_v57 = vld [vmem:[#allocation2 + $0x141] sm:$0xff]  ;;  %v12708_v56 = vld [vmem:[#allocation2 + $0xf0] sm:$0xff]  ;;  %v12712_v5 = vld [vmem:[#allocation2 + $0xf8] sm:$0xff] }
 0x321   : > { %3974 = vst.msk [vmem:[#allocation2 + $0x171] sm:$0xff] %vm3888_vm2, %v3885_v31  ;;  %v3884_v4 = vsel %vm3820_vm7, %v3788_v55, %v3852_v30  ;;  %v3790_v1 = vadd.f32 %v10711_v61, %v12433_v62  ;;  %v12600_v32 = vld [vmem:[#allocation2 + $0x139] sm:$0xff]  ;;  %v12696_v2 = vld [vmem:[#allocation2 + $0xc8] sm:$0xff]  ;;  %v12720_v30 = vld [vmem:[#allocation2 + $0x110] sm:$0xff] }
 0x322   : > { %3973 = vst.msk [vmem:[#allocation2 + $0x169] sm:$0xff] %vm3888_vm2, %v3884_v4  ;;  %vm3823_vm8 = vcmp.ge.f32.partialorder %v3791_v0, 0.0  ;;  %v3855_v7 = vmul.f32 0.2, %v3791_v0  ;;  %10211 = vmatprep.mubr.msk.f32.mxu1 %vm3888_vm2, %v12600_v32  ;;  %v12692_v48 = vld [vmem:[#allocation2 + $0xc0] sm:$0xff]  ;;  %v12700_v55 = vld [vmem:[#allocation2 + $0xd8] sm:$0xff] }
 0x323   : > { %vm3822_vm9 = vcmp.ge.f32.partialorder %v3790_v1, 0.0  ;;  %v3854_v58 = vmul.f32 0.2, %v3790_v1  ;;  %10212 = vmatmul.mubr.msk.f32.gmra.mrb[34].mxu1 %vm3888_vm2, %v12605_v57  ;;  %v12716_v27 = vld [vmem:[#allocation2 + $0x108] sm:$0xff]  ;;  %v12724_v61 = vld [vmem:[#allocation2 + $0x120] sm:$0xff] }
 0x324   : > { %v3887_v8 = vsel %vm3823_vm8, %v3791_v0, %v3855_v7  ;;  %v12615_v11 = vld [vmem:[#allocation2 + $0x159] sm:$0xff]  ;;  %v12728_v31 = vld [vmem:[#allocation2 + $0x128] sm:$0xff] }
 0x325   : > { %3976 = vst.msk [vmem:[#allocation2 + $0x189] sm:$0xff] %vm3888_vm2, %v3887_v8  ;;  %v3886_v62 = vsel %vm3822_vm9, %v3790_v1, %v3854_v58  ;;  %v12610_v9 = vld [vmem:[#allocation2 + $0x151] sm:$0xff]  ;;  %v12736_v4 = vld [vmem:[#allocation2 + $0x140] sm:$0xff] }
 0x326   : > { %3975 = vst.msk [vmem:[#allocation2 + $0x181] sm:$0xff] %vm3888_vm2, %v3886_v62  ;;  %10214 = vmatprep.mubr.msk.f32.mxu1 %vm3888_vm2, %v12610_v9  ;;  %v12732_v0 = vld [vmem:[#allocation2 + $0x138] sm:$0xff]  ;;  %v12740_v1 = vld [vmem:[#allocation2 + $0x150] sm:$0xff]  ;;  %v4686_v8 = vld [vmem:[#allocation2 + $0x2] sm:$0xff] }
 0x327   : > { %10215 = vmatmul.mubr.msk.f32.gmra.mrb[36].mxu1 %vm3888_vm2, %v12615_v11  ;;  %v12744_v7 = vld [vmem:[#allocation2 + $0x158] sm:$0xff] }
 0x328   : > { %v12623_v15 = vld [vmem:[#allocation2 + $0x171] sm:$0xff] }
 0x329   : > { %v12619_v13 = vld [vmem:[#allocation2 + $0x169] sm:$0xff]  ;;  %13917 = vst [vmem:[#allocation7_spill] sm:$0xff] %v12623_v15 }
 0x32a   : > { %13916 = vst [vmem:[#allocation6_spill] sm:$0xff] %v12619_v13  ;;  %10217 = vmatprep.mubr.msk.f32.mxu1 %vm3888_vm2, %v12619_v13  ;;  %v12748_v58 = vld [vmem:[#allocation2 + $0x168] sm:$0xff]  ;;  %v12752_v62 = vld [vmem:[#allocation2 + $0x170] sm:$0xff] }
 0x32b   : > { %10218 = vmatmul.mubr.msk.f32.gmra.mrb[38].mxu1 %vm3888_vm2, %v12623_v15  ;;  %v12763_v15 = vld [vmem:[#allocation2 + $0x1a] sm:$0xff]  ;;  %v12769_v13 = vld [vmem:[#allocation2 + $0x22] sm:$0xff] }
 0x32c   : > { %10222 = vmatprep.mubr.msk.f32.mxu1 %vm3888_vm2, %v3977_v50  ;;  %v4687_v50 = vld [vmem:[#allocation2 + $0xa] sm:$0xff]  ;;  %13918 = vst [vmem:[#allocation25_spill] sm:$0xff] %v12763_v15  ;;  %13919 = vst [vmem:[#allocation26_spill] sm:$0xff] %v12769_v13 }
 0x32f   : > { %10223 = vmatmul.mubr.msk.f32.vlgmr.msra.gmra.mrb[8].mxu1 %vm3888_vm2, %v3978_v51  ;;  %v12760_v51 = vld [vmem:[%s13696_s3 + $0x20] sm:$0xff] }
 0x330   : > { %10225 = vmatprep.mubr.msk.f32.mxu1 %vm3888_vm2, %v12634_v19  ;;  %10271 = vmatpush3.msra.mxu1 %v12427_v59  ;;  %v12656_v59 = vld [vmem:[#allocation2 + $0x50] sm:$0xff] }
 0x331   : > { %10320 = vmatprep.subr.mxu1 %v12631_v17 }
 0x333   : > { %10226 = vmatmul.mubr.msk.f32.gmra.mrb[10].mxu1 %vm3888_vm2, %v12640_v21 }
 0x334   : > { %10228 = vmatprep.mubr.msk.f32.mxu1 %vm3888_vm2, %v12644_v23 }
 0x337   : > { %10229 = vmatmul.mubr.msk.f32.gmra.mrb[12].mxu1 %vm3888_vm2, %v12648_v24 }
 0x338   : > { %10231 = vmatprep.mubr.msk.f32.mxu1 %vm3888_vm2, %v12652_v34 }
 0x33b   : > { %10232 = vmatmul.mubr.msk.f32.gmra.mrb[14].mxu1 %vm3888_vm2, %v12656_v59 }
 0x33c   : > { %10234 = vmatprep.mubr.msk.f32.mxu1 %vm3888_vm2, %v12660_v53 }
 0x33f   : > { %10235 = vmatmul.mubr.msk.f32.gmra.mrb[16].mxu1 %vm3888_vm2, %v12664_v38 }
 0x340   : > { %10237 = vmatprep.mubr.msk.f32.mxu1 %vm3888_vm2, %v12668_v54 }
 0x343   : > { %10238 = vmatmul.mubr.msk.f32.gmra.mrb[18].mxu1 %vm3888_vm2, %v12672_v39 }
 0x344   : > { %10240 = vmatprep.mubr.msk.f32.mxu1 %vm3888_vm2, %v12676_v40 }
 0x347   : > { %10241 = vmatmul.mubr.msk.f32.gmra.mrb[20].mxu1 %vm3888_vm2, %v12680_v41 }
 0x348   : > { %10243 = vmatprep.mubr.msk.f32.mxu1 %vm3888_vm2, %v12684_v42 }
 0x34b   : > { %10244 = vmatmul.mubr.msk.f32.gmra.mrb[22].mxu1 %vm3888_vm2, %v12688_v44 }
 0x34c   : > { %10246 = vmatprep.mubr.msk.f32.mxu1 %vm3888_vm2, %v12692_v48 }
 0x34f   : > { %10247 = vmatmul.mubr.msk.f32.gmra.mrb[24].mxu1 %vm3888_vm2, %v12696_v2 }
 0x350   : > { %10249 = vmatprep.mubr.msk.f32.mxu1 %vm3888_vm2, %v12700_v55 }
 0x353   : > { %10250 = vmatmul.mubr.msk.f32.gmra.mrb[26].mxu1 %vm3888_vm2, %v12704_v3 }
 0x354   : > { %10252 = vmatprep.mubr.msk.f32.mxu1 %vm3888_vm2, %v12708_v56 }
 0x357   : > { %10253 = vmatmul.mubr.msk.f32.gmra.mrb[28].mxu1 %vm3888_vm2, %v12712_v5 }
 0x358   : > { %10255 = vmatprep.mubr.msk.f32.mxu1 %vm3888_vm2, %v12716_v27 }
 0x35b   : > { %10256 = vmatmul.mubr.msk.f32.gmra.mrb[30].mxu1 %vm3888_vm2, %v12720_v30 }
 0x35c   : > { %10258 = vmatprep.mubr.msk.f32.mxu1 %vm3888_vm2, %v12724_v61 }
 0x35f   : > { %10259 = vmatmul.mubr.msk.f32.gmra.mrb[32].mxu1 %vm3888_vm2, %v12728_v31 }
 0x360   : > { %10261 = vmatprep.mubr.msk.f32.mxu1 %vm3888_vm2, %v12732_v0 }
 0x363   : > { %10262 = vmatmul.mubr.msk.f32.gmra.mrb[34].mxu1 %vm3888_vm2, %v12736_v4 }
 0x364   : > { %10264 = vmatprep.mubr.msk.f32.mxu1 %vm3888_vm2, %v12740_v1 }
 0x367   : > { %10265 = vmatmul.mubr.msk.f32.gmra.mrb[36].mxu1 %vm3888_vm2, %v12744_v7 }
 0x368   : > { %10267 = vmatprep.mubr.msk.f32.mxu1 %vm3888_vm2, %v12748_v58 }
 0x36b   : > { %10268 = vmatmul.mubr.msk.f32.gmra.mrb[38].mxu1 %vm3888_vm2, %v12752_v62 }
 0x36c   : > { %10272 = vmatprep.mubr.msk.f32.mxu1 %vm3888_vm2, %v4686_v8  ;;  %v12773_v8 = vld [vmem:[#allocation2 + $0x32] sm:$0xff] }
 0x36d   : > { %13920 = vst [vmem:[#allocation28_spill] sm:$0xff] %v12773_v8 }
 0x36f   : > { %10273 = vmatmul.mubr.msk.f32.vlgmr.msra.gmra.mrb[8].mxu1 %vm3888_vm2, %v4687_v50  ;;  %v12777_v50 = vld [vmem:[#allocation2 + $0x3a] sm:$0xff] }
 0x370   : > { %10275 = vmatprep.mubr.msk.f32.mxu1 %vm3888_vm2, %v12763_v15  ;;  %10321 = vmatpush3.msra.mxu1 %v12631_v17  ;;  %13921 = vst [vmem:[#allocation30_spill] sm:$0xff] %v12777_v50  ;;  %v12781_v15 = vld [vmem:[#allocation2 + $0x4a] sm:$0xff]  ;;  %v12785_v17 = vld [vmem:[#allocation2 + $0x52] sm:$0xff] }
 0x371   : > { %10370 = vmatprep.subr.mxu1 %v12760_v51  ;;  %13922 = vst [vmem:[#allocation34_spill] sm:$0xff] %v12781_v15  ;;  %13923 = vst [vmem:[#allocation36_spill] sm:$0xff] %v12785_v17 }
 0x373   : > { %10276 = vmatmul.mubr.msk.f32.gmra.mrb[10].mxu1 %vm3888_vm2, %v12769_v13  ;;  %v12789_v13 = vld [vmem:[#allocation2 + $0x62] sm:$0xff] }
 0x374   : > { %10278 = vmatprep.mubr.msk.f32.mxu1 %vm3888_vm2, %v12773_v8  ;;  %13924 = vst [vmem:[#allocation29_spill] sm:$0xff] %v12789_v13  ;;  %v12793_v8 = vld [vmem:[#allocation2 + $0x6a] sm:$0xff] }
 0x375   : > { %13925 = vst [vmem:[#allocation31_spill] sm:$0xff] %v12793_v8 }
 0x377   : > { %10279 = vmatmul.mubr.msk.f32.gmra.mrb[12].mxu1 %vm3888_vm2, %v12777_v50  ;;  %v12797_v50 = vld [vmem:[#allocation2 + $0x7a] sm:$0xff] }
 0x378   : > { %10281 = vmatprep.mubr.msk.f32.mxu1 %vm3888_vm2, %v12781_v15  ;;  %13926 = vst [vmem:[#allocation33_spill] sm:$0xff] %v12797_v50  ;;  %v12801_v15 = vld [vmem:[#allocation2 + $0x82] sm:$0xff] }
 0x379   : > { %13927 = vst [vmem:[#allocation35_spill] sm:$0xff] %v12801_v15 }
 0x37b   : > { %10282 = vmatmul.mubr.msk.f32.gmra.mrb[14].mxu1 %vm3888_vm2, %v12785_v17  ;;  %v12805_v17 = vld [vmem:[#allocation2 + $0x92] sm:$0xff] }
 0x37c   : > { %10284 = vmatprep.mubr.msk.f32.mxu1 %vm3888_vm2, %v12789_v13  ;;  %13928 = vst [vmem:[#allocation37_spill] sm:$0xff] %v12805_v17  ;;  %v12809_v13 = vld [vmem:[#allocation2 + $0x9a] sm:$0xff] }
 0x37d   : > { %13929 = vst [vmem:[#allocation38_spill] sm:$0xff] %v12809_v13 }
 0x37f   : > { %10285 = vmatmul.mubr.msk.f32.gmra.mrb[16].mxu1 %vm3888_vm2, %v12793_v8  ;;  %v12813_v8 = vld [vmem:[#allocation2 + $0xaa] sm:$0xff] }
 0x380   : > { %10287 = vmatprep.mubr.msk.f32.mxu1 %vm3888_vm2, %v12797_v50  ;;  %13930 = vst [vmem:[#allocation40_spill] sm:$0xff] %v12813_v8  ;;  %v12817_v50 = vld [vmem:[#allocation2 + $0xb2] sm:$0xff] }
 0x381   : > { %13931 = vst [vmem:[#allocation41_spill] sm:$0xff] %v12817_v50 }
 0x383   : > { %10288 = vmatmul.mubr.msk.f32.gmra.mrb[18].mxu1 %vm3888_vm2, %v12801_v15  ;;  %v12821_v15 = vld [vmem:[#allocation2 + $0xc2] sm:$0xff] }
 0x384   : > { %10290 = vmatprep.mubr.msk.f32.mxu1 %vm3888_vm2, %v12805_v17  ;;  %13932 = vst [vmem:[#allocation8_spill] sm:$0xff] %v12821_v15  ;;  %v12825_v17 = vld [vmem:[#allocation2 + $0xca] sm:$0xff] }
 0x385   : > { %13933 = vst [vmem:[#allocation9_spill] sm:$0xff] %v12825_v17 }
 0x387   : > { %10291 = vmatmul.mubr.msk.f32.gmra.mrb[20].mxu1 %vm3888_vm2, %v12809_v13  ;;  %v12829_v13 = vld [vmem:[#allocation2 + $0xda] sm:$0xff] }
 0x388   : > { %10293 = vmatprep.mubr.msk.f32.mxu1 %vm3888_vm2, %v12813_v8  ;;  %13934 = vst [vmem:[#allocation10_spill] sm:$0xff] %v12829_v13  ;;  %v12833_v8 = vld [vmem:[#allocation2 + $0xe2] sm:$0xff] }
 0x389   : > { %13935 = vst [vmem:[#allocation11_spill] sm:$0xff] %v12833_v8 }
 0x38b   : > { %10294 = vmatmul.mubr.msk.f32.gmra.mrb[22].mxu1 %vm3888_vm2, %v12817_v50  ;;  %v12837_v50 = vld [vmem:[#allocation2 + $0xf2] sm:$0xff] }
 0x38c   : > { %10296 = vmatprep.mubr.msk.f32.mxu1 %vm3888_vm2, %v12821_v15  ;;  %13936 = vst [vmem:[#allocation12_spill] sm:$0xff] %v12837_v50  ;;  %v12841_v15 = vld [vmem:[#allocation2 + $0xfa] sm:$0xff] }
 0x38d   : > { %13937 = vst [vmem:[#allocation13_spill] sm:$0xff] %v12841_v15 }
 0x38f   : > { %10297 = vmatmul.mubr.msk.f32.gmra.mrb[24].mxu1 %vm3888_vm2, %v12825_v17  ;;  %v12845_v17 = vld [vmem:[#allocation2 + $0x10a] sm:$0xff] }
 0x390   : > { %10299 = vmatprep.mubr.msk.f32.mxu1 %vm3888_vm2, %v12829_v13  ;;  %13938 = vst [vmem:[#allocation14_spill] sm:$0xff] %v12845_v17  ;;  %v12849_v13 = vld [vmem:[#allocation2 + $0x112] sm:$0xff] }
 0x391   : > { %13939 = vst [vmem:[#allocation15_spill] sm:$0xff] %v12849_v13 }
 0x393   : > { %10300 = vmatmul.mubr.msk.f32.gmra.mrb[26].mxu1 %vm3888_vm2, %v12833_v8  ;;  %v12853_v8 = vld [vmem:[#allocation2 + $0x122] sm:$0xff] }
 0x394   : > { %10302 = vmatprep.mubr.msk.f32.mxu1 %vm3888_vm2, %v12837_v50  ;;  %13940 = vst [vmem:[#allocation16_spill] sm:$0xff] %v12853_v8  ;;  %v12857_v50 = vld [vmem:[#allocation2 + $0x12a] sm:$0xff] }
 0x395   : > { %13941 = vst [vmem:[#allocation17_spill] sm:$0xff] %v12857_v50 }
 0x397   : > { %10303 = vmatmul.mubr.msk.f32.gmra.mrb[28].mxu1 %vm3888_vm2, %v12841_v15  ;;  %v12861_v15 = vld [vmem:[#allocation2 + $0x13a] sm:$0xff] }
 0x398   : > { %10305 = vmatprep.mubr.msk.f32.mxu1 %vm3888_vm2, %v12845_v17  ;;  %13942 = vst [vmem:[#allocation18_spill] sm:$0xff] %v12861_v15  ;;  %v12865_v17 = vld [vmem:[#allocation2 + $0x142] sm:$0xff] }
 0x399   : > { %13943 = vst [vmem:[#allocation19_spill] sm:$0xff] %v12865_v17 }
 0x39b   : > { %10306 = vmatmul.mubr.msk.f32.gmra.mrb[30].mxu1 %vm3888_vm2, %v12849_v13  ;;  %v12869_v13 = vld [vmem:[#allocation2 + $0x152] sm:$0xff] }
 0x39c   : > { %10308 = vmatprep.mubr.msk.f32.mxu1 %vm3888_vm2, %v12853_v8  ;;  %13944 = vst [vmem:[#allocation20_spill] sm:$0xff] %v12869_v13  ;;  %v12873_v8 = vld [vmem:[#allocation2 + $0x15a] sm:$0xff] }
 0x39f   : > { %10309 = vmatmul.mubr.msk.f32.gmra.mrb[32].mxu1 %vm3888_vm2, %v12857_v50  ;;  %v12877_v50 = vld [vmem:[#allocation2 + $0x16a] sm:$0xff] }
 0x3a0   : > { %10311 = vmatprep.mubr.msk.f32.mxu1 %vm3888_vm2, %v12861_v15  ;;  %13945 = vst [vmem:[#allocation21_spill] sm:$0xff] %v12877_v50  ;;  %v12881_v15 = vld [vmem:[#allocation2 + $0x172] sm:$0xff] }
 0x3a1   : > { %13946 = vst [vmem:[#allocation22_spill] sm:$0xff] %v12881_v15 }
 0x3a3   : > { %10312 = vmatmul.mubr.msk.f32.gmra.mrb[34].mxu1 %vm3888_vm2, %v12865_v17 }
 0x3a4   : > { %10314 = vmatprep.mubr.msk.f32.mxu1 %vm3888_vm2, %v12869_v13  ;;  %v8832_v13 = vld [vmem:[%s13696_s3 + $0x28] sm:$0xff] }
 0x3a7   : > { %10315 = vmatmul.mubr.msk.f32.gmra.mrb[36].mxu1 %vm3888_vm2, %v12873_v8 }
 0x3a8   : > { %10317 = vmatprep.mubr.msk.f32.mxu1 %vm3888_vm2, %v12877_v50 }
 0x3ab   : > { %10318 = vmatmul.mubr.msk.f32.gmra.mrb[38].mxu1 %vm3888_vm2, %v12881_v15 }
 0x3ac   : > { %10322 = vmatprep.mubr.msk.f32.mxu1 %vm3888_vm2, %v12634_v19  ;;  %v12949_v19 = vld [vmem:[#allocation2 + $0x180] sm:$0xff] }
 0x3af   : > { %10323 = vmatmul.mubr.msk.f32.vlgmr.msra.gmra.mrb[8].mxu1 %vm3888_vm2, %v12640_v21  ;;  %v12953_v21 = vld [vmem:[#allocation2 + $0x188] sm:$0xff] }
 0x3b0   : > { %10325 = vmatprep.mubr.msk.f32.mxu1 %vm3888_vm2, %v12644_v23  ;;  %10371 = vmatpush3.msra.mxu1 %v12760_v51  ;;  %v8865_v51 = vld [vmem:[%s13696_s3 + $0x30] sm:$0xff] }
 0x3b1   : > { %10420 = vmatprep.subr.mxu1 %v8832_v13 }
 0x3b3   : > { %10326 = vmatmul.mubr.msk.f32.gmra.mrb[10].mxu1 %vm3888_vm2, %v12648_v24 }
 0x3b4   : > { %10328 = vmatprep.mubr.msk.f32.mxu1 %vm3888_vm2, %v12652_v34 }
 0x3b7   : > { %10329 = vmatmul.mubr.msk.f32.gmra.mrb[12].mxu1 %vm3888_vm2, %v12656_v59 }
 0x3b8   : > { %10331 = vmatprep.mubr.msk.f32.mxu1 %vm3888_vm2, %v12660_v53 }
 0x3bb   : > { %10332 = vmatmul.mubr.msk.f32.gmra.mrb[14].mxu1 %vm3888_vm2, %v12664_v38 }
 0x3bc   : > { %10334 = vmatprep.mubr.msk.f32.mxu1 %vm3888_vm2, %v12668_v54 }
 0x3bf   : > { %10335 = vmatmul.mubr.msk.f32.gmra.mrb[16].mxu1 %vm3888_vm2, %v12672_v39 }
 0x3c0   : > { %10337 = vmatprep.mubr.msk.f32.mxu1 %vm3888_vm2, %v12676_v40 }
 0x3c3   : > { %10338 = vmatmul.mubr.msk.f32.gmra.mrb[18].mxu1 %vm3888_vm2, %v12680_v41 }
 0x3c4   : > { %10340 = vmatprep.mubr.msk.f32.mxu1 %vm3888_vm2, %v12684_v42 }
 0x3c7   : > { %10341 = vmatmul.mubr.msk.f32.gmra.mrb[20].mxu1 %vm3888_vm2, %v12688_v44 }
 0x3c8   : > { %10343 = vmatprep.mubr.msk.f32.mxu1 %vm3888_vm2, %v12692_v48 }
 0x3cb   : > { %10344 = vmatmul.mubr.msk.f32.gmra.mrb[22].mxu1 %vm3888_vm2, %v12696_v2 }
 0x3cc   : > { %10346 = vmatprep.mubr.msk.f32.mxu1 %vm3888_vm2, %v12700_v55 }
 0x3cf   : > { %10347 = vmatmul.mubr.msk.f32.gmra.mrb[24].mxu1 %vm3888_vm2, %v12704_v3 }
 0x3d0   : > { %10349 = vmatprep.mubr.msk.f32.mxu1 %vm3888_vm2, %v12708_v56 }
 0x3d3   : > { %10350 = vmatmul.mubr.msk.f32.gmra.mrb[26].mxu1 %vm3888_vm2, %v12712_v5 }
 0x3d4   : > { %10352 = vmatprep.mubr.msk.f32.mxu1 %vm3888_vm2, %v12716_v27 }
 0x3d7   : > { %10353 = vmatmul.mubr.msk.f32.gmra.mrb[28].mxu1 %vm3888_vm2, %v12720_v30 }
 0x3d8   : > { %10355 = vmatprep.mubr.msk.f32.mxu1 %vm3888_vm2, %v12724_v61 }
 0x3db   : > { %10356 = vmatmul.mubr.msk.f32.gmra.mrb[30].mxu1 %vm3888_vm2, %v12728_v31 }
 0x3dc   : > { %10358 = vmatprep.mubr.msk.f32.mxu1 %vm3888_vm2, %v12732_v0 }
 0x3df   : > { %10359 = vmatmul.mubr.msk.f32.gmra.mrb[32].mxu1 %vm3888_vm2, %v12736_v4 }
 0x3e0   : > { %10361 = vmatprep.mubr.msk.f32.mxu1 %vm3888_vm2, %v12740_v1 }
 0x3e3   : > { %10362 = vmatmul.mubr.msk.f32.gmra.mrb[34].mxu1 %vm3888_vm2, %v12744_v7 }
 0x3e4   : > { %10364 = vmatprep.mubr.msk.f32.mxu1 %vm3888_vm2, %v12748_v58 }
 0x3e7   : > { %10365 = vmatmul.mubr.msk.f32.gmra.mrb[36].mxu1 %vm3888_vm2, %v12752_v62 }
 0x3e8   : > { %10367 = vmatprep.mubr.msk.f32.mxu1 %vm3888_vm2, %v12949_v19 }
 0x3eb   : > { %10368 = vmatmul.mubr.msk.f32.gmra.mrb[38].mxu1 %vm3888_vm2, %v12953_v21 }
 0x3ec   : > { %10372 = vmatprep.mubr.msk.f32.mxu1 %vm3888_vm2, %v12448_v18  ;;  %v13947_v18 = vld [vmem:[#allocation6_spill] sm:$0xff] }
 0x3ef   : > { %10373 = vmatmul.mubr.msk.f32.vlgmr.msra.gmra.mrb[8].mxu1 %vm3888_vm2, %v12453_v20  ;;  %v13948_v20 = vld [vmem:[#allocation7_spill] sm:$0xff] }
 0x3f0   : > { %10375 = vmatprep.mubr.msk.f32.mxu1 %vm3888_vm2, %v12460_v35  ;;  %10421 = vmatpush3.msra.mxu1 %v8832_v13  ;;  %v13020_v35 = vld [vmem:[#allocation2 + $0x181] sm:$0xff] }
 0x3f1   : > { %10470 = vmatprep.subr.mxu1 %v8865_v51  ;;  %v13962_v13 = vld [vmem:[#allocation41_spill] sm:$0xff] }
 0x3f3   : > { %10376 = vmatmul.mubr.msk.f32.gmra.mrb[10].mxu1 %vm3888_vm2, %v12465_v37  ;;  %v13024_v37 = vld [vmem:[#allocation2 + $0x189] sm:$0xff] }
 0x3f4   : > { %10378 = vmatprep.mubr.msk.f32.mxu1 %vm3888_vm2, %v12472_v45  ;;  %v13949_v45 = vld [vmem:[#allocation25_spill] sm:$0xff] }
 0x3f7   : > { %10379 = vmatmul.mubr.msk.f32.gmra.mrb[12].mxu1 %vm3888_vm2, %v12477_v47  ;;  %v8898_v47 = vld [vmem:[%s13696_s3 + $0x38] sm:$0xff] }
 0x3f8   : > { %10381 = vmatprep.mubr.msk.f32.mxu1 %vm3888_vm2, %v12484_v28  ;;  %v13950_v28 = vld [vmem:[#allocation26_spill] sm:$0xff] }
 0x3fb   : > { %10382 = vmatmul.mubr.msk.f32.gmra.mrb[14].mxu1 %vm3888_vm2, %v12489_v60  ;;  %v13951_v60 = vld [vmem:[#allocation28_spill] sm:$0xff] }
 0x3fc   : > { %10384 = vmatprep.mubr.msk.f32.mxu1 %vm3888_vm2, %v12496_v63  ;;  %v13952_v63 = vld [vmem:[#allocation30_spill] sm:$0xff] }
 0x3ff   : > { %10385 = vmatmul.mubr.msk.f32.gmra.mrb[16].mxu1 %vm3888_vm2, %v12501_v33  ;;  %v13953_v33 = vld [vmem:[#allocation34_spill] sm:$0xff] }
 0x400   : > { %10387 = vmatprep.mubr.msk.f32.mxu1 %vm3888_vm2, %v12508_v14  ;;  %v13954_v14 = vld [vmem:[#allocation36_spill] sm:$0xff] }
 0x403   : > { %10388 = vmatmul.mubr.msk.f32.gmra.mrb[18].mxu1 %vm3888_vm2, %v12513_v16  ;;  %v13955_v16 = vld [vmem:[#allocation29_spill] sm:$0xff] }
 0x404   : > { %10390 = vmatprep.mubr.msk.f32.mxu1 %vm3888_vm2, %v12520_v26  ;;  %v13956_v26 = vld [vmem:[#allocation31_spill] sm:$0xff] }
 0x407   : > { %10391 = vmatmul.mubr.msk.f32.gmra.mrb[20].mxu1 %vm3888_vm2, %v12525_v36  ;;  %v13957_v36 = vld [vmem:[#allocation33_spill] sm:$0xff] }
 0x408   : > { %10393 = vmatprep.mubr.msk.f32.mxu1 %vm3888_vm2, %v12532_v46  ;;  %v13958_v46 = vld [vmem:[#allocation35_spill] sm:$0xff] }
 0x40b   : > { %10394 = vmatmul.mubr.msk.f32.gmra.mrb[22].mxu1 %vm3888_vm2, %v12537_v49  ;;  %v13959_v49 = vld [vmem:[#allocation37_spill] sm:$0xff] }
 0x40c   : > { %10396 = vmatprep.mubr.msk.f32.mxu1 %vm3888_vm2, %v12544_v29  ;;  %v13960_v29 = vld [vmem:[#allocation38_spill] sm:$0xff] }
 0x40f   : > { %10397 = vmatmul.mubr.msk.f32.gmra.mrb[24].mxu1 %vm3888_vm2, %v12549_v6  ;;  %v13961_v6 = vld [vmem:[#allocation40_spill] sm:$0xff] }
 0x410   : > { %10399 = vmatprep.mubr.msk.f32.mxu1 %vm3888_vm2, %v12556_v10 }
 0x413   : > { %10400 = vmatmul.mubr.msk.f32.gmra.mrb[26].mxu1 %vm3888_vm2, %v12562_v12 }
 0x414   : > { %10402 = vmatprep.mubr.msk.f32.mxu1 %vm3888_vm2, %v12569_v22 }
 0x417   : > { %10403 = vmatmul.mubr.msk.f32.gmra.mrb[28].mxu1 %vm3888_vm2, %v12574_v25 }
 0x418   : > { %10405 = vmatprep.mubr.msk.f32.mxu1 %vm3888_vm2, %v12583_v43 }
 0x41b   : > { %10406 = vmatmul.mubr.msk.f32.gmra.mrb[30].mxu1 %vm3888_vm2, %v12588_v52 }
 0x41c   : > { %10408 = vmatprep.mubr.msk.f32.mxu1 %vm3888_vm2, %v12600_v32 }
 0x41f   : > { %10409 = vmatmul.mubr.msk.f32.gmra.mrb[32].mxu1 %vm3888_vm2, %v12605_v57 }
 0x420   : > { %10411 = vmatprep.mubr.msk.f32.mxu1 %vm3888_vm2, %v12610_v9 }
 0x423   : > { %10412 = vmatmul.mubr.msk.f32.gmra.mrb[34].mxu1 %vm3888_vm2, %v12615_v11 }
 0x424   : > { %10414 = vmatprep.mubr.msk.f32.mxu1 %vm3888_vm2, %v13947_v18 }
 0x427   : > { %10415 = vmatmul.mubr.msk.f32.gmra.mrb[36].mxu1 %vm3888_vm2, %v13948_v20 }
 0x428   : > { %10417 = vmatprep.mubr.msk.f32.mxu1 %vm3888_vm2, %v13020_v35 }
 0x42b   : > { %10418 = vmatmul.mubr.msk.f32.gmra.mrb[38].mxu1 %vm3888_vm2, %v13024_v37 }
 0x42c   : > { %10422 = vmatprep.mubr.msk.f32.mxu1 %vm3888_vm2, %v13949_v45  ;;  %v13964_v45 = vld [vmem:[#allocation9_spill] sm:$0xff] }
 0x42f   : > { %10423 = vmatmul.mubr.msk.f32.vlgmr.msra.gmra.mrb[8].mxu1 %vm3888_vm2, %v13950_v28  ;;  %v13965_v28 = vld [vmem:[#allocation10_spill] sm:$0xff] }
 0x430   : > { %10425 = vmatprep.mubr.msk.f32.mxu1 %vm3888_vm2, %v13951_v60  ;;  %10471 = vmatpush3.msra.mxu1 %v8865_v51  ;;  %v13963_v51 = vld [vmem:[#allocation8_spill] sm:$0xff] }
 0x431   : > { %10520 = vmatprep.subr.mxu1 %v8898_v47 }
 0x433   : > { %10426 = vmatmul.mubr.msk.f32.gmra.mrb[10].mxu1 %vm3888_vm2, %v13952_v63 }
 0x434   : > { %10428 = vmatprep.mubr.msk.f32.mxu1 %vm3888_vm2, %v13953_v33 }
 0x437   : > { %10429 = vmatmul.mubr.msk.f32.gmra.mrb[12].mxu1 %vm3888_vm2, %v13954_v14 }
 0x438   : > { %10431 = vmatprep.mubr.msk.f32.mxu1 %vm3888_vm2, %v13955_v16 }
 0x43b   : > { %10432 = vmatmul.mubr.msk.f32.gmra.mrb[14].mxu1 %vm3888_vm2, %v13956_v26 }
 0x43c   : > { %10434 = vmatprep.mubr.msk.f32.mxu1 %vm3888_vm2, %v13957_v36 }
 0x43f   : > { %10435 = vmatmul.mubr.msk.f32.gmra.mrb[16].mxu1 %vm3888_vm2, %v13958_v46  ;;  %v13966_v46 = vld [vmem:[#allocation11_spill] sm:$0xff] }
 0x440   : > { %10437 = vmatprep.mubr.msk.f32.mxu1 %vm3888_vm2, %v13959_v49  ;;  %v13967_v49 = vld [vmem:[#allocation12_spill] sm:$0xff] }
 0x443   : > { %10438 = vmatmul.mubr.msk.f32.gmra.mrb[18].mxu1 %vm3888_vm2, %v13960_v29 }
 0x444   : > { %10440 = vmatprep.mubr.msk.f32.mxu1 %vm3888_vm2, %v13961_v6  ;;  %v7563_v6 = vld [vmem:[%s13698_s5] sm:$0xf] }
 0x445   : > { %10620 = vmatprep.subr.msk.mxu0 %vm468_vm0, %v7563_v6 }
 0x446   : > { %10621 = vmatpush3.msk.msra.mxu0 %vm468_vm0, %v7563_v6  ;;  %v13974_v6 = vld [vmem:[#allocation20_spill] sm:$0xff] }
 0x447   : > { %10441 = vmatmul.mubr.msk.f32.gmra.mrb[20].mxu1 %vm3888_vm2, %v13962_v13  ;;  %v13973_v13 = vld [vmem:[#allocation18_spill] sm:$0xff] }
 0x448   : > { %10443 = vmatprep.mubr.msk.f32.mxu1 %vm3888_vm2, %v13963_v51  ;;  %v13968_v51 = vld [vmem:[#allocation13_spill] sm:$0xff] }
 0x44b   : > { %10444 = vmatmul.mubr.msk.f32.gmra.mrb[22].mxu1 %vm3888_vm2, %v13964_v45  ;;  %v13969_v45 = vld [vmem:[#allocation14_spill] sm:$0xff] }
 0x44c   : > { %10446 = vmatprep.mubr.msk.f32.mxu1 %vm3888_vm2, %v13965_v28  ;;  %v13970_v28 = vld [vmem:[#allocation15_spill] sm:$0xff] }
 0x44f   : > { %10447 = vmatmul.mubr.msk.f32.gmra.mrb[24].mxu1 %vm3888_vm2, %v13966_v46  ;;  %v13971_v46 = vld [vmem:[#allocation16_spill] sm:$0xff] }
 0x450   : > { %10449 = vmatprep.mubr.msk.f32.mxu1 %vm3888_vm2, %v13967_v49  ;;  %v13972_v49 = vld [vmem:[#allocation17_spill] sm:$0xff] }
 0x453   : > { %10450 = vmatmul.mubr.msk.f32.gmra.mrb[26].mxu1 %vm3888_vm2, %v13968_v51 }
 0x454   : > { %10452 = vmatprep.mubr.msk.f32.mxu1 %vm3888_vm2, %v13969_v45 }
 0x457   : > { %10453 = vmatmul.mubr.msk.f32.gmra.mrb[28].mxu1 %vm3888_vm2, %v13970_v28 }
 0x458   : > { %10455 = vmatprep.mubr.msk.f32.mxu1 %vm3888_vm2, %v13971_v46 }
 0x45b   : > { %10456 = vmatmul.mubr.msk.f32.gmra.mrb[30].mxu1 %vm3888_vm2, %v13972_v49  ;;  %v13096_v49 = vld [vmem:[#allocation2 + $0x182] sm:$0xff] }
 0x45c   : > { %10458 = vmatprep.mubr.msk.f32.mxu1 %vm3888_vm2, %v13973_v13  ;;  %13975 = vst [vmem:[#allocation23_spill] sm:$0xff] %v13096_v49 }
 0x45f   : > { %10459 = vmatmul.mubr.msk.f32.gmra.mrb[32].mxu1 %vm3888_vm2, %v12865_v17  ;;  %v13100_v17 = vld [vmem:[#allocation2 + $0x18a] sm:$0xff] }
 0x460   : > { %10461 = vmatprep.mubr.msk.f32.mxu1 %vm3888_vm2, %v13974_v6 }
 0x463   : > { %10462 = vmatmul.mubr.msk.f32.gmra.mrb[34].mxu1 %vm3888_vm2, %v12873_v8 }
 0x464   : > { %10464 = vmatprep.mubr.msk.f32.mxu1 %vm3888_vm2, %v12877_v50  ;;  %v13109_v50 = vld [vmem:[%s13696_s3 + $0x40] sm:$0xff] }
 0x467   : > { %10465 = vmatmul.mubr.msk.f32.gmra.mrb[36].mxu1 %vm3888_vm2, %v12881_v15  ;;  %v8966_v15 = vld [vmem:[%s11436_s25 + $0x21] sm:$0xff] }
 0x468   : > { %10467 = vmatprep.mubr.msk.f32.mxu1 %vm3888_vm2, %v13096_v49  ;;  %v8965_v49 = vld [vmem:[%s11436_s25 + $0x19] sm:$0xff] }
 0x469   : > { %10622 = vmatprep.mubr.msk.f32.mxu0 %vm371_vm1, %v8965_v49  ;;  %v8995_v49 = vld [vmem:[%s11436_s25 + $0x181] sm:$0xff] }
 0x46a   : > { %10623 = vmatmul.mubr.msk.f32.vlgmr.msra.gmra.mrb[32].mxu0 %vm371_vm1, %v8966_v15  ;;  %v8969_v15 = vld [vmem:[%s11436_s25 + $0x49] sm:$0xff] }
 0x46b   : > { %10468 = vmatmul.mubr.msk.f32.gmra.mrb[38].mxu1 %vm3888_vm2, %v13100_v17 }
 0x46c   : > { %10472 = vmatprep.mubr.msk.f32.mxu1 %vm3888_vm2, %v12644_v23  ;;  %v8967_v23 = vld [vmem:[%s11436_s25 + $0x31] sm:$0xff] }
 0x46d   : > { %10625 = vmatprep.mubr.msk.f32.mxu0 %vm371_vm1, %v8967_v23  ;;  %v8996_v23 = vld [vmem:[%s11436_s25 + $0x189] sm:$0xff] }
 0x46f   : > { %10473 = vmatmul.mubr.msk.f32.vlgmr.msra.gmra.mrb[8].mxu1 %vm3888_vm2, %v12648_v24  ;;  %v8968_v24 = vld [vmem:[%s11436_s25 + $0x39] sm:$0xff] }
 0x470   : > { %10475 = vmatprep.mubr.msk.f32.mxu1 %vm3888_vm2, %v12652_v34  ;;  %10521 = vmatpush3.msra.mxu1 %v8898_v47  ;;  %v8970_v34 = vld [vmem:[%s11436_s25 + $0x51] sm:$0xff]  ;;  %v6266_v47 = vld [vmem:[#allocation2 + $0x1a0] sm:$0xff] }
 0x471   : > { %10570 = vmatprep.subr.mxu1 %v13109_v50  ;;  %10626 = vmatmul.mubr.msk.f32.gmra.mrb[34].mxu0 %vm371_vm1, %v8968_v24  ;;  %v6623_v24 = vld [vmem:[#allocation2 + $0x39] sm:$0xff] }
 0x472   : > { %10628 = vmatprep.mubr.msk.f32.mxu0 %vm371_vm1, %v8969_v15  ;;  %v6625_v15 = vld [vmem:[#allocation2 + $0x51] sm:$0xff] }
 0x473   : > { %10476 = vmatmul.mubr.msk.f32.gmra.mrb[10].mxu1 %vm3888_vm2, %v12656_v59  ;;  %v8971_v59 = vld [vmem:[%s11436_s25 + $0x61] sm:$0xff] }
 0x474   : > { %10478 = vmatprep.mubr.msk.f32.mxu1 %vm3888_vm2, %v12660_v53  ;;  %v8972_v53 = vld [vmem:[%s11436_s25 + $0x69] sm:$0xff] }
 0x475   : > { %10629 = vmatmul.mubr.msk.f32.gmra.mrb[36].mxu0 %vm371_vm1, %v8970_v34  ;;  %v6626_v34 = vld [vmem:[#allocation2 + $0x61] sm:$0xff] }
 0x476   : > { %10631 = vmatprep.mubr.msk.f32.mxu0 %vm371_vm1, %v8971_v59  ;;  %v6627_v59 = vld [vmem:[#allocation2 + $0x69] sm:$0xff] }
 0x477   : > { %10479 = vmatmul.mubr.msk.f32.gmra.mrb[12].mxu1 %vm3888_vm2, %v12664_v38  ;;  %v8973_v38 = vld [vmem:[%s11436_s25 + $0x79] sm:$0xff] }
 0x478   : > { %10481 = vmatprep.mubr.msk.f32.mxu1 %vm3888_vm2, %v12668_v54  ;;  %v8974_v54 = vld [vmem:[%s11436_s25 + $0x81] sm:$0xff] }
 0x479   : > { %10632 = vmatmul.mubr.msk.f32.gmra.mrb[38].mxu0 %vm371_vm1, %v8972_v53  ;;  %v6628_v53 = vld [vmem:[#allocation2 + $0x79] sm:$0xff] }
 0x47a   : > { %10634 = vmatprep.mubr.msk.f32.mxu0 %vm371_vm1, %v8973_v38  ;;  %v6629_v38 = vld [vmem:[#allocation2 + $0x81] sm:$0xff] }
 0x47b   : > { %10482 = vmatmul.mubr.msk.f32.gmra.mrb[14].mxu1 %vm3888_vm2, %v12672_v39  ;;  %v8975_v39 = vld [vmem:[%s11436_s25 + $0x91] sm:$0xff] }
 0x47c   : > { %10484 = vmatprep.mubr.msk.f32.mxu1 %vm3888_vm2, %v12676_v40  ;;  %v8976_v40 = vld [vmem:[%s11436_s25 + $0x99] sm:$0xff] }
 0x47d   : > { %10635 = vmatmul.mubr.msk.f32.gmra.mrb[40].mxu0 %vm371_vm1, %v8974_v54  ;;  %v6630_v54 = vld [vmem:[#allocation2 + $0x91] sm:$0xff] }
 0x47e   : > { %10637 = vmatprep.mubr.msk.f32.mxu0 %vm371_vm1, %v8975_v39  ;;  %v6631_v39 = vld [vmem:[#allocation2 + $0x99] sm:$0xff] }
 0x47f   : > { %10485 = vmatmul.mubr.msk.f32.gmra.mrb[16].mxu1 %vm3888_vm2, %v12680_v41  ;;  %v8977_v41 = vld [vmem:[%s11436_s25 + $0xa9] sm:$0xff] }
 0x480   : > { %10487 = vmatprep.mubr.msk.f32.mxu1 %vm3888_vm2, %v12684_v42  ;;  %v8978_v42 = vld [vmem:[%s11436_s25 + $0xb1] sm:$0xff] }
 0x481   : > { %10638 = vmatmul.mubr.msk.f32.gmra.mrb[42].mxu0 %vm371_vm1, %v8976_v40  ;;  %v6633_v40 = vld [vmem:[#allocation2 + $0xb1] sm:$0xff] }
 0x482   : > { %10640 = vmatprep.mubr.msk.f32.mxu0 %vm371_vm1, %v8977_v41  ;;  %v6634_v41 = vld [vmem:[#allocation2 + $0xc1] sm:$0xff] }
 0x483   : > { %10488 = vmatmul.mubr.msk.f32.gmra.mrb[18].mxu1 %vm3888_vm2, %v12688_v44  ;;  %v8979_v44 = vld [vmem:[%s11436_s25 + $0xc1] sm:$0xff] }
 0x484   : > { %10490 = vmatprep.mubr.msk.f32.mxu1 %vm3888_vm2, %v12692_v48  ;;  %v8980_v48 = vld [vmem:[%s11436_s25 + $0xc9] sm:$0xff] }
 0x485   : > { %10641 = vmatmul.mubr.msk.f32.gmra.mrb[44].mxu0 %vm371_vm1, %v8978_v42  ;;  %v6635_v42 = vld [vmem:[#allocation2 + $0xc9] sm:$0xff] }
 0x486   : > { %10643 = vmatprep.mubr.msk.f32.mxu0 %vm371_vm1, %v8979_v44  ;;  %v6636_v44 = vld [vmem:[#allocation2 + $0xd9] sm:$0xff] }
 0x487   : > { %10491 = vmatmul.mubr.msk.f32.gmra.mrb[20].mxu1 %vm3888_vm2, %v12696_v2  ;;  %v8981_v2 = vld [vmem:[%s11436_s25 + $0xd9] sm:$0xff] }
 0x488   : > { %10493 = vmatprep.mubr.msk.f32.mxu1 %vm3888_vm2, %v12700_v55  ;;  %v8982_v55 = vld [vmem:[%s11436_s25 + $0xe1] sm:$0xff] }
 0x489   : > { %10644 = vmatmul.mubr.msk.f32.gmra.mrb[46].mxu0 %vm371_vm1, %v8980_v48  ;;  %v6637_v48 = vld [vmem:[#allocation2 + $0xe1] sm:$0xff] }
 0x48a   : > { %10646 = vmatprep.mubr.msk.f32.mxu0 %vm371_vm1, %v8981_v2 }
 0x48b   : > { %10494 = vmatmul.mubr.msk.f32.gmra.mrb[22].mxu1 %vm3888_vm2, %v12704_v3  ;;  %v8983_v3 = vld [vmem:[%s11436_s25 + $0xf1] sm:$0xff] }
 0x48c   : > { %10496 = vmatprep.mubr.msk.f32.mxu1 %vm3888_vm2, %v12708_v56  ;;  %v8984_v56 = vld [vmem:[%s11436_s25 + $0xf9] sm:$0xff] }
 0x48d   : > { %10647 = vmatmul.mubr.msk.f32.gmra.mrb[48].mxu0 %vm371_vm1, %v8982_v55 }
 0x48e   : > { %10649 = vmatprep.mubr.msk.f32.mxu0 %vm371_vm1, %v8983_v3 }
 0x48f   : > { %10497 = vmatmul.mubr.msk.f32.gmra.mrb[24].mxu1 %vm3888_vm2, %v12712_v5  ;;  %v8985_v5 = vld [vmem:[%s11436_s25 + $0x109] sm:$0xff] }
 0x490   : > { %10499 = vmatprep.mubr.msk.f32.mxu1 %vm3888_vm2, %v12716_v27  ;;  %v8986_v27 = vld [vmem:[%s11436_s25 + $0x111] sm:$0xff] }
 0x491   : > { %10650 = vmatmul.mubr.msk.f32.gmra.mrb[50].mxu0 %vm371_vm1, %v8984_v56 }
 0x492   : > { %10652 = vmatprep.mubr.msk.f32.mxu0 %vm371_vm1, %v8985_v5 }
 0x493   : > { %10500 = vmatmul.mubr.msk.f32.gmra.mrb[26].mxu1 %vm3888_vm2, %v12720_v30  ;;  %v8987_v30 = vld [vmem:[%s11436_s25 + $0x121] sm:$0xff] }
 0x494   : > { %10502 = vmatprep.mubr.msk.f32.mxu1 %vm3888_vm2, %v12724_v61  ;;  %v8988_v61 = vld [vmem:[%s11436_s25 + $0x129] sm:$0xff] }
 0x495   : > { %10653 = vmatmul.mubr.msk.f32.gmra.mrb[52].mxu0 %vm371_vm1, %v8986_v27 }
 0x496   : > { %10655 = vmatprep.mubr.msk.f32.mxu0 %vm371_vm1, %v8987_v30 }
 0x497   : > { %10503 = vmatmul.mubr.msk.f32.gmra.mrb[28].mxu1 %vm3888_vm2, %v12728_v31  ;;  %v8989_v31 = vld [vmem:[%s11436_s25 + $0x139] sm:$0xff] }
 0x498   : > { %10505 = vmatprep.mubr.msk.f32.mxu1 %vm3888_vm2, %v12732_v0  ;;  %v8990_v0 = vld [vmem:[%s11436_s25 + $0x141] sm:$0xff] }
 0x499   : > { %10656 = vmatmul.mubr.msk.f32.gmra.mrb[54].mxu0 %vm371_vm1, %v8988_v61 }
 0x49a   : > { %10658 = vmatprep.mubr.msk.f32.mxu0 %vm371_vm1, %v8989_v31 }
 0x49b   : > { %10506 = vmatmul.mubr.msk.f32.gmra.mrb[30].mxu1 %vm3888_vm2, %v12736_v4  ;;  %v8991_v4 = vld [vmem:[%s11436_s25 + $0x151] sm:$0xff] }
 0x49c   : > { %10508 = vmatprep.mubr.msk.f32.mxu1 %vm3888_vm2, %v12740_v1  ;;  %v8992_v1 = vld [vmem:[%s11436_s25 + $0x159] sm:$0xff] }
 0x49d   : > { %10659 = vmatmul.mubr.msk.f32.gmra.mrb[56].mxu0 %vm371_vm1, %v8990_v0 }
 0x49e   : > { %10661 = vmatprep.mubr.msk.f32.mxu0 %vm371_vm1, %v8991_v4 }
 0x49f   : > { %10509 = vmatmul.mubr.msk.f32.gmra.mrb[32].mxu1 %vm3888_vm2, %v12744_v7  ;;  %v6265_v7 = vld [vmem:[#allocation2 + $0x198] sm:$0xff] }
 0x4a0   : > { %10511 = vmatprep.mubr.msk.f32.mxu1 %vm3888_vm2, %v12748_v58  ;;  %v8993_v58 = vld [vmem:[%s11436_s25 + $0x169] sm:$0xff] }
 0x4a1   : > { %10662 = vmatmul.mubr.msk.f32.gmra.mrb[58].mxu0 %vm371_vm1, %v8992_v1 }
 0x4a2   : > { %10664 = vmatprep.mubr.msk.f32.mxu0 %vm371_vm1, %v8993_v58 }
 0x4a3   : > { %10512 = vmatmul.mubr.msk.f32.gmra.mrb[34].mxu1 %vm3888_vm2, %v12752_v62  ;;  %v8994_v62 = vld [vmem:[%s11436_s25 + $0x171] sm:$0xff]  ;;  %s9036_s25 = sshll.u32 %s11393_s9, 10  ;;  %s13652_s9 = scalar_lea.sflag [#allocation4], %s296_s22 }
 0x4a4   : > { %10514 = vmatprep.mubr.msk.f32.mxu1 %vm3888_vm2, %v12949_v19  ;;  %v6622_v19 = vld [vmem:[#allocation2 + $0x31] sm:$0xff]  ;;  %s13644_s13 = scalar_lea.hbm %s13701_s8, %s9036_s25 }
 0x4a5   : > { %10665 = vmatmul.mubr.msk.f32.gmra.mrb[60].mxu0 %vm371_vm1, %v8994_v62 }
 0x4a6   : > { %10667 = vmatprep.mubr.msk.f32.mxu0 %vm371_vm1, %v8995_v49 }
 0x4a7   : > { %10515 = vmatmul.mubr.msk.f32.gmra.mrb[36].mxu1 %vm3888_vm2, %v12953_v21  ;;  %v6624_v21 = vld [vmem:[#allocation2 + $0x49] sm:$0xff] }
 0x4a8   : > { %10517 = vmatprep.mubr.msk.f32.mxu1 %vm3888_vm2, %v6265_v7 }
 0x4a9   : > { %10668 = vmatmul.mubr.msk.f32.gmra.mrb[62].mxu0 %vm371_vm1, %v8996_v23 }
 0x4ab   : > { %10518 = vmatmul.mubr.msk.f32.gmra.mrb[38].mxu1 %vm3888_vm2, %v6266_v47 }
 0x4ac   : > { %10522 = vmatprep.mubr.msk.f32.mxu1 %vm3888_vm2, %v6622_v19 }
 0x4af   : > { %10523 = vmatmul.mubr.msk.f32.vlgmr.msra.gmra.mrb[8].mxu1 %vm3888_vm2, %v6623_v24 }
 0x4b0   : > { %10525 = vmatprep.mubr.msk.f32.mxu1 %vm3888_vm2, %v6624_v21  ;;  %10571 = vmatpush3.msra.mxu1 %v13109_v50  ;;  %v6632_v50 = vld [vmem:[#allocation2 + $0xa9] sm:$0xff] }
 0x4b1   : > { %v7960_v21 = vld [vmem:[%s13700_s7 + $0x8] sm:$0xff] }
 0x4b3   : > { %10526 = vmatmul.mubr.msk.f32.gmra.mrb[10].mxu1 %vm3888_vm2, %v6625_v15  ;;  %v13405_v15 = vld [vmem:[%s13697_s4] ss:$0 sm:$0xff] }
 0x4b4   : > { %10528 = vmatprep.mubr.msk.f32.mxu1 %vm3888_vm2, %v6626_v34  ;;  %v13410_v34 = vld [vmem:[%s13699_s6] ss:$0 sm:$0xff] }
 0x4b7   : > { %10529 = vmatmul.mubr.msk.f32.gmra.mrb[12].mxu1 %vm3888_vm2, %v6627_v59 }
 0x4b8   : > { %10531 = vmatprep.mubr.msk.f32.mxu1 %vm3888_vm2, %v6628_v53 }
 0x4bb   : > { %10532 = vmatmul.mubr.msk.f32.gmra.mrb[14].mxu1 %vm3888_vm2, %v6629_v38 }
 0x4bc   : > { %10534 = vmatprep.mubr.msk.f32.mxu1 %vm3888_vm2, %v6630_v54 }
 0x4bf   : > { %10535 = vmatmul.mubr.msk.f32.gmra.mrb[16].mxu1 %vm3888_vm2, %v6631_v39 }
 0x4c0   : > { %10537 = vmatprep.mubr.msk.f32.mxu1 %vm3888_vm2, %v6632_v50 }
 0x4c3   : > { %10538 = vmatmul.mubr.msk.f32.gmra.mrb[18].mxu1 %vm3888_vm2, %v6633_v40 }
 0x4c4   : > { %10540 = vmatprep.mubr.msk.f32.mxu1 %vm3888_vm2, %v6634_v41 }
 0x4c7   : > { %10541 = vmatmul.mubr.msk.f32.gmra.mrb[20].mxu1 %vm3888_vm2, %v6635_v42 }
 0x4c8   : > { %10543 = vmatprep.mubr.msk.f32.mxu1 %vm3888_vm2, %v6636_v44 }
 0x4cb   : > { %10544 = vmatmul.mubr.msk.f32.gmra.mrb[22].mxu1 %vm3888_vm2, %v6637_v48 }
 0x4cc   : > { %10546 = vmatprep.mubr.msk.f32.mxu1 %vm3888_vm2, %v12556_v10  ;;  %v6652_v10 = vld [vmem:[#allocation2 + $0x199] sm:$0xff] }
 0x4cf   : > { %10547 = vmatmul.mubr.msk.f32.gmra.mrb[24].mxu1 %vm3888_vm2, %v12562_v12  ;;  %v6653_v12 = vld [vmem:[#allocation2 + $0x1a1] sm:$0xff] }
 0x4d0   : > { %10549 = vmatprep.mubr.msk.f32.mxu1 %vm3888_vm2, %v12569_v22  ;;  %v13976_v22 = vld [vmem:[#allocation35_spill] sm:$0xff] }
 0x4d3   : > { %10550 = vmatmul.mubr.msk.f32.gmra.mrb[26].mxu1 %vm3888_vm2, %v12574_v25  ;;  %v13977_v25 = vld [vmem:[#allocation37_spill] sm:$0xff] }
 0x4d4   : > { %10552 = vmatprep.mubr.msk.f32.mxu1 %vm3888_vm2, %v12583_v43  ;;  %v13978_v43 = vld [vmem:[#allocation40_spill] sm:$0xff] }
 0x4d7   : > { %10553 = vmatmul.mubr.msk.f32.gmra.mrb[28].mxu1 %vm3888_vm2, %v12588_v52  ;;  %v13979_v52 = vld [vmem:[#allocation41_spill] sm:$0xff] }
 0x4d8   : > { %10555 = vmatprep.mubr.msk.f32.mxu1 %vm3888_vm2, %v12600_v32  ;;  %v13980_v32 = vld [vmem:[#allocation8_spill] sm:$0xff] }
 0x4db   : > { %10556 = vmatmul.mubr.msk.f32.gmra.mrb[30].mxu1 %vm3888_vm2, %v12605_v57  ;;  %v13981_v57 = vld [vmem:[#allocation9_spill] sm:$0xff] }
 0x4dc   : > { %10558 = vmatprep.mubr.msk.f32.mxu1 %vm3888_vm2, %v12610_v9  ;;  %v13982_v9 = vld [vmem:[#allocation10_spill] sm:$0xff] }
 0x4df   : > { %10559 = vmatmul.mubr.msk.f32.gmra.mrb[32].mxu1 %vm3888_vm2, %v12615_v11  ;;  %v13983_v11 = vld [vmem:[#allocation11_spill] sm:$0xff] }
 0x4e0   : > { %10561 = vmatprep.mubr.msk.f32.mxu1 %vm3888_vm2, %v13947_v18  ;;  %v13984_v18 = vld [vmem:[#allocation12_spill] sm:$0xff] }
 0x4e3   : > { %10562 = vmatmul.mubr.msk.f32.gmra.mrb[34].mxu1 %vm3888_vm2, %v13948_v20  ;;  %v13985_v20 = vld [vmem:[#allocation17_spill] sm:$0xff] }
 0x4e4   : > { %10564 = vmatprep.mubr.msk.f32.mxu1 %vm3888_vm2, %v13020_v35  ;;  %v13986_v35 = vld [vmem:[#allocation19_spill] sm:$0xff] }
 0x4e7   : > { %10565 = vmatmul.mubr.msk.f32.gmra.mrb[36].mxu1 %vm3888_vm2, %v13024_v37  ;;  %v13987_v37 = vld [vmem:[#allocation21_spill] sm:$0xff] }
 0x4e8   : > { %10567 = vmatprep.mubr.msk.f32.mxu1 %vm3888_vm2, %v6652_v10 }
 0x4eb   : > { %10568 = vmatmul.mubr.msk.f32.gmra.mrb[38].mxu1 %vm3888_vm2, %v6653_v12 }
 0x4ec   : > { %10572 = vmatprep.mubr.msk.f32.mxu1 %vm3888_vm2, %v13951_v60  ;;  %v13988_v60 = vld [vmem:[#allocation22_spill] sm:$0xff] }
 0x4ef   : > { %10573 = vmatmul.mubr.msk.f32.vlgmr.msra.gmra.mrb[8].mxu1 %vm3888_vm2, %v13952_v63  ;;  %v13989_v63 = vld [vmem:[#allocation23_spill] sm:$0xff] }
 0x4f0   : > { %10575 = vmatprep.mubr.msk.f32.mxu1 %vm3888_vm2, %v13953_v33  ;;  %v7039_v33 = vld [vmem:[#allocation2 + $0x19a] sm:$0xff] }
 0x4f3   : > { %10576 = vmatmul.mubr.msk.f32.gmra.mrb[10].mxu1 %vm3888_vm2, %v13954_v14  ;;  %v7040_v14 = vld [vmem:[#allocation2 + $0x1a2] sm:$0xff] }
 0x4f4   : > { %10578 = vmatprep.mubr.msk.f32.mxu1 %vm3888_vm2, %v13955_v16 }
 0x4f7   : > { %10579 = vmatmul.mubr.msk.f32.gmra.mrb[12].mxu1 %vm3888_vm2, %v13956_v26 }
 0x4f8   : > { %10581 = vmatprep.mubr.msk.f32.mxu1 %vm3888_vm2, %v13957_v36 }
 0x4fb   : > { %10582 = vmatmul.mubr.msk.f32.gmra.mrb[14].mxu1 %vm3888_vm2, %v13976_v22 }
 0x4fc   : > { %10584 = vmatprep.mubr.msk.f32.mxu1 %vm3888_vm2, %v13977_v25 }
 0x4ff   : > { %10585 = vmatmul.mubr.msk.f32.gmra.mrb[16].mxu1 %vm3888_vm2, %v13960_v29 }
 0x500   : > { %10587 = vmatprep.mubr.msk.f32.mxu1 %vm3888_vm2, %v13978_v43 }
 0x503   : > { %10588 = vmatmul.mubr.msk.f32.gmra.mrb[18].mxu1 %vm3888_vm2, %v13979_v52 }
 0x504   : > { %10590 = vmatprep.mubr.msk.f32.mxu1 %vm3888_vm2, %v13980_v32 }
 0x507   : > { %10591 = vmatmul.mubr.msk.f32.gmra.mrb[20].mxu1 %vm3888_vm2, %v13981_v57 }
 0x508   : > { %10593 = vmatprep.mubr.msk.f32.mxu1 %vm3888_vm2, %v13982_v9 }
 0x50b   : > { %10594 = vmatmul.mubr.msk.f32.gmra.mrb[22].mxu1 %vm3888_vm2, %v13983_v11 }
 0x50c   : > { %10596 = vmatprep.mubr.msk.f32.mxu1 %vm3888_vm2, %v13984_v18 }
 0x50f   : > { %10597 = vmatmul.mubr.msk.f32.gmra.mrb[24].mxu1 %vm3888_vm2, %v13968_v51 }
 0x510   : > { %10599 = vmatprep.mubr.msk.f32.mxu1 %vm3888_vm2, %v13969_v45 }
 0x513   : > { %10600 = vmatmul.mubr.msk.f32.gmra.mrb[26].mxu1 %vm3888_vm2, %v13970_v28 }
 0x514   : > { %10602 = vmatprep.mubr.msk.f32.mxu1 %vm3888_vm2, %v13971_v46 }
 0x517   : > { %10603 = vmatmul.mubr.msk.f32.gmra.mrb[28].mxu1 %vm3888_vm2, %v13985_v20 }
 0x518   : > { %10605 = vmatprep.mubr.msk.f32.mxu1 %vm3888_vm2, %v13973_v13 }
 0x51b   : > { %10606 = vmatmul.mubr.msk.f32.gmra.mrb[30].mxu1 %vm3888_vm2, %v13986_v35 }
 0x51c   : > { %10608 = vmatprep.mubr.msk.f32.mxu1 %vm3888_vm2, %v13974_v6 }
 0x51f   : > { %10609 = vmatmul.mubr.msk.f32.gmra.mrb[32].mxu1 %vm3888_vm2, %v12873_v8 }
 0x520   : > { %10611 = vmatprep.mubr.msk.f32.mxu1 %vm3888_vm2, %v13987_v37 }
 0x523   : > { %10612 = vmatmul.mubr.msk.f32.gmra.mrb[34].mxu1 %vm3888_vm2, %v13988_v60 }
 0x524   : > { %10614 = vmatprep.mubr.msk.f32.mxu1 %vm3888_vm2, %v13989_v63 }
 0x527   : > { %10615 = vmatmul.mubr.msk.f32.gmra.mrb[36].mxu1 %vm3888_vm2, %v13100_v17 }
 0x528   : > { %10617 = vmatprep.mubr.msk.f32.mxu1 %vm3888_vm2, %v7039_v33 }
 0x52b   : > { %10618 = vmatmul.mubr.msk.f32.gmra.mrb[38].mxu1 %vm3888_vm2, %v7040_v14 }
 0x52c   : > { %8039 = vmatprep.mubr.f32.mxu1 %v7960_v21 }
 0x53d   : > { %v10624_v16 = vpop.f32.mrb[32].mxu0 }
 0x53e   : > { %v7736_v8 = vpop.f32.mrb[33].mxu0  ;;  %v7742_v39 = vadd.f32 %v10624_v16, %v13410_v34 }
 0x53f   : > { %v7737_v40 = vadd.f32 %v13410_v34, %v7736_v8 }
 0x544   : > { %v10627_v26 = vpop.f32.mrb[34].mxu0 }
 0x545   : > { %v7746_v36 = vpop.f32.mrb[35].mxu0  ;;  %v7752_v43 = vadd.f32 %v10627_v26, %v13410_v34 }
 0x546   : > { %v7747_v57 = vadd.f32 %v13410_v34, %v7746_v36 }
 0x548   : > { %v10630_v46 = vpop.f32.mrb[36].mxu0 }
 0x549   : > { %v13345_v29 = vpop.f32.mrb[37].mxu0  ;;  %v7762_v63 = vadd.f32 %v10630_v46, %v13410_v34 }
 0x54a   : > { %v7757_v8 = vadd.f32 %v13410_v34, %v13345_v29 }
 0x54c   : > { %v13347_v13 = vpop.f32.mrb[38].mxu0 }
 0x54d   : > { %v13349_v51 = vpop.f32.mrb[39].mxu0  ;;  %v7772_v29 = vadd.f32 %v13347_v13, %v13410_v34 }
 0x550   : > { %v13351_v45 = vpop.f32.mrb[40].mxu0 }
 0x551   : > { %v13353_v28 = vpop.f32.mrb[41].mxu0 }
 0x554   : > { %v13355_v17 = vpop.f32.mrb[42].mxu0 }
 0x555   : > { %v13357_v6 = vpop.f32.mrb[43].mxu0 }
 0x558   : > { %v13359_v2 = vpop.f32.mrb[44].mxu0 }
 0x559   : > { %v13361_v55 = vpop.f32.mrb[45].mxu0 }
 0x55c   : > { %v13363_v3 = vpop.f32.mrb[46].mxu0 }
 0x55d   : > { %v13365_v56 = vpop.f32.mrb[47].mxu0 }
 0x560   : > { %v13367_v5 = vpop.f32.mrb[48].mxu0 }
 0x561   : > { %v13369_v27 = vpop.f32.mrb[49].mxu0 }
 0x564   : > { %v13371_v30 = vpop.f32.mrb[50].mxu0 }
 0x565   : > { %v13373_v61 = vpop.f32.mrb[51].mxu0 }
 0x568   : > { %v13375_v31 = vpop.f32.mrb[52].mxu0 }
 0x569   : > { %v13377_v0 = vpop.f32.mrb[53].mxu0 }
 0x56c   : > { %v13379_v4 = vpop.f32.mrb[54].mxu0 }
 0x56d   : > { %v13381_v1 = vpop.f32.mrb[55].mxu0 }
 0x570   : > { %v13383_v7 = vpop.f32.mrb[56].mxu0 }
 0x571   : > { %v13385_v58 = vpop.f32.mrb[57].mxu0 }
 0x574   : > { %v13387_v47 = vpop.f32.mrb[58].mxu0 }
 0x575   : > { %v13389_v62 = vpop.f32.mrb[59].mxu0 }
 0x578   : > { %v13391_v19 = vpop.f32.mrb[60].mxu0 }
 0x579   : > { %v13393_v49 = vpop.f32.mrb[61].mxu0 }
 0x57c   : > { %v13395_v23 = vpop.f32.mrb[62].mxu0 }
 0x57d   : > { %v13397_v24 = vpop.f32.mrb[63].mxu0 }
 0x5c2   : > { %v10574_v59 = vpop.f32.mrb[8].mxu1 }
 0x5c3   : > { %v7404_v53 = vadd.f32 %v10574_v59, %v13405_v15  ;;  %v7205_v38 = vpop.f32.mrb[9].mxu1 }
 0x5c4   : > { %v7403_v54 = vadd.f32 %v13405_v15, %v7205_v38 }
 0x5c5   : > { %vm7436_vm0 = vcmp.ge.f32.partialorder %v7404_v53, 0.0  ;;  %v7468_v50 = vmul.f32 0.2, %v7404_v53 }
 0x5c6   : > { %vm7435_vm1 = vcmp.ge.f32.partialorder %v7403_v54, 0.0  ;;  %v7467_v41 = vmul.f32 0.2, %v7403_v54  ;;  %v10577_v42 = vpop.f32.mrb[10].mxu1 }
 0x5c7   : > { %v7500_v44 = vsel %vm7436_vm0, %v7404_v53, %v7468_v50  ;;  %v7406_v48 = vadd.f32 %v10577_v42, %v13405_v15  ;;  %v7215_v10 = vpop.f32.mrb[11].mxu1 }
 0x5c8   : > { %v7896_v12 = vadd.f32 %v7742_v39, %v7500_v44  ;;  %v7499_v22 = vsel %vm7435_vm1, %v7403_v54, %v7467_v41  ;;  %v7405_v25 = vadd.f32 %v13405_v15, %v7215_v10  ;;  %v7767_v44 = vadd.f32 %v13410_v34, %v13349_v51 }
 0x5c9   : > { %v7895_v52 = vadd.f32 %v7737_v40, %v7499_v22  ;;  %vm7438_vm10 = vcmp.ge.f32.partialorder %v7406_v48, 0.0  ;;  %v7470_v32 = vmul.f32 0.2, %v7406_v48  ;;  %v7782_v51 = vadd.f32 %v13351_v45, %v13410_v34 }
 0x5ca   : > { %v13420_v9 = vmul.f32 0.70710677, %v7896_v12  ;;  %vm7437_vm11 = vcmp.ge.f32.partialorder %v7405_v25, 0.0  ;;  %v7469_v11 = vmul.f32 0.2, %v7405_v25  ;;  %v10580_v18 = vpop.f32.mrb[12].mxu1 }
 0x5cb   : > { %v13422_v20 = vmul.f32 0.70710677, %v7895_v52  ;;  %v7502_v35 = vsel %vm7438_vm10, %v7406_v48, %v7470_v32  ;;  %v7408_v37 = vadd.f32 %v10580_v18, %v13405_v15  ;;  %v7225_v60 = vpop.f32.mrb[13].mxu1 }
 0x5cc   : > { %v7898_v33 = vadd.f32 %v7752_v43, %v7502_v35  ;;  %v7501_v14 = vsel %vm7437_vm11, %v7405_v25, %v7469_v11  ;;  %v7407_v16 = vadd.f32 %v13405_v15, %v7225_v60 }
 0x5cd   : > { %v10672_v26 = vpack.c.bf16 %v13420_v9, %v13422_v20  ;;  %v7897_v36 = vadd.f32 %v7747_v57, %v7501_v14  ;;  %vm7440_vm12 = vcmp.ge.f32.partialorder %v7408_v37, 0.0  ;;  %v7472_v21 = vmul.f32 0.2, %v7408_v37 }
 0x5ce   : > { %v13431_v59 = vmul.f32 0.70710677, %v7898_v33  ;;  %vm7439_vm13 = vcmp.ge.f32.partialorder %v7407_v16, 0.0  ;;  %v7471_v53 = vmul.f32 0.2, %v7407_v16  ;;  %v10583_v38 = vpop.f32.mrb[14].mxu1  ;;  %v7862_v9 = vadd.f32 %v13383_v7, %v13410_v34 }
 0x5cf   : > { %v13433_v54 = vmul.f32 0.70710677, %v7897_v36  ;;  %v7504_v46 = vsel %vm7440_vm12, %v7408_v37, %v7472_v21  ;;  %v7410_v39 = vadd.f32 %v10583_v38, %v13405_v15  ;;  %v7235_v50 = vpop.f32.mrb[15].mxu1  ;;  %v7777_v37 = vadd.f32 %v13410_v34, %v13353_v28 }
 0x5d0   : > { %v7900_v40 = vadd.f32 %v7762_v63, %v7504_v46  ;;  %v7503_v41 = vsel %vm7439_vm13, %v7407_v16, %v7471_v53  ;;  %v7409_v42 = vadd.f32 %v13405_v15, %v7235_v50  ;;  %v7792_v28 = vadd.f32 %v13355_v17, %v13410_v34 }
 0x5d1   : > { %v10676_v48 = vpack.c.bf16 %v13431_v59, %v13433_v54  ;;  %v7899_v10 = vadd.f32 %v7757_v8, %v7503_v41  ;;  %vm7442_vm14 = vcmp.ge.f32.partialorder %v7410_v39, 0.0  ;;  %v7474_v12 = vmul.f32 0.2, %v7410_v39 }
 0x5d2   : > { %v13443_v22 = vmul.f32 0.70710677, %v7900_v40  ;;  %vm7441_vm15 = vcmp.ge.f32.partialorder %v7409_v42, 0.0  ;;  %v7473_v25 = vmul.f32 0.2, %v7409_v42  ;;  %v10586_v43 = vpop.f32.mrb[16].mxu1  ;;  %v7787_v50 = vadd.f32 %v13410_v34, %v13357_v6 }
 0x5d3   : > { %v13445_v52 = vmul.f32 0.70710677, %v7899_v10  ;;  %v7506_v13 = vsel %vm7442_vm14, %v7410_v39, %v7474_v12  ;;  %v7412_v32 = vadd.f32 %v10586_v43, %v13405_v15  ;;  %v7245_v57 = vpop.f32.mrb[17].mxu1  ;;  %v7802_v6 = vadd.f32 %v13359_v2, %v13410_v34 }
 0x5d4   : > { %v7902_v11 = vadd.f32 %v7772_v29, %v7506_v13  ;;  %v7505_v18 = vsel %vm7441_vm15, %v7409_v42, %v7473_v25  ;;  %v7411_v35 = vadd.f32 %v13405_v15, %v7245_v57  ;;  %v7872_v59 = vadd.f32 %v13387_v47, %v13410_v34 }
 0x5d5   : > { %v10680_v60 = vpack.c.bf16 %v13443_v22, %v13445_v52  ;;  %v7901_v63 = vadd.f32 %v7767_v44, %v7505_v18  ;;  %vm7444_vm3 = vcmp.ge.f32.partialorder %v7412_v32, 0.0  ;;  %v7476_v33 = vmul.f32 0.2, %v7412_v32 }
 0x5d6   : > { %v13455_v14 = vmul.f32 0.70710677, %v7902_v11  ;;  %vm7443_vm4 = vcmp.ge.f32.partialorder %v7411_v35, 0.0  ;;  %v7475_v16 = vmul.f32 0.2, %v7411_v35  ;;  %v10589_v8 = vpop.f32.mrb[18].mxu1  ;;  %v7882_v22 = vadd.f32 %v13391_v19, %v13410_v34 }
 0x5d7   : > { %v13457_v36 = vmul.f32 0.70710677, %v7901_v63  ;;  %v7508_v45 = vsel %vm7444_vm3, %v7412_v32, %v7476_v33  ;;  %v7414_v21 = vadd.f32 %v10589_v8, %v13405_v15  ;;  %v7255_v53 = vpop.f32.mrb[19].mxu1 }
 0x5d8   : > { %v7904_v38 = vadd.f32 %v7782_v51, %v7508_v45  ;;  %v7507_v46 = vsel %vm7443_vm4, %v7411_v35, %v7475_v16  ;;  %v7413_v39 = vadd.f32 %v13405_v15, %v7255_v53  ;;  %v7797_v51 = vadd.f32 %v13410_v34, %v13361_v55 }
 0x5d9   : > { %v10684_v29 = vpack.c.bf16 %v13455_v14, %v13457_v36  ;;  %v7903_v40 = vadd.f32 %v7777_v37, %v7507_v46  ;;  %vm7446_vm5 = vcmp.ge.f32.partialorder %v7414_v21, 0.0  ;;  %v7478_v41 = vmul.f32 0.2, %v7414_v21 }
 0x5da   : > { %v13467_v42 = vmul.f32 0.70710677, %v7904_v38  ;;  %vm7445_vm6 = vcmp.ge.f32.partialorder %v7413_v39, 0.0  ;;  %v7477_v44 = vmul.f32 0.2, %v7413_v39  ;;  %v10592_v10 = vpop.f32.mrb[20].mxu1  ;;  %v7812_v55 = vadd.f32 %v13363_v3, %v13410_v34 }
 0x5db   : > { %v13469_v12 = vmul.f32 0.70710677, %v7903_v40  ;;  %v7510_v17 = vsel %vm7446_vm5, %v7414_v21, %v7478_v41  ;;  %v7416_v25 = vadd.f32 %v10592_v10, %v13405_v15  ;;  %v7265_v43 = vpop.f32.mrb[21].mxu1  ;;  %v7807_v38 = vadd.f32 %v13410_v34, %v13365_v56 }
 0x5dc   : > { %v7906_v13 = vadd.f32 %v7792_v28, %v7510_v17  ;;  %v7509_v32 = vsel %vm7445_vm6, %v7413_v39, %v7477_v44  ;;  %v7415_v57 = vadd.f32 %v13405_v15, %v7265_v43  ;;  %v7822_v56 = vadd.f32 %v13367_v5, %v13410_v34 }
 0x5dd   : > { %v10688_v11 = vpack.c.bf16 %v13467_v42, %v13469_v12  ;;  %v7905_v18 = vadd.f32 %v7787_v50, %v7509_v32  ;;  %vm7448_vm7 = vcmp.ge.f32.partialorder %v7416_v25, 0.0  ;;  %v7480_v35 = vmul.f32 0.2, %v7416_v25 }
 0x5de   : > { %v13479_v37 = vmul.f32 0.70710677, %v7906_v13  ;;  %vm7447_vm8 = vcmp.ge.f32.partialorder %v7415_v57, 0.0  ;;  %v7479_v63 = vmul.f32 0.2, %v7415_v57  ;;  %v10595_v33 = vpop.f32.mrb[22].mxu1  ;;  %v7817_v32 = vadd.f32 %v13410_v34, %v13369_v27 }
 0x5df   : > { %v13481_v16 = vmul.f32 0.70710677, %v7905_v18  ;;  %v7512_v2 = vsel %vm7448_vm7, %v7416_v25, %v7480_v35  ;;  %v7418_v8 = vadd.f32 %v10595_v33, %v13405_v15  ;;  %v7275_v45 = vpop.f32.mrb[23].mxu1  ;;  %v7832_v27 = vadd.f32 %v13371_v30, %v13410_v34 }
 0x5e0   : > { %v7908_v21 = vadd.f32 %v7802_v6, %v7512_v2  ;;  %v7511_v53 = vsel %vm7447_vm8, %v7415_v57, %v7479_v63  ;;  %v7417_v28 = vadd.f32 %v13405_v15, %v7275_v45  ;;  %v7892_v14 = vadd.f32 %v13395_v23, %v13410_v34 }
 0x5e1   : > { %v10692_v46 = vpack.c.bf16 %v13479_v37, %v13481_v16  ;;  %v7907_v39 = vadd.f32 %v7797_v51, %v7511_v53  ;;  %vm7450_vm9 = vcmp.ge.f32.partialorder %v7418_v8, 0.0  ;;  %v7482_v50 = vmul.f32 0.2, %v7418_v8  ;;  %v7962_v37 = vld [vmem:[%s13700_s7 + $0x18] sm:$0xff]  ;;  %v7961_v16 = vld [vmem:[%s13700_s7 + $0x10] sm:$0xff] }
 0x5e2   : > { %v13491_v40 = vmul.f32 0.70710677, %v7908_v21  ;;  %vm7449_vm0 = vcmp.ge.f32.partialorder %v7417_v28, 0.0  ;;  %v7481_v41 = vmul.f32 0.2, %v7417_v28  ;;  %v10598_v44 = vpop.f32.mrb[24].mxu1 }
 0x5e3   : > { %v13493_v10 = vmul.f32 0.70710677, %v7907_v39  ;;  %v7514_v3 = vsel %vm7450_vm9, %v7418_v8, %v7482_v50  ;;  %v7420_v17 = vadd.f32 %v10598_v44, %v13405_v15  ;;  %v7285_v25 = vpop.f32.mrb[25].mxu1 }
 0x5e4   : > { %v7910_v43 = vadd.f32 %v7812_v55, %v7514_v3  ;;  %v7513_v6 = vsel %vm7449_vm0, %v7417_v28, %v7481_v41  ;;  %v7419_v13 = vadd.f32 %v13405_v15, %v7285_v25  ;;  %v7827_v28 = vadd.f32 %v13410_v34, %v13373_v61 }
 0x5e5   : > { %v10696_v57 = vpack.c.bf16 %v13491_v40, %v13493_v10  ;;  %v7909_v51 = vadd.f32 %v7807_v38, %v7513_v6  ;;  %vm7452_vm1 = vcmp.ge.f32.partialorder %v7420_v17, 0.0  ;;  %v7484_v18 = vmul.f32 0.2, %v7420_v17  ;;  %v7963_v40 = vld [vmem:[%s13700_s7 + $0x20] sm:$0xff]  ;;  %v7966_v10 = vld [vmem:[%s13700_s7 + $0x38] sm:$0xff] }
 0x5e6   : > { %v13503_v35 = vmul.f32 0.70710677, %v7910_v43  ;;  %vm7451_vm10 = vcmp.ge.f32.partialorder %v7419_v13, 0.0  ;;  %v7483_v63 = vmul.f32 0.2, %v7419_v13  ;;  %v10601_v33 = vpop.f32.mrb[26].mxu1  ;;  %v7842_v43 = vadd.f32 %v13375_v31, %v13410_v34 }
 0x5e7   : > { %v13505_v2 = vmul.f32 0.70710677, %v7909_v51  ;;  %v7516_v5 = vsel %vm7452_vm1, %v7420_v17, %v7484_v18  ;;  %v7422_v8 = vadd.f32 %v10601_v33, %v13405_v15  ;;  %v7295_v45 = vpop.f32.mrb[27].mxu1 }
 0x5e8   : > { %v7912_v55 = vadd.f32 %v7822_v56, %v7516_v5  ;;  %v7515_v21 = vsel %vm7451_vm10, %v7419_v13, %v7483_v63  ;;  %v7421_v53 = vadd.f32 %v13405_v15, %v7295_v45 }
 0x5e9   : > { %v10700_v38 = vpack.c.bf16 %v13503_v35, %v13505_v2  ;;  %v7911_v39 = vadd.f32 %v7817_v32, %v7515_v21  ;;  %vm7454_vm11 = vcmp.ge.f32.partialorder %v7422_v8, 0.0  ;;  %v7486_v50 = vmul.f32 0.2, %v7422_v8  ;;  %v7968_v35 = vld [vmem:[%s13700_s7 + $0x48] sm:$0xff]  ;;  %v7967_v2 = vld [vmem:[%s13700_s7 + $0x40] sm:$0xff] }
 0x5ea   : > { %v7944_v41 = vmul.f32 0.70710677, %v7912_v55  ;;  %vm7453_vm12 = vcmp.ge.f32.partialorder %v7421_v53, 0.0  ;;  %v7485_v44 = vmul.f32 0.2, %v7421_v53  ;;  %v10604_v3 = vpop.f32.mrb[28].mxu1  ;;  %v7837_v32 = vadd.f32 %v13410_v34, %v13377_v0 }
 0x5eb   : > { %v7943_v17 = vmul.f32 0.70710677, %v7911_v39  ;;  %v7518_v25 = vsel %vm7454_vm11, %v7422_v8, %v7486_v50  ;;  %v7424_v30 = vadd.f32 %v10604_v3, %v13405_v15  ;;  %v7305_v56 = vpop.f32.mrb[29].mxu1 }
 0x5ec   : > { %v7914_v6 = vadd.f32 %v7832_v27, %v7518_v25  ;;  %v7517_v61 = vsel %vm7453_vm12, %v7421_v53, %v7485_v44  ;;  %v7423_v13 = vadd.f32 %v13405_v15, %v7305_v56  ;;  %v7852_v27 = vadd.f32 %v13379_v4, %v13410_v34 }
 0x5ed   : > { %vm7456_vm13 = vcmp.ge.f32.partialorder %v7424_v30, 0.0  ;;  %v7488_v51 = vmul.f32 0.2, %v7424_v30  ;;  %v7913_v18 = vadd.f32 %v7827_v28, %v7517_v61  ;;  %v10670_v63 = vpack.c.bf16 %v7944_v41, %v7943_v17 }
 0x5ee   : > { %v7946_v33 = vmul.f32 0.70710677, %v7914_v6  ;;  %vm7455_vm14 = vcmp.ge.f32.partialorder %v7423_v13, 0.0  ;;  %v7487_v5 = vmul.f32 0.2, %v7423_v13  ;;  %v10607_v8 = vpop.f32.mrb[30].mxu1  ;;  %v7847_v28 = vadd.f32 %v13410_v34, %v13381_v1 }
 0x5ef   : > { %v7945_v45 = vmul.f32 0.70710677, %v7913_v18  ;;  %v7520_v55 = vsel %vm7456_vm13, %v7424_v30, %v7488_v51  ;;  %v7426_v21 = vadd.f32 %v10607_v8, %v13405_v15  ;;  %v7315_v31 = vpop.f32.mrb[31].mxu1  ;;  %10671 = vmatprep.subr.bf16.mxu1 %v10670_v63  ;;  %v7857_v6 = vadd.f32 %v13410_v34, %v13385_v58 }
 0x5f0   : > { %v7916_v53 = vadd.f32 %v7842_v43, %v7520_v55  ;;  %v7519_v39 = vsel %vm7455_vm14, %v7423_v13, %v7487_v5  ;;  %v7425_v0 = vadd.f32 %v13405_v15, %v7315_v31  ;;  %10673 = vmatpush3.bf16.msra.mxu1 %v10672_v26 }
 0x5f1   : > { %vm7458_vm15 = vcmp.ge.f32.partialorder %v7426_v21, 0.0  ;;  %v7490_v50 = vmul.f32 0.2, %v7426_v21  ;;  %v7915_v41 = vadd.f32 %v7837_v32, %v7519_v39  ;;  %v10674_v44 = vpack.c.bf16 %v7946_v33, %v7945_v45 }
 0x5f2   : > { %v7948_v3 = vmul.f32 0.70710677, %v7916_v53  ;;  %vm7457_vm3 = vcmp.ge.f32.partialorder %v7425_v0, 0.0  ;;  %v7489_v17 = vmul.f32 0.2, %v7425_v0  ;;  %v10610_v25 = vpop.f32.mrb[32].mxu1  ;;  %v7867_v45 = vadd.f32 %v13410_v34, %v13389_v62 }
 0x5f3   : > { %v7947_v4 = vmul.f32 0.70710677, %v7915_v41  ;;  %v7522_v30 = vsel %vm7458_vm15, %v7426_v21, %v7490_v50  ;;  %v7428_v56 = vadd.f32 %v10610_v25, %v13405_v15  ;;  %v7325_v43 = vpop.f32.mrb[33].mxu1  ;;  %10675 = vmatprep.subr.bf16.mxu1 %v10674_v44  ;;  %v7877_v41 = vadd.f32 %v13410_v34, %v13393_v49 }
 0x5f4   : > { %v7918_v20 = vadd.f32 %v7852_v27, %v7522_v30  ;;  %v7521_v26 = vsel %vm7457_vm3, %v7425_v0, %v7489_v17  ;;  %v7427_v1 = vadd.f32 %v13405_v15, %v7325_v43  ;;  %10677 = vmatpush3.bf16.msra.mxu1 %v10676_v48 }
 0x5f5   : > { %vm7460_vm4 = vcmp.ge.f32.partialorder %v7428_v56, 0.0  ;;  %v7492_v61 = vmul.f32 0.2, %v7428_v56  ;;  %v7917_v13 = vadd.f32 %v7847_v28, %v7521_v26  ;;  %v10678_v32 = vpack.c.bf16 %v7948_v3, %v7947_v4 }
 0x5f6   : > { %v7950_v51 = vmul.f32 0.70710677, %v7918_v20  ;;  %vm7459_vm5 = vcmp.ge.f32.partialorder %v7427_v1, 0.0  ;;  %v7491_v18 = vmul.f32 0.2, %v7427_v1  ;;  %v10613_v63 = vpop.f32.mrb[34].mxu1  ;;  %v7887_v20 = vadd.f32 %v13410_v34, %v13397_v24 }
 0x5f7   : > { %v7949_v7 = vmul.f32 0.70710677, %v7917_v13  ;;  %v7524_v33 = vsel %vm7460_vm4, %v7428_v56, %v7492_v61  ;;  %v7430_v5 = vadd.f32 %v10613_v63, %v13405_v15  ;;  %v7335_v8 = vpop.f32.mrb[35].mxu1  ;;  %10679 = vmatprep.subr.bf16.mxu1 %v10678_v32  ;;  %v7969_v63 = vld [vmem:[%s13700_s7 + $0x50] sm:$0xff] }
 0x5f8   : > { %v7920_v54 = vadd.f32 %v7862_v9, %v7524_v33  ;;  %v7523_v48 = vsel %vm7459_vm5, %v7427_v1, %v7491_v18  ;;  %v7429_v58 = vadd.f32 %v13405_v15, %v7335_v8  ;;  %10681 = vmatpush3.bf16.msra.mxu1 %v10680_v60  ;;  %v7971_v33 = vld [vmem:[%s13700_s7 + $0x60] sm:$0xff]  ;;  %v7973_v8 = vld [vmem:[%s13700_s7 + $0x70] sm:$0xff] }
 0x5f9   : > { %vm7462_vm6 = vcmp.ge.f32.partialorder %v7430_v5, 0.0  ;;  %v7494_v55 = vmul.f32 0.2, %v7430_v5  ;;  %v7919_v21 = vadd.f32 %v7857_v6, %v7523_v48  ;;  %v10682_v31 = vpack.c.bf16 %v7950_v51, %v7949_v7  ;;  %v7972_v7 = vld [vmem:[%s13700_s7 + $0x68] sm:$0xff] }
 0x5fa   : > { %v7952_v27 = vmul.f32 0.70710677, %v7920_v54  ;;  %vm7461_vm7 = vcmp.ge.f32.partialorder %v7429_v58, 0.0  ;;  %v7493_v53 = vmul.f32 0.2, %v7429_v58  ;;  %v10616_v39 = vpop.f32.mrb[36].mxu1 }
 0x5fb   : > { %v7951_v47 = vmul.f32 0.70710677, %v7919_v21  ;;  %v7526_v0 = vsel %vm7462_vm6, %v7430_v5, %v7494_v55  ;;  %v7432_v28 = vadd.f32 %v10616_v39, %v13405_v15  ;;  %v7345_v50 = vpop.f32.mrb[37].mxu1  ;;  %10683 = vmatprep.subr.bf16.mxu1 %v10682_v31  ;;  %v7974_v5 = vld [vmem:[%s13700_s7 + $0x78] sm:$0xff] }
 0x5fc   : > { %v7922_v52 = vadd.f32 %v7872_v59, %v7526_v0  ;;  %v7525_v60 = vsel %vm7461_vm7, %v7429_v58, %v7493_v53  ;;  %v7431_v62 = vadd.f32 %v13405_v15, %v7345_v50  ;;  %10685 = vmatpush3.bf16.msra.mxu1 %v10684_v29 }
 0x5fd   : > { %vm7464_vm8 = vcmp.ge.f32.partialorder %v7432_v28, 0.0  ;;  %v7496_v44 = vmul.f32 0.2, %v7432_v28  ;;  %v7921_v3 = vadd.f32 %v7867_v45, %v7525_v60  ;;  %v10686_v17 = vpack.c.bf16 %v7952_v27, %v7951_v47 }
 0x5fe   : > { %v7954_v25 = vmul.f32 0.70710677, %v7922_v52  ;;  %vm7463_vm9 = vcmp.ge.f32.partialorder %v7431_v62, 0.0  ;;  %v7495_v4 = vmul.f32 0.2, %v7431_v62  ;;  %v10619_v30 = vpop.f32.mrb[38].mxu1 }
 0x5ff   : > { %v7953_v19 = vmul.f32 0.70710677, %v7921_v3  ;;  %v7528_v56 = vsel %vm7464_vm8, %v7432_v28, %v7496_v44  ;;  %v7434_v43 = vadd.f32 %v10619_v30, %v13405_v15  ;;  %v7355_v9 = vpop.f32.mrb[39].mxu1  ;;  %10687 = vmatprep.subr.bf16.mxu1 %v10686_v17 }
 0x600   : > { %v7924_v36 = vadd.f32 %v7882_v22, %v7528_v56  ;;  %v7527_v29 = vsel %vm7463_vm9, %v7431_v62, %v7495_v4  ;;  %v7433_v49 = vadd.f32 %v13405_v15, %v7355_v9  ;;  %10689 = vmatpush3.bf16.msra.mxu1 %v10688_v11  ;;  %v7959_v11 = vld [vmem:[%s13700_s7] sm:$0xff] }
 0x601   : > { %vm7466_vm0 = vcmp.ge.f32.partialorder %v7434_v43, 0.0  ;;  %v7498_v26 = vmul.f32 0.2, %v7434_v43  ;;  %v7923_v1 = vadd.f32 %v7877_v41, %v7527_v29  ;;  %v10690_v6 = vpack.c.bf16 %v7954_v25, %v7953_v19 }
 0x602   : > { %v7956_v61 = vmul.f32 0.70710677, %v7924_v36  ;;  %vm7465_vm1 = vcmp.ge.f32.partialorder %v7433_v49, 0.0  ;;  %v7497_v13 = vmul.f32 0.2, %v7433_v49 }
 0x603   : > { %v7955_v32 = vmul.f32 0.70710677, %v7923_v1  ;;  %v7530_v23 = vsel %vm7466_vm0, %v7434_v43, %v7498_v26  ;;  %10691 = vmatprep.subr.bf16.mxu1 %v10690_v6 }
 0x604   : > { %v7926_v51 = vadd.f32 %v7892_v14, %v7530_v23  ;;  %v7529_v18 = vsel %vm7465_vm1, %v7433_v49, %v7497_v13  ;;  %10693 = vmatpush3.bf16.msra.mxu1 %v10692_v46  ;;  %v7964_v46 = vld [vmem:[%s13700_s7 + $0x28] sm:$0xff] }
 0x605   : > { %v7925_v15 = vadd.f32 %v7887_v20, %v7529_v18  ;;  %v10694_v42 = vpack.c.bf16 %v7956_v61, %v7955_v32 }
 0x606   : > { %v7958_v12 = vmul.f32 0.70710677, %v7926_v51 }
 0x607   : > { %v7957_v24 = vmul.f32 0.70710677, %v7925_v15  ;;  %10695 = vmatprep.subr.bf16.mxu1 %v10694_v42 }
 0x608   : > { %10697 = vmatpush3.bf16.msra.mxu1 %v10696_v57  ;;  %v7965_v57 = vld [vmem:[%s13700_s7 + $0x30] sm:$0xff] }
 0x609   : > { %v10698_v34 = vpack.c.bf16 %v7958_v12, %v7957_v24 }
 0x60b   : > { %10699 = vmatprep.subr.bf16.mxu1 %v10698_v34 }
 0x60c   : > { %10701 = vmatpush3.bf16.msra.mxu1 %v10700_v38  ;;  %v7970_v38 = vld [vmem:[%s13700_s7 + $0x58] sm:$0xff] }
 0x60f   : > { %8040 = vmatmul.mubr.f32.vlgmr.msra.gmra.mrb[40].mxu1 %v7959_v11 }
 0x610   : > { %8044 = vmatprep.mubr.f32.mxu1 %v7962_v37 }
 0x613   : > { %8045 = vmatmul.mubr.f32.gmra.mrb[42].mxu1 %v7961_v16 }
 0x614   : > { %8049 = vmatprep.mubr.f32.mxu1 %v7964_v46 }
 0x617   : > { %8050 = vmatmul.mubr.f32.gmra.mrb[44].mxu1 %v7963_v40 }
 0x618   : > { %8054 = vmatprep.mubr.f32.mxu1 %v7966_v10 }
 0x61b   : > { %8055 = vmatmul.mubr.f32.gmra.mrb[46].mxu1 %v7965_v57 }
 0x61c   : > { %8059 = vmatprep.mubr.f32.mxu1 %v7968_v35 }
 0x61f   : > { %8060 = vmatmul.mubr.f32.gmra.mrb[48].mxu1 %v7967_v2 }
 0x620   : > { %8064 = vmatprep.mubr.f32.mxu1 %v7970_v38 }
 0x623   : > { %8065 = vmatmul.mubr.f32.gmra.mrb[50].mxu1 %v7969_v63 }
 0x624   : > { %8069 = vmatprep.mubr.f32.mxu1 %v7972_v7 }
 0x627   : > { %8070 = vmatmul.mubr.f32.gmra.mrb[52].mxu1 %v7971_v33 }
 0x628   : > { %8074 = vmatprep.mubr.f32.mxu1 %v7974_v5 }
 0x62b   : > { %8075 = vmatmul.mubr.f32.gmra.mrb[54].mxu1 %v7973_v8 }
 0x6e2   : > { %v9696_v59 = vpop.f32.mrb[40].mxu1 }
 0x6e3   : > { %v9697_v54 = vpop.f32.mrb[41].mxu1 }
 0x6e4   : > { %v9698_v48 = vadd.f32 %v9697_v54, %v9696_v59 }
 0x6e6   : > { %8080 = vst.msk [vmem:[%s13623_s24] sm:$0xff] %vm3888_vm2, %v9698_v48  ;;  %v9699_v58 = vpop.f32.mrb[42].mxu1 }
 0x6e7   : > { %v9700_v45 = vpop.f32.mrb[43].mxu1 }
 0x6e8   : > { %v9701_v55 = vadd.f32 %v9700_v45, %v9699_v58 }
 0x6ea   : > { %8081 = vst.msk [vmem:[%s13623_s24 + $0x8] sm:$0xff] %vm3888_vm2, %v9701_v55  ;;  %v9702_v21 = vpop.f32.mrb[44].mxu1 }
 0x6eb   : > { %v9703_v31 = vpop.f32.mrb[45].mxu1 }
 0x6ec   : > { %v9704_v27 = vadd.f32 %v9703_v31, %v9702_v21 }
 0x6ee   : > { %8082 = vst.msk [vmem:[%s13623_s24 + $0x10] sm:$0xff] %vm3888_vm2, %v9704_v27  ;;  %v9705_v53 = vpop.f32.mrb[46].mxu1 }
 0x6ef   : > { %v9706_v39 = vpop.f32.mrb[47].mxu1 }
 0x6f0   : > { %v9707_v47 = vadd.f32 %v9706_v39, %v9705_v53 }
 0x6f2   : > { %8083 = vst.msk [vmem:[%s13623_s24 + $0x18] sm:$0xff] %vm3888_vm2, %v9707_v47  ;;  %v9708_v0 = vpop.f32.mrb[48].mxu1 }
 0x6f3   : > { %v9709_v28 = vpop.f32.mrb[49].mxu1 }
 0x6f4   : > { %v9710_v50 = vadd.f32 %v9709_v28, %v9708_v0 }
 0x6f6   : > { %8084 = vst.msk [vmem:[%s13623_s24 + $0x20] sm:$0xff] %vm3888_vm2, %v9710_v50  ;;  %v9711_v22 = vpop.f32.mrb[50].mxu1 }
 0x6f7   : > { %v9712_v52 = vpop.f32.mrb[51].mxu1 }
 0x6f8   : > { %v9713_v60 = vadd.f32 %v9712_v52, %v9711_v22 }
 0x6fa   : > { %8085 = vst.msk [vmem:[%s13623_s24 + $0x28] sm:$0xff] %vm3888_vm2, %v9713_v60  ;;  %v9714_v62 = vpop.f32.mrb[52].mxu1 }
 0x6fb   : > { %v9715_v41 = vpop.f32.mrb[53].mxu1 }
 0x6fc   : > { %v9716_v44 = vadd.f32 %v9715_v41, %v9714_v62 }
 0x6fe   : > { %8086 = vst.msk [vmem:[%s13623_s24 + $0x30] sm:$0xff] %vm3888_vm2, %v9716_v44  ;;  %v9717_v3 = vpop.f32.mrb[54].mxu1 }
 0x6ff   : > { %v9718_v17 = vpop.f32.mrb[55].mxu1 }
 0x700   : > { %v9719_v25 = vadd.f32 %v9718_v17, %v9717_v3 }
 0x702   : > { %8087 = vst.msk [vmem:[%s13623_s24 + $0x38] sm:$0xff] %vm3888_vm2, %v9719_v25 }
 0x703   : > { %11272 = shalt.err (!%p11269_p3)
}
 0x704   : > { %s11273_s21 = scalar_lea.hbm %s13644_s13, 1024  ;;  %s11277_s24 = scalar_lea.hbm %s13701_s8, 2048 }
 0x705   : > { %p11274_p4 = scmp.ne.s32.totalorder %s13644_s13, %s11273_s21  ;;  %p11278_p9 = scmp.lt.u32.totalorder %s13644_s13, %s13701_s8 }
 0x706   : > { %p11279_p10 = scmp.lt.u32.totalorder %s11277_s24, %s11273_s21  ;;  %p11281_p12 = scmp.lt.u32.totalorder %s11273_s21, %s13644_s13 }
 0x707   : > { %p11275_p7 = pnand %p11274_p4, %p11410_p5 }
 0x708   : > { %p11280_p11 = por %p11279_p10, %p11278_p9 }
 0x709   : > { %p11276_p8 = pneg %p11275_p7 }
 0x70a   : > { %p11282_p13 = por %p11281_p12, %p11280_p11 }
 0x70c   : > { %p11283_p0 = pnand %p11282_p13, %p11276_p8 }
 0x70e   : > { %11286 = shalt.err (!%p11283_p0)
}
 0x70f   : > { %s11325_s12 = smov 128   ;;  %s11326_s17 = smov 8  }
 0x710   : > { %11217 = dma.vmem_to_hbm [thread:$0]  (%p11410_p5), %s13646_s26, 1024, %s13644_s13, %s13652_s9, %s11325_s12, %s11325_s12, %s11326_s17  }
 0x711 PF: > { %p11223_p1 = scmp.ge.s32.totalorder %s11321_s30, 2  ;;  %s8117_s18 = sand.u32 1, %s11309_s27  }
 0x712   : > { %s8118_s19 = scalar_lea.sflag [#allocation4], %s8117_s18 }
 0x713   : > { %p11220_p2 = pnand %p11223_p1, %p11414_p6 }
 0x715   : > { %11304 = dma.done.wait (!%p11220_p2), %s8118_s19, 1024  }
 0x716   : > { %11306 = vsyncadd (!%p11220_p2), %s8118_s19, 4294966272  ;;  %p18_p3 = scmp.ge.s32.totalorder %s11397_s11, 4   ;;  %s13990_s27 = smov %s11313_s28 }
 0x717   : > { %s13991_s28 = smov %s11317_s29  ;;  %s13992_s29 = smov %s11408_s14 }
 0x718   : > { %s13993_s30 = smov %s11397_s11  ;;  %20 = sbr.rel (!%p18_p3) target bundleno = 3 (0x3), region = 107 }
 0x71f   :  { %8123 = vsyncpa [#allocation4], 1 }
 0x720   :  { %8125 = vsyncpa [#allocation4 + $0x1], 1 }

</bundles_post_ra>
